<compile_context>
chip_gen: v7x
topology: tpu7x:2x2x1
jax: 0.10.0
libtpu: 0.0.40
codegen_flags: <defaults>
</compile_context>

<pallas_src>
import jax
import jax.numpy as jnp
import numpy as np
from jax.experimental import pallas as pl
from jax.experimental.pallas import tpu as pltpu

BN_EPS = 1e-5


# ----------------------------------------------------------------------------
# Kernel
# ----------------------------------------------------------------------------
def _build_kernel(c_in: int, num_layers: int, use_vpu_layer0: bool):
    """Kernel operating on [C, tn] activation tiles; per layer i it receives
    (w_i, vec_i); vec_i = bias [c_i,1] for interior layers, [c_last,3] =
    (bias|scale|shift) for the last layer.  Emits a [tn, c_out] output block."""

    def _epilogue(z, vec, is_last):
        h = jnp.maximum(z + vec[:, 0:1], 0.0)          # +bias, ReLU (f32 VPU)
        if is_last:
            h = h * vec[:, 1:2] + vec[:, 2:3]          # final BN affine
        return h

    def kernel(x_ref, *refs):
        o_ref = refs[-1]
        prefs = refs[:-1]                              # (w0, v0, w1, v1, ...)

        x = x_ref[...]                                 # [c_in, tn] f32
        w0 = prefs[0][...]                             # [c0, c_in] f32
        if use_vpu_layer0:
            # tiny-K contraction as unrolled broadcast-MACs on the VPU
            z = w0[:, 0:1] * x[0:1, :]
            for k in range(1, c_in):
                z = z + w0[:, k:k + 1] * x[k:k + 1, :]
        else:
            z = jnp.dot(w0, x, preferred_element_type=jnp.float32)
        h = _epilogue(z, prefs[1][...], is_last=(num_layers == 1))

        # remaining layers: f32 MXU matmul, f32 accumulate (not MXU-bound here)
        for li in range(1, num_layers):
            w = prefs[2 * li][...]                     # [c_out, c_prev] f32
            z = jnp.dot(w, h, preferred_element_type=jnp.float32)
            h = _epilogue(z, prefs[2 * li + 1][...], is_last=(li == num_layers - 1))

        # Emit [tn, c_out] so the module-facing [N, C_out] layout comes straight
        # out of the kernel (no host-side XLA transpose over HBM).
        o_ref[...] = h.T.astype(o_ref.dtype)

    return kernel


# ----------------------------------------------------------------------------
# Parameters (deterministic), BN fold
# ----------------------------------------------------------------------------
def make_params(key, space_variable, hidden_layers, out_channels):
    """Raw per-layer params: (W [c_out,c_in], bias [c_out,1], bn_scale, bn_shift)."""
    if len(hidden_layers) <= 0:
        hidden_layers = [out_channels]
    dims = [space_variable] + list(hidden_layers) + [out_channels]
    raw = []
    for i in range(len(dims) - 1):
        cin, cout = dims[i], dims[i + 1]
        key, kw, kb, kg, kbe, km, kv = jax.random.split(key, 7)
        w = 0.1 * jax.random.normal(kw, (cout, cin), jnp.float32)
        b = 0.1 * jax.random.normal(kb, (cout, 1), jnp.float32)
        gamma = 1.0 + 0.1 * jax.random.normal(kg, (cout, 1), jnp.float32)
        beta = 0.1 * jax.random.normal(kbe, (cout, 1), jnp.float32)
        run_mean = 0.1 * jax.random.normal(km, (cout, 1), jnp.float32)
        run_var = jnp.abs(jax.random.normal(kv, (cout, 1), jnp.float32)) + 0.5
        scale = gamma / jnp.sqrt(run_var + BN_EPS)     # folded BN (inference)
        shift = beta - run_mean * scale
        raw.append((w, b, scale, shift))
    return raw


def fold_bn(raw):
    """Fold layer i's BN affine into layer i+1's weight/bias (exact, linear):
       W'_{i+1} = W_{i+1} * s_i^T ,  b'_{i+1} = W_{i+1} @ t_i + b_{i+1}.
    Returns ([(W', b')], scale_last, shift_last)."""
    folded = []
    for i, (w, b, _, _) in enumerate(raw):
        if i > 0:
            s_prev, t_prev = raw[i - 1][2], raw[i - 1][3]
            b = b + w @ t_prev
            w = w * s_prev.reshape(1, -1)
        folded.append((w, b))
    return folded, raw[-1][2], raw[-1][3]


# ----------------------------------------------------------------------------
# Generation-aware tiling
# ----------------------------------------------------------------------------
def _round_up(x, m):
    return ((x + m - 1) // m) * m


def _tpu_info():
    """(num_tensorcores, vmem_capacity_bytes) with conservative fallbacks."""
    num_tc, vmem = 1, 64 * 1024 * 1024                 # conservative defaults
    kind = ""
    try:
        kind = jax.devices()[0].device_kind.lower()
    except Exception:
        pass
    if "v7" in kind:
        num_tc, vmem = 2, 64 * 1024 * 1024             # 64 MiB / TensorCore
    elif ("v4" in kind) or ("v5p" in kind) or ("v5 p" in kind):
        num_tc, vmem = 2, 128 * 1024 * 1024            # megacore
    elif ("v5" in kind) or ("v6" in kind):
        num_tc, vmem = 1, 128 * 1024 * 1024
    try:
        info_bytes = int(pltpu.get_tpu_info().vmem_capacity_bytes)
        if info_bytes > 0:
            vmem = min(vmem, info_bytes)
    except Exception:
        pass
    return num_tc, vmem


def _vmem_plan(c_in, widths, vmem_capacity):
    """(tn_cap, vmem_limit_bytes): largest lane-dense point tile that keeps
    2x double-buffered in/out blocks + intermediates inside ~3/4 of VMEM."""
    budget = int(vmem_capacity) * 3 // 4               # headroom for Mosaic scratch
    c_out = widths[-1]
    max_w = max(widths + [c_in])
    # per-point f32 bytes: 2x in blocks + 2x out blocks + ~3 live intermediates
    # of the widest layer + the transposed output copy.
    per_point = 4 * (2 * c_in + 2 * c_out + 3 * max_w + c_out)
    fixed = 2 * 1024 * 1024                            # params + misc slack
    tn_cap = max(128, ((budget - fixed) // per_point) // 128 * 128)
    tn_cap = min(tn_cap, 16384)                        # diminishing returns beyond
    return tn_cap, budget


def _choose_tiling(n, *, num_tc, tn_cap):
    """Pick a lane-dense point tile (multiple of 128) and grid such that
    (a) tn <= tn_cap (per-generation VMEM cap),
    (b) there is at least one step per TensorCore when N allows,
    (c) the grid is a multiple of num_tc where possible (even v7x split),
    (d) N-padding waste is bounded by ~grid*128 columns, never a full big tile."""
    n128 = _round_up(max(int(n), 1), 128)
    max_steps = n128 // 128
    grid = -(-n128 // tn_cap)                          # steps forced by VMEM cap
    grid = max(grid, min(num_tc, max_steps))           # give every TensorCore work
    if grid % num_tc:
        grid += num_tc - grid % num_tc
    grid = min(grid, max_steps)
    grid = max(grid, -(-n128 // tn_cap))               # never exceed the cap
    tn = min(tn_cap, _round_up(-(-n128 // grid), 128))
    grid = -(-n128 // tn)
    return tn, grid, grid * tn


# ----------------------------------------------------------------------------
# Wrapper
# ----------------------------------------------------------------------------
def shared_mlp_forward(x_cn, raw_params, *, out_dtype=jnp.float32):
    """x_cn: [space_variable, N] (what the PyTorch module's Conv1d consumes).
    Returns [N, out_channels] (matching `model(x.unsqueeze(0)).squeeze(0).T`).
    Pass out_dtype=jnp.bfloat16 to halve output HBM bytes if downstream allows."""
    x_cn = jnp.asarray(x_cn, jnp.float32)
    c_in, n = x_cn.shape

    folded, s_last, t_last = fold_bn(raw_params)
    num_layers = len(folded)
    widths = [w.shape[0] for (w, _) in folded]
    c_out = widths[-1]

    num_tc, vmem_cap = _tpu_info()
    tn_cap, vmem_limit = _vmem_plan(c_in, widths, vmem_cap)
    tn, grid, n_pad = _choose_tiling(n, num_tc=num_tc, tn_cap=tn_cap)

    if n_pad != n:
        x_cn = jnp.pad(x_cn, ((0, 0), (0, n_pad - n)))

    params = []
    in_specs = [pl.BlockSpec((c_in, tn), lambda i: (0, i))]
    for li, (w, b) in enumerate(folded):
        w_arr = w.astype(jnp.float32)                  # f32 everywhere (not MXU-bound)
        if li == num_layers - 1:
            vec = jnp.concatenate([b, s_last, t_last], axis=1).astype(jnp.float32)
        else:
            vec = b.astype(jnp.float32)
        params += [w_arr, vec]
        in_specs += [pl.BlockSpec(w_arr.shape, lambda i: (0, 0)),
                     pl.BlockSpec(vec.shape, lambda i: (0, 0))]

    use_vpu_layer0 = (c_in <= 8) and (widths[0] < 128)
    kernel = _build_kernel(c_in, num_layers, use_vpu_layer0)

    out_nc = pl.pallas_call(
        kernel,
        out_shape=jax.ShapeDtypeStruct((n_pad, c_out), out_dtype),
        grid_spec=pltpu.PrefetchScalarGridSpec(
            num_scalar_prefetch=0,
            grid=(grid,),
            in_specs=in_specs,
            out_specs=pl.BlockSpec((tn, c_out), lambda i: (i, 0)),
        ),
        compiler_params=pltpu.CompilerParams(
            dimension_semantics=("parallel",),
            vmem_limit_bytes=int(vmem_limit),
        ),
    )(x_cn, *params)

    # When N is 128-aligned there is no extra HBM pass at all.
    return out_nc if n_pad == n else out_nc[:n]


# ----------------------------------------------------------------------------
# Pure-JAX reference (unfolded, f32 throughout)
# ----------------------------------------------------------------------------
def reference_forward(x_cn, raw_params):
    h = jnp.asarray(x_cn, jnp.float32)
    for (w, b, s, t) in raw_params:
        h = jnp.maximum(w @ h + b, 0.0)
        h = s * h + t
    return h.T


if __name__ == "__main__":
    space_variable = 4
    hidden_layers = [64, 64]
    out_channels = 32

    key = jax.random.PRNGKey(0)
    key, kx1, kx2 = jax.random.split(key, 3)
    raw = make_params(key, space_variable, hidden_layers, out_channels)

    # Module input (what Conv1d sees after unsqueeze(0)): [space_variable, N].
    # Test both a 128-aligned and a non-aligned point count.
    for kx, n_pts in ((kx1, 2048), (kx2, 1000)):
        x = jax.random.normal(kx, (space_variable, n_pts), jnp.float32)
        out = jax.block_until_ready(shared_mlp_forward(x, raw))
        ref = reference_forward(x, raw)
        # f32 end-to-end; tolerance kept modest (2e-3) only to be robust to the
        # MXU's f32 multi-pass mode — typically agreement is ~1e-6.
        np.testing.assert_allclose(np.asarray(out), np.asarray(ref),
                                   rtol=2e-3, atol=2e-3)
        assert out.shape == (n_pts, out_channels)

    # TODO(synk): Dropout / BatchNorm use eval-mode (inference) semantics;
    # training-mode batch statistics and dropout RNG are not modeled.
    print("KERNEL_OK")
</pallas_src>

<mosaic_0001>
module attributes {stable_mosaic.version = 11 : i64} {
  func.func @kernel(%arg0: i32, %arg1: memref<4x2048xf32, #tpu.memory_space<vmem>>, %arg2: memref<64x4xf32, #tpu.memory_space<vmem>>, %arg3: memref<64x1xf32, #tpu.memory_space<vmem>>, %arg4: memref<64x64xf32, #tpu.memory_space<vmem>>, %arg5: memref<64x1xf32, #tpu.memory_space<vmem>>, %arg6: memref<32x64xf32, #tpu.memory_space<vmem>>, %arg7: memref<32x3xf32, #tpu.memory_space<vmem>>, %arg8: memref<2048x32xf32, #tpu.memory_space<vmem>>) attributes {dimension_semantics = [#tpu.dimension_semantics<parallel>], iteration_bounds = array<i64: 1>, scalar_prefetch = 0 : i64, scratch_operands = 0 : i64, tpu.core_type = #tpu.core_type<tc>, window_params = [{transform_indices = @transform_0, window_bounds = array<i64: 4, 2048>}, {pipeline_mode = #tpu.pipeline_mode<synchronous>, transform_indices = @transform_1, window_bounds = array<i64: 64, 4>}, {pipeline_mode = #tpu.pipeline_mode<synchronous>, transform_indices = @transform_2, window_bounds = array<i64: 64, 1>}, {pipeline_mode = #tpu.pipeline_mode<synchronous>, transform_indices = @transform_3, window_bounds = array<i64: 64, 64>}, {pipeline_mode = #tpu.pipeline_mode<synchronous>, transform_indices = @transform_4, window_bounds = array<i64: 64, 1>}, {pipeline_mode = #tpu.pipeline_mode<synchronous>, transform_indices = @transform_5, window_bounds = array<i64: 32, 64>}, {pipeline_mode = #tpu.pipeline_mode<synchronous>, transform_indices = @transform_6, window_bounds = array<i64: 32, 3>}, {transform_indices = @transform_7, window_bounds = array<i64: 2048, 32>}]} {
    %c0 = arith.constant 0 : index
    %c0_0 = arith.constant 0 : index
    %0 = vector.load %arg1[%c0, %c0_0] : memref<4x2048xf32, #tpu.memory_space<vmem>>, vector<4x2048xf32>
    %c0_1 = arith.constant 0 : index
    %c0_2 = arith.constant 0 : index
    %1 = vector.load %arg2[%c0_1, %c0_2] : memref<64x4xf32, #tpu.memory_space<vmem>>, vector<64x4xf32>
    %2 = vector.extract_strided_slice %1 {offsets = [0, 0], sizes = [64, 1], strides = [1, 1]} : vector<64x4xf32> to vector<64x1xf32>
    %3 = vector.extract_strided_slice %0 {offsets = [0, 0], sizes = [1, 2048], strides = [1, 1]} : vector<4x2048xf32> to vector<1x2048xf32>
    %4 = vector.broadcast %2 : vector<64x1xf32> to vector<64x2048xf32>
    %5 = vector.broadcast %3 : vector<1x2048xf32> to vector<64x2048xf32>
    %6 = arith.mulf %4, %5 : vector<64x2048xf32>
    %7 = vector.extract_strided_slice %1 {offsets = [0, 1], sizes = [64, 1], strides = [1, 1]} : vector<64x4xf32> to vector<64x1xf32>
    %8 = vector.extract_strided_slice %0 {offsets = [1, 0], sizes = [1, 2048], strides = [1, 1]} : vector<4x2048xf32> to vector<1x2048xf32>
    %9 = vector.broadcast %7 : vector<64x1xf32> to vector<64x2048xf32>
    %10 = vector.broadcast %8 : vector<1x2048xf32> to vector<64x2048xf32>
    %11 = arith.mulf %9, %10 : vector<64x2048xf32>
    %12 = arith.addf %6, %11 : vector<64x2048xf32>
    %13 = vector.extract_strided_slice %1 {offsets = [0, 2], sizes = [64, 1], strides = [1, 1]} : vector<64x4xf32> to vector<64x1xf32>
    %14 = vector.extract_strided_slice %0 {offsets = [2, 0], sizes = [1, 2048], strides = [1, 1]} : vector<4x2048xf32> to vector<1x2048xf32>
    %15 = vector.broadcast %13 : vector<64x1xf32> to vector<64x2048xf32>
    %16 = vector.broadcast %14 : vector<1x2048xf32> to vector<64x2048xf32>
    %17 = arith.mulf %15, %16 : vector<64x2048xf32>
    %18 = arith.addf %12, %17 : vector<64x2048xf32>
    %19 = vector.extract_strided_slice %1 {offsets = [0, 3], sizes = [64, 1], strides = [1, 1]} : vector<64x4xf32> to vector<64x1xf32>
    %20 = vector.extract_strided_slice %0 {offsets = [3, 0], sizes = [1, 2048], strides = [1, 1]} : vector<4x2048xf32> to vector<1x2048xf32>
    %21 = vector.broadcast %19 : vector<64x1xf32> to vector<64x2048xf32>
    %22 = vector.broadcast %20 : vector<1x2048xf32> to vector<64x2048xf32>
    %23 = arith.mulf %21, %22 : vector<64x2048xf32>
    %24 = arith.addf %18, %23 : vector<64x2048xf32>
    %c0_3 = arith.constant 0 : index
    %c0_4 = arith.constant 0 : index
    %25 = vector.load %arg3[%c0_3, %c0_4] : memref<64x1xf32, #tpu.memory_space<vmem>>, vector<64x1xf32>
    %26 = vector.broadcast %25 : vector<64x1xf32> to vector<64x2048xf32>
    %27 = arith.addf %24, %26 : vector<64x2048xf32>
    %cst = arith.constant 0.000000e+00 : f32
    %28 = vector.broadcast %cst : f32 to vector<64x2048xf32>
    %29 = arith.maximumf %27, %28 : vector<64x2048xf32>
    %c0_5 = arith.constant 0 : index
    %c0_6 = arith.constant 0 : index
    %30 = vector.load %arg4[%c0_5, %c0_6] : memref<64x64xf32, #tpu.memory_space<vmem>>, vector<64x64xf32>
    %cst_7 = arith.constant dense<0.000000e+00> : vector<64x2048xf32>
    %31 = tpu.matmul %30, %29, %cst_7 {dimension_numbers = #tpu.dot_dimension_numbers<[1], [0], [0], [1], [0, 0, 1, 1], [], []>} : vector<64x64xf32>, vector<64x2048xf32>, vector<64x2048xf32> -> vector<64x2048xf32>
    %c0_8 = arith.constant 0 : index
    %c0_9 = arith.constant 0 : index
    %32 = vector.load %arg5[%c0_8, %c0_9] : memref<64x1xf32, #tpu.memory_space<vmem>>, vector<64x1xf32>
    %33 = vector.broadcast %32 : vector<64x1xf32> to vector<64x2048xf32>
    %34 = arith.addf %31, %33 : vector<64x2048xf32>
    %cst_10 = arith.constant 0.000000e+00 : f32
    %35 = vector.broadcast %cst_10 : f32 to vector<64x2048xf32>
    %36 = arith.maximumf %34, %35 : vector<64x2048xf32>
    %c0_11 = arith.constant 0 : index
    %c0_12 = arith.constant 0 : index
    %37 = vector.load %arg6[%c0_11, %c0_12] : memref<32x64xf32, #tpu.memory_space<vmem>>, vector<32x64xf32>
    %cst_13 = arith.constant dense<0.000000e+00> : vector<32x2048xf32>
    %38 = tpu.matmul %37, %36, %cst_13 {dimension_numbers = #tpu.dot_dimension_numbers<[1], [0], [0], [1], [0, 0, 1, 1], [], []>} : vector<32x64xf32>, vector<64x2048xf32>, vector<32x2048xf32> -> vector<32x2048xf32>
    %c0_14 = arith.constant 0 : index
    %c0_15 = arith.constant 0 : index
    %39 = vector.load %arg7[%c0_14, %c0_15] : memref<32x3xf32, #tpu.memory_space<vmem>>, vector<32x3xf32>
    %40 = vector.extract_strided_slice %39 {offsets = [0, 0], sizes = [32, 1], strides = [1, 1]} : vector<32x3xf32> to vector<32x1xf32>
    %41 = vector.broadcast %40 : vector<32x1xf32> to vector<32x2048xf32>
    %42 = arith.addf %38, %41 : vector<32x2048xf32>
    %cst_16 = arith.constant 0.000000e+00 : f32
    %43 = vector.broadcast %cst_16 : f32 to vector<32x2048xf32>
    %44 = arith.maximumf %42, %43 : vector<32x2048xf32>
    %45 = vector.extract_strided_slice %39 {offsets = [0, 1], sizes = [32, 1], strides = [1, 1]} : vector<32x3xf32> to vector<32x1xf32>
    %46 = vector.broadcast %45 : vector<32x1xf32> to vector<32x2048xf32>
    %47 = arith.mulf %44, %46 : vector<32x2048xf32>
    %48 = vector.extract_strided_slice %39 {offsets = [0, 2], sizes = [32, 1], strides = [1, 1]} : vector<32x3xf32> to vector<32x1xf32>
    %49 = vector.broadcast %48 : vector<32x1xf32> to vector<32x2048xf32>
    %50 = arith.addf %47, %49 : vector<32x2048xf32>
    %51 = tpu.transpose %50, [1, 0] : vector<32x2048xf32> -> vector<2048x32xf32>
    %c0_17 = arith.constant 0 : index
    %c0_18 = arith.constant 0 : index
    %52 = vector.load %arg8[%c0_17, %c0_18] : memref<2048x32xf32, #tpu.memory_space<vmem>>, vector<2048x32xf32>
    tpu.vector_store %arg8[%c0_17, %c0_18], %51 {strides = array<i32>} : memref<2048x32xf32, #tpu.memory_space<vmem>>, vector<2048x32xf32>,
    return
  }
  func.func @transform_0(%arg0: i32) -> (i32, i32) {
    %c0_i32 = arith.constant 0 : i32
    %c0_i32_0 = arith.constant 0 : i32
    return %c0_i32, %arg0 : i32, i32
  }
  func.func @transform_1(%arg0: i32) -> (i32, i32) {
    %c0_i32 = arith.constant 0 : i32
    %c0_i32_0 = arith.constant 0 : i32
    %c0_i32_1 = arith.constant 0 : i32
    return %c0_i32, %c0_i32_0 : i32, i32
  }
  func.func @transform_2(%arg0: i32) -> (i32, i32) {
    %c0_i32 = arith.constant 0 : i32
    %c0_i32_0 = arith.constant 0 : i32
    %c0_i32_1 = arith.constant 0 : i32
    return %c0_i32, %c0_i32_0 : i32, i32
  }
  func.func @transform_3(%arg0: i32) -> (i32, i32) {
    %c0_i32 = arith.constant 0 : i32
    %c0_i32_0 = arith.constant 0 : i32
    %c0_i32_1 = arith.constant 0 : i32
    return %c0_i32, %c0_i32_0 : i32, i32
  }
  func.func @transform_4(%arg0: i32) -> (i32, i32) {
    %c0_i32 = arith.constant 0 : i32
    %c0_i32_0 = arith.constant 0 : i32
    %c0_i32_1 = arith.constant 0 : i32
    return %c0_i32, %c0_i32_0 : i32, i32
  }
  func.func @transform_5(%arg0: i32) -> (i32, i32) {
    %c0_i32 = arith.constant 0 : i32
    %c0_i32_0 = arith.constant 0 : i32
    %c0_i32_1 = arith.constant 0 : i32
    return %c0_i32, %c0_i32_0 : i32, i32
  }
  func.func @transform_6(%arg0: i32) -> (i32, i32) {
    %c0_i32 = arith.constant 0 : i32
    %c0_i32_0 = arith.constant 0 : i32
    %c0_i32_1 = arith.constant 0 : i32
    return %c0_i32, %c0_i32_0 : i32, i32
  }
  func.func @transform_7(%arg0: i32) -> (i32, i32) {
    %c0_i32 = arith.constant 0 : i32
    %c0_i32_0 = arith.constant 0 : i32
    return %arg0, %c0_i32 : i32, i32
  }
}

</mosaic_0001>

<bundles_post_ra>
// kernel: tpu_custom_call.1
= control target key start
LH: loop header
LB: loop body
LE: loop exit
PB: predicated region body
PF: predicated region fallthrough
CT: control target
= control target key end

     0   :  { %v9425_v0 = vmov 1   ;;  %v9424_v4 = vmov 2   ;;  %v5219_v7 = vmov 0   ;;  %v5220_v8 = vmov 3   ;;  %s9414_s1 = inlined_call_operand.vmem [shape: f32[64,4], index: 1, kind: input, shape index: {}]   ;;  %s9415_s2 = inlined_call_operand.vmem [shape: f32[64,1], index: 2, kind: input, shape index: {}]   ;;  %s9416_s4 = inlined_call_operand.vmem [shape: f32[64,1], index: 4, kind: input, shape index: {}]   ;;  %s9417_s6 = inlined_call_operand.vmem [shape: f32[32,3], index: 6, kind: input, shape index: {}]   ;;  %s9418_s0 = inlined_call_operand.vmem [shape: f32[4,2048], index: 0, kind: input, shape index: {}]   ;;  %s9419_s3 = inlined_call_operand.vmem [shape: f32[64,64], index: 3, kind: input, shape index: {}]   ;;  %s9420_s5 = inlined_call_operand.vmem [shape: f32[32,64], index: 5, kind: input, shape index: {}]   ;;  %s9421_s7 = inlined_call_operand.vmem [shape: f32[2048,32], index: 7, kind: output, shape index: {}]  }
   0x1   :  { %5188 = vset.pattern.permute.xlu0 %v9425_v0  ;;  %5181 = vset.pattern.permute.xlu1 %v9425_v0  ;;  %v38_v1 = vld [vmem:[%s9414_s1 + $0x20] sm:$0xff]  ;;  %v35_v3 = vld [vmem:[%s9414_s1 + $0x8] sm:$0xff]  ;;  %v37_v5 = vld [vmem:[%s9414_s1 + $0x18] sm:$0xff]  ;;  %v90_v25 = vlaneseq  ;;  %vm2018_vm0 = vcmask 523264   ;;  %vm4563_vm1 = vcmask 261120  }
   0x2   :  { %v34_v2 = vld [vmem:[%s9414_s1] sm:$0xff]  ;;  %379 = vperm.xlu0 %5188, %v38_v1   ;;  %v36_v6 = vld [vmem:[%s9414_s1 + $0x10] sm:$0xff]  ;;  %v39_v10 = vld [vmem:[%s9414_s1 + $0x28] sm:$0xff] }
   0x3   :  { %363 = vperm.xlu1 %5181, %v34_v2   ;;  %v40_v9 = vld [vmem:[%s9414_s1 + $0x30] sm:$0xff]  ;;  %v41_v11 = vld [vmem:[%s9414_s1 + $0x38] sm:$0xff]  ;;  %v1663_v13 = vld [vmem:[%s9415_s2 + $0x28] sm:$0xff]  ;;  %v91_v26 = vshrl.u32 %v90_v25, 7 }
   0x4   :  { %v1661_v12 = vld [vmem:[%s9415_s2 + $0x18] sm:$0xff]  ;;  %v1658_v14 = vld [vmem:[%s9415_s2] sm:$0xff]  ;;  %v1659_v16 = vld [vmem:[%s9415_s2 + $0x8] sm:$0xff] }
   0x5   :  { %v1970_v15 = vld [vmem:[%s9416_s4] sm:$0xff]  ;;  %v1972_v17 = vld [vmem:[%s9416_s4 + $0x10] sm:$0xff]  ;;  %v5348_v23 = vld [vmem:[%s9417_s6 + $0x18] sm:$0xff]  ;;  %v5361_v27 = vsub.s32 5, %v91_v26  ;;  %v5366_v29 = vsub.s32 6, %v91_v26  ;;  %v5371_v31 = vsub.s32 1, %v91_v26 }
   0x6   :  { %5189 = vset.pattern.permute.xlu0 %v9424_v4  ;;  %v1974_v18 = vld [vmem:[%s9416_s4 + $0x20] sm:$0xff]  ;;  %v1976_v19 = vld [vmem:[%s9416_s4 + $0x30] sm:$0xff]  ;;  %v5355_v24 = vld [vmem:[%s9417_s6 + $0x8] sm:$0xff]  ;;  %v5377_v33 = vsub.s32 4, %v91_v26  ;;  %v5386_v39 = vsub.s32 0, %v91_v26  ;;  %v5388_v40 = vsub.s32 2, %v91_v26 }
   0x7   :  { %367 = vperm.xlu1 %5181, %v35_v3   ;;  %795 = vperm.xlu0 %5189, %v34_v2   ;;  %v5329_v20 = vld [vmem:[%s9417_s6] sm:$0xff]  ;;  %v5336_v21 = vld [vmem:[%s9417_s6 + $0x10] sm:$0xff]  ;;  %9596 = vst [vmem:[#allocation2_spill] sm:$0xff] %v5361_v27  ;;  %9597 = vst [vmem:[#allocation3_spill] sm:$0xff] %v5366_v29  ;;  %v5391_v42 = vsub.s32 7, %v91_v26  ;;  %v5397_v45 = vsub.s32 3, %v91_v26 }
   0x8   :  { %v1660_v22 = vld [vmem:[%s9415_s2 + $0x10] sm:$0xff]  ;;  %v26_v28 = vld [vmem:[%s9418_s0] sm:$0xff]  ;;  %9598 = vst [vmem:[#allocation4_spill] sm:$0xff] %v5371_v31  ;;  %v27_v32 = vld [vmem:[%s9418_s0 + $0x8] sm:$0xff] }
   0x9   :  { %v1662_v30 = vld [vmem:[%s9415_s2 + $0x20] sm:$0xff]  ;;  %9599 = vst [vmem:[#allocation5_spill] sm:$0xff] %v5377_v33  ;;  %v401_v34 = vrot.slane %v26_v28, %v5361_v27  ;;  %v833_v35 = vrot.slane %v26_v28, %v5366_v29  ;;  %v409_v36 = vrot.slane %v27_v32, %v5361_v27  ;;  %v841_v37 = vrot.slane %v27_v32, %v5366_v29  ;;  %v1664_v38 = vld [vmem:[%s9415_s2 + $0x30] sm:$0xff]  ;;  %v5417_v51 = vld [vmem:[%s9418_s0 + $0x18] sm:$0xff] }
   0xa   :  { %9600 = vst [vmem:[#allocation6_spill] sm:$0xff] %v5386_v39  ;;  %9601 = vst [vmem:[#allocation7_spill] sm:$0xff] %v5388_v40  ;;  %v397_v41 = vrot.slane %v26_v28, %v5371_v31  ;;  %v97_v43 = vrot.slane %v26_v28, %v5377_v33  ;;  %v105_v47 = vrot.slane %v27_v32, %v5377_v33  ;;  %v5412_v50 = vld [vmem:[%s9418_s0 + $0x10] sm:$0xff]  ;;  %v1665_v52 = vld [vmem:[%s9415_s2 + $0x38] sm:$0xff] }
   0xb   :  { %5182 = vset.pattern.permute.xlu1 %v9424_v4  ;;  %807 = vperm.xlu0 %5189, %v37_v5   ;;  %9602 = vst [vmem:[#allocation8_spill] sm:$0xff] %v5391_v42  ;;  %v5395_v44 = vrot.slane %v401_v34, %v5371_v31  ;;  %9603 = vst [vmem:[#allocation9_spill] sm:$0xff] %v5397_v45  ;;  %v5400_v46 = vrot.slane %v833_v35, %v5388_v40 }
   0xc   :  { %799 = vperm.xlu1 %5182, %v35_v3   ;;  %v5404_v48 = vrot.slane %v409_v36, %v5371_v31  ;;  %v5407_v49 = vrot.slane %v841_v37, %v5388_v40  ;;  %v93_v53 = vrot.slane %v26_v28, %v5386_v39  ;;  %v5424_v54 = vrot.slane %v397_v41, %v5371_v31 }
   0xd   :  { %v829_v55 = vrot.slane %v26_v28, %v5388_v40  ;;  %v101_v56 = vrot.slane %v27_v32, %v5386_v39  ;;  %v1265_v57 = vrot.slane %v26_v28, %v5391_v42  ;;  %v1273_v58 = vrot.slane %v27_v32, %v5391_v42 }
   0xe   :  { %9604 = vst [vmem:[#allocation10_spill] sm:$0xff] %v5404_v48  ;;  %9605 = vst [vmem:[#allocation11_spill] sm:$0xff] %v5424_v54  ;;  %v405_v59 = vrot.slane %v27_v32, %v5371_v31  ;;  %v837_v60 = vrot.slane %v27_v32, %v5388_v40  ;;  %v1261_v61 = vrot.slane %v26_v28, %v5397_v45 }
   0xf   :  { %811 = vperm.xlu0 %5189, %v38_v1   ;;  %v1269_v62 = vrot.slane %v27_v32, %v5397_v45  ;;  %v417_v63 = vrot.slane %v5412_v50, %v5361_v27  ;;  %v849_v25 = vrot.slane %v5412_v50, %v5366_v29  ;;  %v857_v26 = vrot.slane %v5417_v51, %v5366_v29  ;;  %v1973_v32 = vld [vmem:[%s9416_s4 + $0x18] sm:$0xff] }
  0x10   :  { %5183 = vset.pattern.permute.xlu1 %v5219_v7  ;;  %v121_v34 = vrot.slane %v5417_v51, %v5377_v33  ;;  %v109_v35 = vrot.slane %v5412_v50, %v5386_v39  ;;  %v845_v36 = vrot.slane %v5412_v50, %v5388_v40  ;;  %v1289_v41 = vrot.slane %v5417_v51, %v5391_v42 }
  0x11   :  { %54 = vperm.xlu1 %5183, %v36_v6  }
  0x13   :  { %5193 = vset.pattern.permute.xlu0 %v5220_v8 }
  0x14   :  { %1227 = vperm.xlu0 %5193, %v34_v2  }
  0x15   :  { %5184 = vset.pattern.permute.xlu1 %v9425_v0 }
  0x16   :  { %371 = vperm.xlu1 %5184, %v36_v6  }
  0x18   :  { %1239 = vperm.xlu0 %5193, %v37_v5  }
  0x1a   :  { %375 = vperm.xlu1 %5184, %v37_v5  }
  0x1c   :  { %1243 = vperm.xlu0 %5193, %v38_v1  }
  0x1e   :  { %5185 = vset.pattern.permute.xlu1 %v5220_v8 }
  0x1f   :  { %1231 = vperm.xlu1 %5185, %v35_v3  }
  0x20   :  { %1251 = vperm.xlu0 %5193, %v40_v9  }
  0x23   :  { %5186 = vset.pattern.permute.xlu1 %v9424_v4 }
  0x24   :  { %803 = vperm.xlu1 %5186, %v36_v6   ;;  %5200 = vset.pattern.permute.xlu0 %v5219_v7 }
  0x25   :  { %44 = vperm.xlu0 %5200, %v34_v2   ;;  %v5439_v2 = vrot.slane %v97_v43, %v5386_v39  ;;  %v117_v43 = vrot.slane %v5417_v51, %v5386_v39 }
  0x28   :  { %5187 = vset.pattern.permute.xlu1 %v5219_v7 }
  0x29   :  { %64 = vperm.xlu1 %5187, %v38_v1   ;;  %49 = vperm.xlu0 %5200, %v35_v3   ;;  %v425_v1 = vrot.slane %v5417_v51, %v5361_v27  ;;  %v5442_v3 = vrot.slane %v105_v47, %v5386_v39  ;;  %v853_v47 = vrot.slane %v5417_v51, %v5388_v40 }
  0x2d   :  { %69 = vperm.xlu1 %5187, %v39_v10   ;;  %59 = vperm.xlu0 %5200, %v37_v5   ;;  %v113_v5 = vrot.slane %v5412_v50, %v5377_v33 }
  0x31   :  { %5190 = vset.pattern.permute.xlu1 %v9425_v0  ;;  %79 = vperm.xlu0 %5200, %v41_v11  }
  0x32   :  { %383 = vperm.xlu1 %5190, %v39_v10  }
  0x35   :  { %1683 = vperm.xlu0 %5200, %v1661_v12   ;;  %v5463_v12 = vrot.slane %v1265_v57, %v5397_v45  ;;  %v5530_v57 = vrot.slane %v849_v25, %v5388_v40 }
  0x36   :  { %5191 = vset.pattern.permute.xlu1 %v5220_v8 }
  0x37   :  { %1235 = vperm.xlu1 %5191, %v36_v6   ;;  %v413_v6 = vrot.slane %v5412_v50, %v5371_v31  ;;  %9613 = vst [vmem:[#allocation19_spill] sm:$0xff] %v5530_v57 }
  0x39   :  { %1693 = vperm.xlu0 %5200, %v1663_v13   ;;  %v5466_v13 = vrot.slane %v1273_v58, %v5397_v45  ;;  %v5494_v28 = vrot.slane %v413_v6, %v5371_v31  ;;  %v5533_v58 = vrot.slane %v857_v26, %v5388_v40  ;;  %v5559_v6 = vrot.slane %v1289_v41, %v5397_v45 }
  0x3b   :  { %5192 = vset.pattern.permute.xlu1 %v5219_v7  ;;  %9610 = vst [vmem:[#allocation16_spill] sm:$0xff] %v5494_v28  ;;  %9614 = vst [vmem:[#allocation20_spill] sm:$0xff] %v5533_v58 }
  0x3c   :  { %1668 = vperm.xlu1 %5192, %v1658_v14   ;;  %v5469_v14 = vrot.slane %v405_v59, %v5371_v31  ;;  %9621 = vst [vmem:[#allocation27_spill] sm:$0xff] %v5559_v6 }
  0x3d   :  { %1980 = vperm.xlu0 %5200, %v1970_v15   ;;  %v5472_v15 = vrot.slane %v837_v60, %v5388_v40  ;;  %v9422_v60 = vmov 0.0  }
  0x3e   :  { %9606 = vst [vmem:[#allocation12_spill] sm:$0xff] %v5469_v14  ;;  %2107 = vmatprep.mubr.f32.mxu0 %v9422_v60  ;;  %2220 = vmatprep.mubr.f32.mxu1 %v9422_v60 }
  0x40   :  { %1673 = vperm.xlu1 %5192, %v1659_v16   ;;  %v5475_v16 = vrot.slane %v1261_v61, %v5397_v45  ;;  %v5546_v61 = vrot.slane %v109_v35, %v5386_v39 }
  0x41   :  { %1990 = vperm.xlu0 %5200, %v1972_v17   ;;  %v5478_v17 = vrot.slane %v1269_v62, %v5397_v45  ;;  %v5549_v62 = vrot.slane %v845_v36, %v5388_v40 }
  0x42   :  { %9616 = vst [vmem:[#allocation22_spill] sm:$0xff] %v5546_v61 }
  0x43   :  { %9617 = vst [vmem:[#allocation23_spill] sm:$0xff] %v5549_v62 }
  0x44   :  { %5194 = vset.pattern.permute.xlu1 %v9424_v4 }
  0x45   :  { %815 = vperm.xlu1 %5194, %v39_v10   ;;  %2000 = vperm.xlu0 %5200, %v1974_v18   ;;  %v5481_v18 = vrot.slane %v417_v63, %v5371_v31 }
  0x47   :  { %9607 = vst [vmem:[#allocation13_spill] sm:$0xff] %v5481_v18 }
  0x49   :  { %5195 = vset.pattern.permute.xlu1 %v5219_v7  ;;  %2010 = vperm.xlu0 %5200, %v1976_v19   ;;  %v5484_v19 = vrot.slane %v425_v1, %v5371_v31 }
  0x4a   :  { %74 = vperm.xlu1 %5195, %v40_v9  }
  0x4b   :  { %9608 = vst [vmem:[#allocation14_spill] sm:$0xff] %v5484_v19 }
  0x4d   :  { %3085 = vperm.xlu0 %5200, %v5329_v20  }
  0x4e   :  { %5196 = vset.pattern.permute.xlu1 %v9425_v0 }
  0x4f   :  { %387 = vperm.xlu1 %5196, %v40_v9  }
  0x51   :  { %3095 = vperm.xlu0 %5200, %v5336_v21  }
  0x53   :  { %391 = vperm.xlu1 %5196, %v41_v11  }
  0x55   :  { %5203 = vset.pattern.permute.xlu0 %v9425_v0 }
  0x56   :  { %3892 = vperm.xlu0 %5203, %v5329_v20  }
  0x57   :  { %5197 = vset.pattern.permute.xlu1 %v5220_v8 }
  0x58   :  { %1247 = vperm.xlu1 %5197, %v39_v10   ;;  %v5458_v10 = vrot.slane %v101_v56, %v5386_v39 }
  0x5a   :  { %3904 = vperm.xlu0 %5203, %v5348_v23  }
  0x5c   :  { %5198 = vset.pattern.permute.xlu1 %v5219_v7 }
  0x5d   :  { %1678 = vperm.xlu1 %5198, %v1660_v22   ;;  %v5487_v22 = vrot.slane %v113_v5, %v5386_v39 }
  0x5e   :  { %5206 = vset.pattern.permute.xlu0 %v9424_v4 }
  0x5f   :  { %3976 = vperm.xlu0 %5206, %v5355_v24   ;;  %9609 = vst [vmem:[#allocation15_spill] sm:$0xff] %v5487_v22 }
  0x61   :  { %5199 = vset.pattern.permute.xlu1 %v9424_v4 }
  0x62   :  { %819 = vperm.xlu1 %5199, %v40_v9   ;;  %v5455_v9 = vrot.slane %v829_v55, %v5388_v40 }
  0x66   :  { %823 = vperm.xlu1 %5199, %v41_v11  }
  0x6a   :  { %5201 = vset.pattern.permute.xlu1 %v5220_v8  ;;  %v5452_v8 = vrot.slane %v93_v53, %v5386_v39  ;;  %v1285_v53 = vrot.slane %v5417_v51, %v5397_v45 }
  0x6b   :  { %1255 = vperm.xlu1 %5201, %v41_v11   ;;  %v421_v11 = vrot.slane %v5417_v51, %v5371_v31  ;;  %v5541_v51 = vrot.slane %v121_v34, %v5386_v39 }
  0x6c   :  { %v5571_v26 = vrot.slane %v1285_v53, %v5397_v45 }
  0x6d   :  { %v5511_v37 = vrot.slane %v421_v11, %v5371_v31  ;;  %9615 = vst [vmem:[#allocation21_spill] sm:$0xff] %v5541_v51  ;;  %v5565_v11 = vrot.slane %v853_v47, %v5388_v40 }
  0x6e   :  { %9625 = vst [vmem:[#allocation31_spill] sm:$0xff] %v5571_v26 }
  0x6f   :  { %5202 = vset.pattern.permute.xlu1 %v5219_v7  ;;  %v1971_v7 = vld [vmem:[%s9416_s4 + $0x8] sm:$0xff]  ;;  %9612 = vst [vmem:[#allocation18_spill] sm:$0xff] %v5511_v37  ;;  %9623 = vst [vmem:[#allocation29_spill] sm:$0xff] %v5565_v11 }
  0x70   :  { %1688 = vperm.xlu1 %5202, %v1662_v30   ;;  %v5499_v30 = vld [vmem:[%s9418_s0 + $0x20] sm:$0xff] }
  0x71   :  { %9611 = vst [vmem:[#allocation17_spill] sm:$0xff] %v5499_v30  ;;  %v129_v55 = vrot.slane %v5499_v30, %v5377_v33  ;;  %v433_v56 = vrot.slane %v5499_v30, %v5361_v27  ;;  %v865_v59 = vrot.slane %v5499_v30, %v5366_v29 }
  0x73   :  { %v5577_v34 = vrot.slane %v433_v56, %v5371_v31  ;;  %v5592_v41 = vrot.slane %v865_v59, %v5388_v40 }
  0x74   :  { %1698 = vperm.xlu1 %5202, %v1664_v38   ;;  %v1281_v38 = vrot.slane %v5412_v50, %v5391_v42 }
  0x75   :  { %9627 = vst [vmem:[#allocation33_spill] sm:$0xff] %v5577_v34  ;;  %9628 = vst [vmem:[#allocation34_spill] sm:$0xff] %v5592_v41 }
  0x76   :  { %v5556_v5 = vrot.slane %v1281_v38, %v5397_v45 }
  0x78   :  { %1703 = vperm.xlu1 %5202, %v1665_v52   ;;  %v1277_v52 = vrot.slane %v5412_v50, %v5397_v45  ;;  %v1975_v50 = vld [vmem:[%s9416_s4 + $0x28] sm:$0xff]  ;;  %9620 = vst [vmem:[#allocation26_spill] sm:$0xff] %v5556_v5 }
  0x7a   :  { %v5568_v25 = vrot.slane %v1277_v52, %v5397_v45 }
  0x7c   :  { %1985 = vperm.xlu1 %5202, %v1971_v7   ;;  %v5562_v7 = vrot.slane %v117_v43, %v5386_v39  ;;  %9624 = vst [vmem:[#allocation30_spill] sm:$0xff] %v5568_v25  ;;  %v1977_v43 = vld [vmem:[%s9416_s4 + $0x38] sm:$0xff] }
  0x7e   :  { %9622 = vst [vmem:[#allocation28_spill] sm:$0xff] %v5562_v7 }
  0x80   :  { %1995 = vperm.xlu1 %5202, %v1973_v32   ;;  %v5574_v32 = vrot.slane %v129_v55, %v5386_v39 }
  0x81   :  { %v5553_v1 = vpop.permute.xlu0 %379 }
  0x82   :  { %v5551_v63 = vpop.permute.xlu1 %363  ;;  %9619 = vst [vmem:[#allocation25_spill] sm:$0xff] %v5553_v1  ;;  %9626 = vst [vmem:[#allocation32_spill] sm:$0xff] %v5574_v32  ;;  %v5603_v52 = vmul.f32 %v5395_v44, %v5553_v1  ;;  %v5607_v53 = vmul.f32 %v5404_v48, %v5553_v1  ;;  %v5611_v55 = vmul.f32 %v5424_v54, %v5553_v1 }
  0x83   :  { %9618 = vst [vmem:[#allocation24_spill] sm:$0xff] %v5551_v63  ;;  %v5581_v35 = vmul.f32 %v5395_v44, %v5551_v63  ;;  %v5585_v36 = vmul.f32 %v5404_v48, %v5551_v63  ;;  %v5589_v38 = vmul.f32 %v5424_v54, %v5551_v63  ;;  %v5599_v47 = vmul.f32 %v5469_v14, %v5551_v63 }
  0x84   :  { %2005 = vperm.xlu1 %5202, %v1975_v50   ;;  %9629 = vst [vmem:[#allocation35_spill] sm:$0xff] %v5603_v52  ;;  %9630 = vst [vmem:[#allocation36_spill] sm:$0xff] %v5607_v53  ;;  %v5617_v59 = vmul.f32 %v5469_v14, %v5553_v1  ;;  %v5621_v50 = vmul.f32 %v5481_v18, %v5551_v63  ;;  %v5625_v60 = vmul.f32 %v5484_v19, %v5551_v63 }
  0x85   :  { %9631 = vst [vmem:[#allocation37_spill] sm:$0xff] %v5611_v55  ;;  %v5629_v4 = vmul.f32 %v5494_v28, %v5551_v63  ;;  %v5635_v40 = vmul.f32 %v5511_v37, %v5551_v63  ;;  %v5639_v29 = vmul.f32 %v5481_v18, %v5553_v1  ;;  %v5643_v31 = vmul.f32 %v5484_v19, %v5553_v1 }
  0x86   :  { %v5613_v56 = vpop.permute.xlu1 %367  ;;  %9633 = vst [vmem:[#allocation39_spill] sm:$0xff] %v5617_v59  ;;  %9634 = vst [vmem:[#allocation40_spill] sm:$0xff] %v5621_v50  ;;  %v5631_v0 = vpop.permute.xlu0 %795  ;;  %v5647_v39 = vmul.f32 %v5494_v28, %v5553_v1 }
  0x87   :  { %9632 = vst [vmem:[#allocation38_spill] sm:$0xff] %v5613_v56  ;;  %9635 = vst [vmem:[#allocation41_spill] sm:$0xff] %v5625_v60  ;;  %v5651_v45 = vmul.f32 %v5395_v44, %v5613_v56  ;;  %v5655_v32 = vmul.f32 %v5404_v48, %v5613_v56  ;;  %v5691_v60 = vmul.f32 %v5530_v57, %v5631_v0 }
  0x88   :  { %9636 = vst [vmem:[#allocation42_spill] sm:$0xff] %v5629_v4  ;;  %9637 = vst [vmem:[#allocation43_spill] sm:$0xff] %v5631_v0  ;;  %2015 = vperm.xlu1 %5202, %v1977_v43   ;;  %v5671_v43 = vmul.f32 %v5407_v49, %v5631_v0  ;;  %v5679_v4 = vmul.f32 %v5469_v14, %v5613_v56  ;;  %v5695_v50 = vmul.f32 %v5484_v19, %v5613_v56 }
  0x89   :  { %9638 = vst [vmem:[#allocation44_spill] sm:$0xff] %v5635_v40  ;;  %9639 = vst [vmem:[#allocation45_spill] sm:$0xff] %v5639_v29  ;;  %v5659_v29 = vmul.f32 %v5424_v54, %v5613_v56  ;;  %v5675_v40 = vmul.f32 %v5455_v9, %v5631_v0  ;;  %v5703_v53 = vmul.f32 %v5533_v58, %v5631_v0 }
  0x8a   :  { %9640 = vst [vmem:[#allocation46_spill] sm:$0xff] %v5643_v31  ;;  %9641 = vst [vmem:[#allocation47_spill] sm:$0xff] %v5647_v39  ;;  %v5663_v31 = vmul.f32 %v5511_v37, %v5553_v1  ;;  %v5667_v39 = vmul.f32 %v5400_v46, %v5631_v0  ;;  %v5683_v1 = vmul.f32 %v5472_v15, %v5631_v0  ;;  %v5699_v55 = vpop.permute.xlu0 %807 }
  0x8b   :  { %9642 = vst [vmem:[#allocation48_spill] sm:$0xff] %v5659_v29  ;;  %9644 = vst [vmem:[#allocation50_spill] sm:$0xff] %v5675_v40  ;;  %v5697_v59 = vpop.permute.xlu1 %799  ;;  %v5707_v52 = vmul.f32 %v5494_v28, %v5613_v56 }
  0x8c   :  { %9643 = vst [vmem:[#allocation49_spill] sm:$0xff] %v5663_v31  ;;  %9645 = vst [vmem:[#allocation51_spill] sm:$0xff] %v5679_v4  ;;  %v5687_v31 = vmul.f32 %v5481_v18, %v5613_v56  ;;  %3090 = vperm.xlu1 %5202, %v5355_v24   ;;  %v5740_v4 = vmul.f32 %v5455_v9, %v5697_v59 }
  0x8d   :  { %9646 = vst [vmem:[#allocation52_spill] sm:$0xff] %v5683_v1  ;;  %9648 = vst [vmem:[#allocation54_spill] sm:$0xff] %v5691_v60  ;;  %v5715_v60 = vmul.f32 %v5511_v37, %v5613_v56 }
  0x8e   :  { %9647 = vst [vmem:[#allocation53_spill] sm:$0xff] %v5687_v31  ;;  %9649 = vst [vmem:[#allocation55_spill] sm:$0xff] %v5695_v50  ;;  %v5711_v31 = vmul.f32 %v5549_v62, %v5631_v0  ;;  %v5720_v50 = vmul.f32 %v5400_v46, %v5697_v59 }
  0x8f   :  { %9650 = vst [vmem:[#allocation56_spill] sm:$0xff] %v5697_v59  ;;  %9651 = vst [vmem:[#allocation57_spill] sm:$0xff] %v5699_v55 }
  0x90   :  { %9652 = vst [vmem:[#allocation58_spill] sm:$0xff] %v5703_v53  ;;  %9653 = vst [vmem:[#allocation59_spill] sm:$0xff] %v5707_v52  ;;  %v5724_v53 = vmul.f32 %v5565_v11, %v5631_v0  ;;  %v5728_v52 = vmul.f32 %v5577_v34, %v5551_v63  ;;  %v5744_v0 = vmul.f32 %v5472_v15, %v5697_v59  ;;  %3100 = vperm.xlu1 %5202, %v5348_v23  }
  0x91   :  { %9654 = vst [vmem:[#allocation60_spill] sm:$0xff] %v5711_v31  ;;  %9655 = vst [vmem:[#allocation61_spill] sm:$0xff] %v5715_v60  ;;  %v5732_v31 = vmul.f32 %v5577_v34, %v5613_v56  ;;  %v5736_v60 = vmul.f32 %v5407_v49, %v5697_v59  ;;  %v5748_v63 = vmul.f32 %v5400_v46, %v5699_v55 }
  0x92   :  { %9656 = vst [vmem:[#allocation62_spill] sm:$0xff] %v5720_v50  ;;  %9657 = vst [vmem:[#allocation63_spill] sm:$0xff] %v5724_v53  ;;  %v5752_v34 = vmul.f32 %v5407_v49, %v5699_v55  ;;  %v5756_v56 = vmul.f32 %v5455_v9, %v5699_v55  ;;  %v5766_v53 = vpop.permute.xlu0 %811 }
  0x93   :  { %9658 = vst [vmem:[#allocation64_spill] sm:$0xff] %v5728_v52  ;;  %9659 = vst [vmem:[#allocation65_spill] sm:$0xff] %v5732_v31  ;;  %v5760_v31 = vmul.f32 %v5472_v15, %v5699_v55  ;;  %v5764_v52 = vmul.f32 %v5530_v57, %v5697_v59  ;;  %v5840_v29 = vmul.f32 %v5530_v57, %v5766_v53 }
  0x94   :  { %9660 = vst [vmem:[#allocation66_spill] sm:$0xff] %v5736_v60  ;;  %9661 = vst [vmem:[#allocation67_spill] sm:$0xff] %v5740_v4  ;;  %v5807_v4 = vmul.f32 %v5407_v49, %v5766_v53  ;;  %v5846_v1 = vmul.f32 %v5533_v58, %v5766_v53 }
  0x95   :  { %9662 = vst [vmem:[#allocation68_spill] sm:$0xff] %v5744_v0  ;;  %9663 = vst [vmem:[#allocation69_spill] sm:$0xff] %v5748_v63  ;;  %v5770_v63 = vmul.f32 %v5533_v58, %v5697_v59  ;;  %v5789_v0 = vmul.f32 %v5400_v46, %v5766_v53 }
  0x96   :  { %9664 = vst [vmem:[#allocation70_spill] sm:$0xff] %v5752_v34  ;;  %9665 = vst [vmem:[#allocation71_spill] sm:$0xff] %v5756_v56  ;;  %v5774_v34 = vmul.f32 %v5549_v62, %v5697_v59  ;;  %v5778_v56 = vmul.f32 %v5565_v11, %v5697_v59 }
  0x97   :  { %9666 = vst [vmem:[#allocation72_spill] sm:$0xff] %v5760_v31  ;;  %9667 = vst [vmem:[#allocation73_spill] sm:$0xff] %v5764_v52  ;;  %v5782_v31 = vmul.f32 %v5530_v57, %v5699_v55  ;;  %v5785_v52 = vpop.permute.xlu1 %54 }
  0x98   :  { %9668 = vst [vmem:[#allocation74_spill] sm:$0xff] %v5766_v53  ;;  %9669 = vst [vmem:[#allocation75_spill] sm:$0xff] %v5770_v63  ;;  %v5793_v63 = vmul.f32 %v5533_v58, %v5699_v55  ;;  %v270_v60 = vmul.f32 %v5546_v61, %v5785_v52  ;;  %v5836_v50 = vmul.f32 %v5562_v7, %v5785_v52  ;;  %v9688_v7 = vmov 1  }
  0x99   :  { %9670 = vst [vmem:[#allocation76_spill] sm:$0xff] %v5774_v34  ;;  %9671 = vst [vmem:[#allocation77_spill] sm:$0xff] %v5778_v56  ;;  %v5797_v34 = vmul.f32 %v5549_v62, %v5699_v55  ;;  %v5801_v56 = vmul.f32 %v5565_v11, %v5699_v55  ;;  %v266_v55 = vmul.f32 %v5452_v8, %v5785_v52  ;;  %5204 = vset.pattern.permute.xlu1 %v9688_v7 }
  0x9a   :  { %9672 = vst [vmem:[#allocation78_spill] sm:$0xff] %v5782_v31  ;;  %9673 = vst [vmem:[#allocation79_spill] sm:$0xff] %v5785_v52  ;;  %v267_v31 = vmul.f32 %v5439_v2, %v5785_v52  ;;  %v5854_v61 = vmul.f32 %v5565_v11, %v5766_v53  ;;  %3896 = vperm.xlu1 %5204, %v5355_v24  }
  0x9b   :  { %9674 = vst [vmem:[#allocation80_spill] sm:$0xff] %v5789_v0  ;;  %9675 = vst [vmem:[#allocation81_spill] sm:$0xff] %v5793_v63  ;;  %v5811_v0 = vmul.f32 %v5455_v9, %v5766_v53  ;;  %v5815_v63 = vmul.f32 %v5472_v15, %v5766_v53 }
  0x9c   :  { %9676 = vst [vmem:[#allocation82_spill] sm:$0xff] %v5797_v34  ;;  %9677 = vst [vmem:[#allocation83_spill] sm:$0xff] %v5801_v56  ;;  %v269_v34 = vmul.f32 %v5442_v3, %v5785_v52  ;;  %v268_v56 = vmul.f32 %v5458_v10, %v5785_v52 }
  0x9d   :  { %9678 = vst [vmem:[#allocation84_spill] sm:$0xff] %v5807_v4  ;;  %9679 = vst [vmem:[#allocation85_spill] sm:$0xff] %v5811_v0  ;;  %v271_v4 = vmul.f32 %v5487_v22, %v5785_v52  ;;  %v5828_v0 = vld [vmem:[%s9418_s0 + $0x28] sm:$0xff]  ;;  %v5842_v22 = vpop.permute.xlu0 %1227 }
  0x9e   :  { %9680 = vst [vmem:[#allocation86_spill] sm:$0xff] %v5815_v63  ;;  %9681 = vst [vmem:[#allocation87_spill] sm:$0xff] %v5828_v0  ;;  %v273_v63 = vmul.f32 %v5541_v51, %v5785_v52  ;;  %v5850_v51 = vmul.f32 %v5549_v62, %v5766_v53  ;;  %v5858_v52 = vmul.f32 %v5592_v41, %v5697_v59  ;;  %3900 = vperm.xlu1 %5204, %v5336_v21  }
  0x9f   :  { %9682 = vst [vmem:[#allocation88_spill] sm:$0xff] %v5840_v29  ;;  %9683 = vst [vmem:[#allocation89_spill] sm:$0xff] %v5842_v22  ;;  %v5861_v29 = vpop.permute.xlu1 %371  ;;  %v5865_v40 = vmul.f32 %v5463_v12, %v5842_v22  ;;  %v5888_v53 = vmul.f32 %v5475_v16, %v5842_v22  ;;  %v5892_v24 = vmul.f32 %v5478_v17, %v5842_v22 }
  0xa0   :  { %9684 = vst [vmem:[#allocation90_spill] sm:$0xff] %v5846_v1  ;;  %9685 = vst [vmem:[#allocation91_spill] sm:$0xff] %v5850_v51  ;;  %v571_v7 = vmul.f32 %v5395_v44, %v5861_v29  ;;  %v573_v59 = vmul.f32 %v5404_v48, %v5861_v29  ;;  %v572_v1 = vmul.f32 %v5469_v14, %v5861_v29 }
  0xa1   :  { %9686 = vst [vmem:[#allocation92_spill] sm:$0xff] %v5854_v61  ;;  %9687 = vst [vmem:[#allocation93_spill] sm:$0xff] %v5858_v52  ;;  %v570_v52 = vmul.f32 %v5424_v54, %v5861_v29  ;;  %v5884_v51 = vmul.f32 %v5466_v13, %v5842_v22  ;;  %v5896_v27 = vmul.f32 %v5556_v5, %v5842_v22  ;;  %v5898_v33 = vpop.permute.xlu0 %1239 }
  0xa2   :  { %9689 = vst [vmem:[#allocation94_spill] sm:$0xff] %v5861_v29  ;;  %9691 = vst [vmem:[#allocation96_spill] sm:$0xff] %v5898_v33  ;;  %v5900_v0 = vadd.f32 %v571_v7, %v267_v31  ;;  %v5904_v42 = vmul.f32 %v5559_v6, %v5842_v22  ;;  %v5908_v30 = vmul.f32 %v5568_v25, %v5842_v22 }
  0xa3   :  { %9690 = vst [vmem:[#allocation95_spill] sm:$0xff] %v5896_v27  ;;  %v5912_v41 = vmul.f32 %v5571_v26, %v5842_v22  ;;  %v5914_v61 = vpop.permute.xlu1 %375  ;;  %v5918_v11 = vmul.f32 %v5463_v12, %v5898_v33  ;;  %v5920_v31 = vadd.f32 %v573_v59, %v269_v34  ;;  %v5922_v7 = vadd.f32 %v570_v52, %v266_v55 }
  0xa4   :  { %9692 = vst [vmem:[#allocation97_spill] sm:$0xff] %v5904_v42  ;;  %9693 = vst [vmem:[#allocation98_spill] sm:$0xff] %v5908_v30  ;;  %v5924_v27 = vadd.f32 %v572_v1, %v268_v56  ;;  %v5929_v30 = vmul.f32 %v5395_v44, %v5914_v61  ;;  %v5933_v22 = vmul.f32 %v5466_v13, %v5898_v33 }
  0xa5   :  { %9694 = vst [vmem:[#allocation99_spill] sm:$0xff] %v5912_v41  ;;  %9695 = vst [vmem:[#allocation100_spill] sm:$0xff] %v5914_v61  ;;  %v5937_v41 = vmul.f32 %v5475_v16, %v5898_v33  ;;  %v5941_v34 = vmul.f32 %v5478_v17, %v5898_v33  ;;  %v5945_v1 = vmul.f32 %v5404_v48, %v5914_v61  ;;  %v5955_v59 = vpop.permute.xlu0 %1243 }
  0xa6   :  { %9696 = vst [vmem:[#allocation101_spill] sm:$0xff] %v5918_v11  ;;  %9697 = vst [vmem:[#allocation102_spill] sm:$0xff] %v5933_v22  ;;  %v5949_v52 = vmul.f32 %v5424_v54, %v5914_v61  ;;  %v575_v55 = vmul.f32 %v5481_v18, %v5861_v29  ;;  %v577_v56 = vmul.f32 %v5484_v19, %v5861_v29 }
  0xa7   :  { %9698 = vst [vmem:[#allocation103_spill] sm:$0xff] %v5937_v41  ;;  %9699 = vst [vmem:[#allocation104_spill] sm:$0xff] %v5941_v34  ;;  %v5959_v42 = vmul.f32 %v5469_v14, %v5914_v61  ;;  %v5963_v34 = vmul.f32 %v5481_v18, %v5914_v61  ;;  %v5967_v54 = vmul.f32 %v5556_v5, %v5898_v33 }
  0xa8   :  { %9700 = vst [vmem:[#allocation105_spill] sm:$0xff] %v5955_v59  ;;  %v574_v41 = vmul.f32 %v5494_v28, %v5861_v29  ;;  %v5973_v48 = vmul.f32 %v5463_v12, %v5955_v59  ;;  %v5977_v22 = vmul.f32 %v5484_v19, %v5914_v61  ;;  %v5981_v14 = vmul.f32 %v5559_v6, %v5898_v33 }
  0xa9   :  { %9701 = vst [vmem:[#allocation106_spill] sm:$0xff] %v5963_v34  ;;  %9702 = vst [vmem:[#allocation107_spill] sm:$0xff] %v5967_v54  ;;  %v5985_v18 = vmul.f32 %v5494_v28, %v5914_v61  ;;  %v9706_v54 = vmov 2   ;;  %v5988_v34 = vpop.permute.xlu1 %1231  ;;  %v5992_v11 = vmul.f32 %v5466_v13, %v5955_v59  ;;  %v5996_v19 = vmul.f32 %v5475_v16, %v5955_v59 }
  0xaa   :  { %9703 = vst [vmem:[#allocation108_spill] sm:$0xff] %v5977_v22  ;;  %9704 = vst [vmem:[#allocation109_spill] sm:$0xff] %v5981_v14  ;;  %5205 = vset.pattern.permute.xlu1 %v9706_v54  ;;  %v6000_v22 = vmul.f32 %v5478_v17, %v5955_v59  ;;  %v6002_v14 = vadd.f32 %v575_v55, %v271_v4  ;;  %v6007_v54 = vmul.f32 %v5463_v12, %v5988_v34 }
  0xab   :  { %9705 = vst [vmem:[#allocation110_spill] sm:$0xff] %v5985_v18  ;;  %9707 = vst [vmem:[#allocation111_spill] sm:$0xff] %v5988_v34  ;;  %3972 = vperm.xlu1 %5205, %v5329_v20   ;;  %v6009_v28 = vadd.f32 %v577_v56, %v273_v63  ;;  %v6011_v18 = vadd.f32 %v574_v41, %v270_v60  ;;  %v6021_v4 = vmul.f32 %v5466_v13, %v5988_v34 }
  0xac   :  { %9708 = vst [vmem:[#allocation112_spill] sm:$0xff] %v5992_v11  ;;  %9709 = vst [vmem:[#allocation113_spill] sm:$0xff] %v5996_v19  ;;  %v6015_v11 = vmul.f32 %v5568_v25, %v5898_v33  ;;  %v6017_v19 = vpop.permute.xlu0 %1251  ;;  %v6025_v20 = vmul.f32 %v5475_v16, %v5988_v34  ;;  %v6029_v63 = vmul.f32 %v5478_v17, %v5988_v34 }
  0xad   :  { %9710 = vst [vmem:[#allocation114_spill] sm:$0xff] %v6002_v14  ;;  %9711 = vst [vmem:[#allocation115_spill] sm:$0xff] %v6009_v28  ;;  %v6033_v60 = vmul.f32 %v5556_v5, %v5988_v34  ;;  %v6037_v41 = vmul.f32 %v5463_v12, %v6017_v19  ;;  %v6041_v55 = vmul.f32 %v5559_v6, %v5988_v34 }
  0xae   :  { %9712 = vst [vmem:[#allocation116_spill] sm:$0xff] %v6011_v18  ;;  %9713 = vst [vmem:[#allocation117_spill] sm:$0xff] %v6015_v11  ;;  %v6045_v56 = vmul.f32 %v5568_v25, %v5988_v34  ;;  %v6049_v11 = vmul.f32 %v5571_v26, %v5988_v34  ;;  %v6053_v18 = vmul.f32 %v5466_v13, %v6017_v19 }
  0xaf   :  { %9714 = vst [vmem:[#allocation118_spill] sm:$0xff] %v6017_v19  ;;  %9715 = vst [vmem:[#allocation119_spill] sm:$0xff] %v6037_v41  ;;  %v6057_v28 = vmul.f32 %v5475_v16, %v6017_v19  ;;  %v6061_v41 = vmul.f32 %v5478_v17, %v6017_v19  ;;  %v576_v14 = vmul.f32 %v5511_v37, %v5861_v29  ;;  %3980 = vperm.xlu1 %5205, %v5336_v21  }
  0xb0   :  { %9716 = vst [vmem:[#allocation120_spill] sm:$0xff] %v6045_v56  ;;  %9717 = vst [vmem:[#allocation121_spill] sm:$0xff] %v6053_v18  ;;  %v6066_v56 = vpop.permute.xlu1 %803  ;;  %v6070_v34 = vmul.f32 %v5511_v37, %v5914_v61  ;;  %v6074_v18 = vmul.f32 %v5571_v26, %v5898_v33  ;;  %v6088_v29 = vmul.f32 %v5568_v25, %v5955_v59  ;;  %v6098_v37 = vpop.permute.xlu0 %44 }
  0xb1   :  { %9718 = vst [vmem:[#allocation122_spill] sm:$0xff] %v6057_v28  ;;  %9719 = vst [vmem:[#allocation123_spill] sm:$0xff] %v6061_v41  ;;  %v6078_v28 = vmul.f32 %v5556_v5, %v5955_v59  ;;  %v6082_v41 = vmul.f32 %v5559_v6, %v5955_v59  ;;  %v1003_v21 = vmul.f32 %v5400_v46, %v6066_v56 }
  0xb2   :  { %9720 = vst [vmem:[#allocation124_spill] sm:$0xff] %v6066_v56  ;;  %9721 = vst [vmem:[#allocation125_spill] sm:$0xff] %v6070_v34  ;;  %v6092_v61 = vmul.f32 %v5571_v26, %v5955_v59  ;;  %v6096_v33 = vmul.f32 %v5556_v5, %v6017_v19  ;;  %v235_v59 = vmul.f32 %v5439_v2, %v6098_v37 }
  0xb3   :  { %9722 = vst [vmem:[#allocation126_spill] sm:$0xff] %v6074_v18  ;;  %9723 = vst [vmem:[#allocation127_spill] sm:$0xff] %v6078_v28  ;;  %v1002_v28 = vmul.f32 %v5455_v9, %v6066_v56  ;;  %v1004_v18 = vmul.f32 %v5472_v15, %v6066_v56  ;;  %v237_v19 = vmul.f32 %v5442_v3, %v6098_v37  ;;  %3984 = vperm.xlu1 %5205, %v5348_v23  }
  0xb4   :  { %9724 = vst [vmem:[#allocation128_spill] sm:$0xff] %v6082_v41  ;;  %9725 = vst [vmem:[#allocation129_spill] sm:$0xff] %v6088_v29  ;;  %v1005_v41 = vmul.f32 %v5407_v49, %v6066_v56  ;;  %v6108_v29 = vmul.f32 %v5530_v57, %v6066_v56  ;;  %v6120_v26 = vadd.f32 %v1003_v21, %v5900_v0  ;;  %v6133_v6 = vpop.permute.xlu1 %64 }
  0xb5   :  { %9726 = vst [vmem:[#allocation130_spill] sm:$0xff] %v6092_v61  ;;  %9727 = vst [vmem:[#allocation131_spill] sm:$0xff] %v6096_v33  ;;  %v234_v33 = vmul.f32 %v5452_v8, %v6098_v37  ;;  %v236_v61 = vmul.f32 %v5458_v10, %v6098_v37  ;;  %v6124_v57 = vmul.f32 %v5533_v58, %v6066_v56 }
  0xb6   :  { %9728 = vst [vmem:[#allocation132_spill] sm:$0xff] %v6098_v37  ;;  %9729 = vst [vmem:[#allocation133_spill] sm:$0xff] %v6108_v29  ;;  %v6128_v34 = vmul.f32 %v5549_v62, %v6066_v56  ;;  %v6131_v25 = vadd.f32 %v576_v14, %v5836_v50  ;;  %v667_v5 = vadd.f32 %v5581_v35, %v235_v59  ;;  %v6139_v29 = vpop.permute.xlu0 %49  ;;  %v9736_v50 = vld [vmem:[#allocation50_spill] sm:$0xff]  ;;  %v9740_v56 = vld [vmem:[#allocation51_spill] sm:$0xff] }
  0xb7   :  { %9730 = vst [vmem:[#allocation134_spill] sm:$0xff] %v6124_v57  ;;  %9733 = vst [vmem:[#allocation137_spill] sm:$0xff] %v6133_v6  ;;  %v669_v23 = vadd.f32 %v5585_v36, %v237_v19  ;;  %v666_v0 = vadd.f32 %v5589_v38, %v234_v33  ;;  %v668_v21 = vadd.f32 %v5599_v47, %v236_v61 }
  0xb8   :  { %9731 = vst [vmem:[#allocation135_spill] sm:$0xff] %v6128_v34  ;;  %9732 = vst [vmem:[#allocation136_spill] sm:$0xff] %v6131_v25  ;;  %v6142_v58 = vadd.f32 %v1005_v41, %v5920_v31  ;;  %v6145_v62 = vadd.f32 %v1002_v28, %v5922_v7  ;;  %v6148_v14 = vadd.f32 %v1004_v18, %v5924_v27  ;;  %v6168_v47 = vpop.permute.xlu1 %69  ;;  %v9737_v7 = vld [vmem:[#allocation52_spill] sm:$0xff] }
  0xb9   :  { %9734 = vst [vmem:[#allocation138_spill] sm:$0xff] %v6139_v29  ;;  %v299_v35 = vmul.f32 %v5439_v2, %v6133_v6  ;;  %v251_v19 = vmul.f32 %v5439_v2, %v6139_v29  ;;  %v1099_v33 = vadd.f32 %v5667_v39, %v667_v5  ;;  %v253_v61 = vmul.f32 %v5442_v3, %v6139_v29 }
  0xba   :  { %v301_v36 = vmul.f32 %v5442_v3, %v6133_v6  ;;  %v1101_v28 = vadd.f32 %v5671_v43, %v669_v23  ;;  %v250_v27 = vmul.f32 %v5452_v8, %v6139_v29  ;;  %v252_v18 = vmul.f32 %v5458_v10, %v6139_v29  ;;  %9735 = vst [vmem:[#allocation139_spill] sm:$0xff] %v6168_v47  ;;  %v6174_v59 = vpop.permute.xlu0 %59  ;;  %v9739_v23 = vld [vmem:[#allocation48_spill] sm:$0xff] }
  0xbb   :  { %v6166_v38 = vmul.f32 %v5452_v8, %v6133_v6  ;;  %v683_v39 = vadd.f32 %v5651_v45, %v251_v19  ;;  %v685_v5 = vadd.f32 %v5655_v32, %v253_v61  ;;  %v1098_v31 = vadd.f32 %v9736_v50, %v666_v0  ;;  %9738 = vst [vmem:[#allocation50_spill] sm:$0xff] %v6174_v59  ;;  %v9741_v45 = vld [vmem:[#allocation62_spill] sm:$0xff] }
  0xbc   :  { %v1100_v43 = vadd.f32 %v9737_v7, %v668_v21  ;;  %v6177_v41 = vadd.f32 %v5865_v40, %v1099_v33  ;;  %v682_v25 = vadd.f32 %v9739_v23, %v250_v27  ;;  %v684_v34 = vadd.f32 %v9740_v56, %v252_v18  ;;  %v9742_v32 = vld [vmem:[#allocation66_spill] sm:$0xff]  ;;  %v9743_v33 = vld [vmem:[#allocation67_spill] sm:$0xff] }
  0xbd   :  { %v6183_v57 = vmul.f32 %v5458_v10, %v6133_v6  ;;  %v1115_v19 = vadd.f32 %v9741_v45, %v683_v39  ;;  %v1117_v61 = vadd.f32 %v9742_v32, %v685_v5  ;;  %v283_v0 = vmul.f32 %v5439_v2, %v6174_v59  ;;  %v6203_v45 = vpop.permute.xlu1 %383 }
  0xbe   :  { %v285_v21 = vmul.f32 %v5442_v3, %v6174_v59  ;;  %v1533_v40 = vadd.f32 %v5884_v51, %v1101_v28  ;;  %v1114_v27 = vadd.f32 %v9743_v33, %v682_v25  ;;  %v282_v56 = vmul.f32 %v5452_v8, %v6174_v59  ;;  %v6201_v23 = vpop.permute.xlu0 %79  ;;  %9745 = vst [vmem:[#allocation48_spill] sm:$0xff] %v6203_v45  ;;  %v9746_v25 = vld [vmem:[#allocation68_spill] sm:$0xff] }
  0xbf   :  { %v284_v18 = vmul.f32 %v5458_v10, %v6174_v59  ;;  %v1530_v39 = vadd.f32 %v5888_v53, %v1098_v31  ;;  %v1532_v5 = vadd.f32 %v5892_v24, %v1100_v43  ;;  %v715_v50 = vadd.f32 %v5929_v30, %v283_v0  ;;  %9744 = vst [vmem:[#allocation52_spill] sm:$0xff] %v6201_v23  ;;  %v9747_v24 = vld [vmem:[#allocation69_spill] sm:$0xff]  ;;  %v9748_v30 = vld [vmem:[#allocation70_spill] sm:$0xff] }
  0xc0   :  { %v717_v7 = vadd.f32 %v5945_v1, %v285_v21  ;;  %v6206_v51 = vadd.f32 %v6007_v54, %v1115_v19  ;;  %v1116_v28 = vadd.f32 %v9746_v25, %v684_v34  ;;  %v714_v32 = vadd.f32 %v5949_v52, %v282_v56  ;;  %v9749_v21 = vld [vmem:[#allocation71_spill] sm:$0xff]  ;;  %v9750_v19 = vld [vmem:[#allocation72_spill] sm:$0xff]  ;;  %v9752_v52 = vld [vmem:[#allocation101_spill] sm:$0xff] }
  0xc1   :  { %v716_v33 = vadd.f32 %v5959_v42, %v284_v18  ;;  %v1549_v53 = vadd.f32 %v6021_v4, %v1117_v61  ;;  %v1147_v31 = vadd.f32 %v9747_v24, %v715_v50  ;;  %v619_v1 = vmul.f32 %v5395_v44, %v6203_v45  ;;  %v9751_v34 = vld [vmem:[#allocation35_spill] sm:$0xff]  ;;  %v9753_v42 = vld [vmem:[#allocation102_spill] sm:$0xff]  ;;  %v9757_v24 = vld [vmem:[#allocation104_spill] sm:$0xff] }
  0xc2   :  { %v1149_v43 = vadd.f32 %v9748_v30, %v717_v7  ;;  %v1546_v0 = vadd.f32 %v6025_v20, %v1114_v27  ;;  %v1146_v54 = vadd.f32 %v9749_v21, %v714_v32  ;;  %v731_v25 = vadd.f32 %v9751_v34, %v299_v35  ;;  %v9754_v61 = vld [vmem:[#allocation10_spill] sm:$0xff]  ;;  %v6226_v7 = vpop.permute.xlu0 %1683  ;;  %v9756_v27 = vld [vmem:[#allocation103_spill] sm:$0xff] }
  0xc3   :  { %v1148_v6 = vadd.f32 %v9750_v19, %v716_v33  ;;  %v1579_v56 = vadd.f32 %v9752_v52, %v1147_v31  ;;  %v315_v4 = vmul.f32 %v5439_v2, %v6168_v47  ;;  %v621_v50 = vmul.f32 %v9754_v61, %v6203_v45  ;;  %9755 = vst [vmem:[#allocation51_spill] sm:$0xff] %v6226_v7  ;;  %v6233_v31 = vpop.permute.xlu1 %1235  ;;  %v9761_v19 = vld [vmem:[#allocation36_spill] sm:$0xff] }
  0xc4   :  { %v1581_v18 = vadd.f32 %v9753_v42, %v1149_v43  ;;  %v1548_v20 = vadd.f32 %v6029_v63, %v1116_v28  ;;  %v1578_v32 = vadd.f32 %v9756_v27, %v1146_v54  ;;  %v317_v35 = vmul.f32 %v5442_v3, %v6168_v47  ;;  %9758 = vst [vmem:[#allocation62_spill] sm:$0xff] %v6233_v31  ;;  %v9762_v54 = vld [vmem:[#allocation80_spill] sm:$0xff]  ;;  %v9767_v27 = vld [vmem:[#allocation37_spill] sm:$0xff] }
  0xc5   :  { %v1580_v33 = vadd.f32 %v9757_v24, %v1148_v6  ;;  %v6236_v30 = vadd.f32 %v6226_v7, %v1579_v56  ;;  %v6241_v21 = vadd.f32 %v619_v1, %v315_v4  ;;  %v733_v34 = vadd.f32 %v9761_v19, %v301_v36 }
  0xc6   :  { %v6239_v43 = vadd.f32 %v6226_v7, %v1581_v18  ;;  %v1435_v63 = vmul.f32 %v5463_v12, %v6233_v31  ;;  %v1437_v6 = vmul.f32 %v5466_v13, %v6233_v31  ;;  %v1434_v28 = vmul.f32 %v5475_v16, %v6233_v31 }
  0xc7   :  { %9759 = vst [vmem:[#allocation66_spill] sm:$0xff] %v6236_v30  ;;  %v1163_v52 = vadd.f32 %v9762_v54, %v731_v25  ;;  %v6252_v56 = vadd.f32 %v6226_v7, %v1578_v32  ;;  %v1436_v1 = vmul.f32 %v5478_v17, %v6233_v31  ;;  %v6256_v42 = vadd.f32 %v621_v50, %v317_v35  ;;  %v9763_v35 = vld [vmem:[#allocation84_spill] sm:$0xff]  ;;  %v9766_v54 = vld [vmem:[#allocation11_spill] sm:$0xff]  ;;  %v9774_v30 = vld [vmem:[#allocation113_spill] sm:$0xff] }
  0xc8   :  { %9760 = vst [vmem:[#allocation67_spill] sm:$0xff] %v6239_v43  ;;  %v314_v36 = vmul.f32 %v5452_v8, %v6168_v47  ;;  %v6261_v18 = vadd.f32 %v1435_v63, %v6120_v26  ;;  %v6266_v25 = vadd.f32 %v6226_v7, %v1580_v33  ;;  %v6269_v32 = vadd.f32 %v1437_v6, %v6142_v58  ;;  %v6278_v26 = vpop.permute.xlu1 %1668  ;;  %v9768_v6 = vld [vmem:[#allocation12_spill] sm:$0xff] }
  0xc9   :  { %v6272_v24 = vadd.f32 %v1434_v28, %v6145_v62  ;;  %v6275_v50 = vadd.f32 %v1436_v1, %v6148_v14  ;;  %v1165_v19 = vadd.f32 %v9763_v35, %v733_v34  ;;  %9764 = vst [vmem:[#allocation68_spill] sm:$0xff] %v6278_v26  ;;  %v6281_v63 = vadd.f32 %v5973_v48, %v1163_v52  ;;  %v9769_v48 = vld [vmem:[#allocation112_spill] sm:$0xff]  ;;  %v9771_v35 = vld [vmem:[#allocation85_spill] sm:$0xff] }
  0xca   :  { %v618_v33 = vmul.f32 %v9766_v54, %v6203_v45  ;;  %v730_v58 = vadd.f32 %v9767_v27, %v6166_v38  ;;  %v620_v62 = vmul.f32 %v9768_v6, %v6203_v45  ;;  %v1707_v14 = vadd.f32 %v6278_v26, %v6177_v41  ;;  %v9772_v27 = vld [vmem:[#allocation39_spill] sm:$0xff] }
  0xcb   :  { %9765 = vst [vmem:[#allocation69_spill] sm:$0xff] %v6281_v63  ;;  %v1709_v28 = vadd.f32 %v6278_v26, %v1533_v40  ;;  %v1706_v34 = vadd.f32 %v6278_v26, %v1530_v39  ;;  %v1708_v1 = vadd.f32 %v6278_v26, %v1532_v5  ;;  %v6295_v52 = vadd.f32 %v9769_v48, %v1165_v19  ;;  %v9776_v48 = vld [vmem:[#allocation86_spill] sm:$0xff] }
  0xcc   :  { %v1162_v4 = vadd.f32 %v9771_v35, %v730_v58  ;;  %v316_v38 = vmul.f32 %v5458_v10, %v6168_v47  ;;  %v732_v45 = vadd.f32 %v9772_v27, %v6183_v57  ;;  %v1835_v63 = vmax.f32 %v1707_v14, 0.0  ;;  %v6302_v40 = vpop.permute.xlu1 %1673 }
  0xcd   :  { %9770 = vst [vmem:[#allocation70_spill] sm:$0xff] %v6295_v52  ;;  %v1837_v7 = vmax.f32 %v1709_v28, 0.0  ;;  %v1834_v41 = vmax.f32 %v1706_v34, 0.0  ;;  %v746_v43 = vadd.f32 %v618_v33, %v314_v36  ;;  %9773 = vst [vmem:[#allocation71_spill] sm:$0xff] %v6302_v40  ;;  %v1836_v39 = vmax.f32 %v1708_v1, 0.0  ;;  %v9779_v28 = vld [vmem:[#allocation21_spill] sm:$0xff] }
  0xce   :  { %v6305_v5 = vadd.f32 %v9774_v30, %v1162_v4  ;;  %v748_v19 = vadd.f32 %v620_v62, %v316_v38  ;;  %v1164_v52 = vadd.f32 %v9776_v48, %v732_v45  ;;  %v1723_v58 = vadd.f32 %v6302_v40, %v6206_v51 }
  0xcf   :  { %v1725_v35 = vadd.f32 %v6302_v40, %v1549_v53  ;;  %v1722_v57 = vadd.f32 %v6302_v40, %v1546_v0  ;;  %v1724_v14 = vadd.f32 %v6302_v40, %v1548_v20  ;;  %v6318_v33 = vmul.f32 %v5439_v2, %v6201_v23  ;;  %v9778_v20 = vld [vmem:[#allocation15_spill] sm:$0xff] }
  0xd0   :  { %9775 = vst [vmem:[#allocation72_spill] sm:$0xff] %v6305_v5  ;;  %v6314_v36 = vadd.f32 %v6000_v22, %v1164_v52  ;;  %v6322_v30 = vmul.f32 %v5442_v3, %v6201_v23  ;;  %v6326_v45 = vmul.f32 %v5452_v8, %v6201_v23  ;;  %v1851_v51 = vmax.f32 %v1723_v58, 0.0  ;;  %v6336_v52 = vpop.permute.xlu1 %815  ;;  %v9793_v5 = vld [vmem:[#allocation97_spill] sm:$0xff] }
  0xd1   :  { %v1853_v53 = vmax.f32 %v1725_v35, 0.0  ;;  %v1850_v0 = vmax.f32 %v1722_v57, 0.0  ;;  %v1852_v4 = vmax.f32 %v1724_v14, 0.0  ;;  %v239_v22 = vmul.f32 %v9778_v20, %v6098_v37  ;;  %9780 = vst [vmem:[#allocation101_spill] sm:$0xff] %v6336_v52 }
  0xd2   :  { %9777 = vst [vmem:[#allocation35_spill] sm:$0xff] %v6314_v36  ;;  %v255_v62 = vmul.f32 %v9778_v20, %v6139_v29  ;;  %v241_v34 = vmul.f32 %v9779_v28, %v6098_v37  ;;  %v257_v1 = vmul.f32 %v9779_v28, %v6139_v29  ;;  %v4920_v38 = vpack.c.bf16 %v1851_v51, %v1835_v63  ;;  %v9781_v63 = vld [vmem:[#allocation40_spill] sm:$0xff]  ;;  %v9783_v51 = vld [vmem:[#allocation41_spill] sm:$0xff] }
  0xd3   :  { %v4936_v27 = vpack.c.bf16 %v1853_v53, %v1837_v7  ;;  %v4922_v48 = vpack.c.bf16 %v1850_v0, %v1834_v41  ;;  %v4938_v58 = vpack.c.bf16 %v1852_v4, %v1836_v39  ;;  %v1051_v35 = vmul.f32 %v5400_v46, %v6336_v52  ;;  %v9782_v41 = vld [vmem:[#allocation53_spill] sm:$0xff] }
  0xd4   :  { %v1053_v57 = vmul.f32 %v5407_v49, %v6336_v52  ;;  %v1050_v14 = vmul.f32 %v5455_v9, %v6336_v52  ;;  %v1052_v36 = vmul.f32 %v5472_v15, %v6336_v52  ;;  %4921 = vmatprep.subr.bf16.mxu0 %v4920_v38  ;;  %v671_v7 = vadd.f32 %v9781_v63, %v239_v22  ;;  %v9784_v22 = vld [vmem:[#allocation54_spill] sm:$0xff] }
  0xd5   :  { %4937 = vmatprep.subr.bf16.mxu1 %v4936_v27  ;;  %v687_v39 = vadd.f32 %v9782_v41, %v255_v62  ;;  %v673_v53 = vadd.f32 %v9783_v51, %v241_v34  ;;  %4923 = vmatpush1.bf16.msra.mxu0 %v4922_v48  ;;  %v6352_v4 = vadd.f32 %v1051_v35, %v6241_v21  ;;  %v9785_v62 = vld [vmem:[#allocation73_spill] sm:$0xff]  ;;  %v9786_v34 = vld [vmem:[#allocation55_spill] sm:$0xff]  ;;  %v9788_v51 = vld [vmem:[#allocation58_spill] sm:$0xff] }
  0xd6   :  { %4939 = vmatpush1.bf16.msra.mxu1 %v4938_v58  ;;  %v6355_v47 = vadd.f32 %v1053_v57, %v6256_v42  ;;  %v348_v38 = vmul.f32 %v5458_v10, %v6201_v23  ;;  %v6359_v27 = vadd.f32 %v1050_v14, %v746_v43  ;;  %v1103_v63 = vadd.f32 %v9784_v22, %v671_v7  ;;  %v6364_v58 = vpop.permute.xlu1 %74  ;;  %v9789_v21 = vld [vmem:[#allocation22_spill] sm:$0xff]  ;;  %v9790_v57 = vld [vmem:[#allocation28_spill] sm:$0xff] }
  0xd7   :  { %v1119_v41 = vadd.f32 %v9785_v62, %v687_v39  ;;  %v689_v48 = vadd.f32 %v9786_v34, %v257_v1  ;;  %9787 = vst [vmem:[#allocation102_spill] sm:$0xff] %v6364_v58  ;;  %v1105_v0 = vadd.f32 %v9788_v51, %v673_v53  ;;  %v238_v35 = vmul.f32 %v9789_v21, %v6098_v37  ;;  %v9791_v53 = vld [vmem:[#allocation95_spill] sm:$0xff] }
  0xd8   :  { %v254_v42 = vmul.f32 %v9789_v21, %v6139_v29  ;;  %v240_v43 = vmul.f32 %v9790_v57, %v6098_v37  ;;  %v6373_v14 = vadd.f32 %v1052_v36, %v748_v19  ;;  %v331_v7 = vmul.f32 %v5439_v2, %v6364_v58  ;;  %v9792_v34 = vld [vmem:[#allocation75_spill] sm:$0xff]  ;;  %v9794_v37 = vld [vmem:[#allocation42_spill] sm:$0xff]  ;;  %v9796_v21 = vld [vmem:[#allocation44_spill] sm:$0xff] }
  0xd9   :  { %v333_v1 = vmul.f32 %v5442_v3, %v6364_v58  ;;  %v330_v39 = vmul.f32 %v5452_v8, %v6364_v58  ;;  %v1535_v22 = vadd.f32 %v9791_v53, %v1103_v63  ;;  %v1551_v62 = vadd.f32 %v6033_v60, %v1119_v41  ;;  %v9795_v36 = vld [vmem:[#allocation59_spill] sm:$0xff]  ;;  %v9800_v53 = vld [vmem:[#allocation61_spill] sm:$0xff] }
  0xda   :  { %v1121_v51 = vadd.f32 %v9792_v34, %v689_v48  ;;  %v1537_v23 = vadd.f32 %v9793_v5, %v1105_v0  ;;  %v670_v19 = vadd.f32 %v9794_v37, %v238_v35  ;;  %v686_v52 = vadd.f32 %v9795_v36, %v254_v42  ;;  %v6395_v48 = vpop.permute.xlu1 %387  ;;  %v9798_v5 = vld [vmem:[#allocation60_spill] sm:$0xff] }
  0xdb   :  { %v256_v2 = vmul.f32 %v9790_v57, %v6139_v29  ;;  %v672_v3 = vadd.f32 %v9796_v21, %v240_v43  ;;  %v332_v8 = vmul.f32 %v5458_v10, %v6364_v58  ;;  %v1711_v63 = vadd.f32 %v6278_v26, %v1535_v22  ;;  %9797 = vst [vmem:[#allocation10_spill] sm:$0xff] %v6395_v48  ;;  %v9799_v35 = vld [vmem:[#allocation76_spill] sm:$0xff]  ;;  %v9803_v58 = vld [vmem:[#allocation98_spill] sm:$0xff] }
  0xdc   :  { %v1727_v60 = vadd.f32 %v6302_v40, %v1551_v62  ;;  %v1713_v41 = vadd.f32 %v6278_v26, %v1537_v23  ;;  %v1553_v37 = vadd.f32 %v6041_v55, %v1121_v51  ;;  %v1102_v0 = vadd.f32 %v9798_v5, %v670_v19  ;;  %v9801_v51 = vld [vmem:[#allocation63_spill] sm:$0xff] }
  0xdd   :  { %v1118_v42 = vadd.f32 %v9799_v35, %v686_v52  ;;  %v688_v34 = vadd.f32 %v9800_v53, %v256_v2  ;;  %v635_v21 = vmul.f32 %v5395_v44, %v6395_v48  ;;  %v637_v10 = vmul.f32 %v9754_v61, %v6395_v48 }
  0xde   :  { %v634_v43 = vmul.f32 %v9766_v54, %v6395_v48  ;;  %v636_v23 = vmul.f32 %v9768_v6, %v6395_v48  ;;  %v1839_v22 = vmax.f32 %v1711_v63, 0.0  ;;  %v1855_v55 = vmax.f32 %v1727_v60, 0.0  ;;  %v6417_v35 = vpop.permute.xlu1 %391  ;;  %v9804_v63 = vld [vmem:[#allocation120_spill] sm:$0xff] }
  0xdf   :  { %v1729_v62 = vadd.f32 %v6302_v40, %v1553_v37  ;;  %v1104_v52 = vadd.f32 %v9801_v51, %v672_v3  ;;  %v6411_v19 = vadd.f32 %v635_v21, %v331_v7  ;;  %v6413_v36 = vadd.f32 %v637_v10, %v333_v1  ;;  %9802 = vst [vmem:[#allocation103_spill] sm:$0xff] %v6417_v35 }
  0xe0   :  { %v6415_v2 = vadd.f32 %v634_v43, %v330_v39  ;;  %v1841_v5 = vmax.f32 %v1713_v41, 0.0  ;;  %v6419_v53 = vadd.f32 %v636_v23, %v332_v8  ;;  %v1534_v48 = vadd.f32 %v9803_v58, %v1102_v0  ;;  %v9805_v41 = vld [vmem:[#allocation77_spill] sm:$0xff] }
  0xe1   :  { %v1857_v29 = vmax.f32 %v1729_v62, 0.0  ;;  %v1550_v60 = vadd.f32 %v9804_v63, %v1118_v42  ;;  %v651_v37 = vmul.f32 %v5395_v44, %v6417_v35  ;;  %v653_v7 = vmul.f32 %v9754_v61, %v6417_v35  ;;  %v9811_v63 = vld [vmem:[#allocation106_spill] sm:$0xff] }
  0xe2   :  { %v650_v1 = vmul.f32 %v9766_v54, %v6417_v35  ;;  %v652_v39 = vmul.f32 %v9768_v6, %v6417_v35  ;;  %v6431_v3 = vpack.c.bf16 %v1855_v55, %v1839_v22  ;;  %v1710_v8 = vadd.f32 %v6278_v26, %v1534_v48  ;;  %v9806_v48 = vld [vmem:[#allocation99_spill] sm:$0xff]  ;;  %v6450_v23 = vpop.permute.xlu1 %1247  ;;  %v9809_v22 = vld [vmem:[#allocation133_spill] sm:$0xff] }
  0xe3   :  { %v1726_v58 = vadd.f32 %v6302_v40, %v1550_v60  ;;  %v1120_v0 = vadd.f32 %v9805_v41, %v688_v34  ;;  %v6437_v42 = vadd.f32 %v651_v37, %v6318_v33  ;;  %v6440_v44 = vadd.f32 %v653_v7, %v6322_v30  ;;  %9807 = vst [vmem:[#allocation104_spill] sm:$0xff] %v6450_v23  ;;  %v9808_v30 = vld [vmem:[#allocation114_spill] sm:$0xff] }
  0xe4   :  { %v6443_v61 = vadd.f32 %v650_v1, %v6326_v45  ;;  %v6445_v54 = vpack.c.bf16 %v1857_v29, %v1841_v5  ;;  %v6447_v6 = vadd.f32 %v652_v39, %v348_v38  ;;  %v1838_v21 = vmax.f32 %v1710_v8, 0.0  ;;  %v9810_v45 = vld [vmem:[#allocation26_spill] sm:$0xff] }
  0xe5   :  { %v1854_v10 = vmax.f32 %v1726_v58, 0.0  ;;  %v1536_v43 = vadd.f32 %v9806_v48, %v1104_v52  ;;  %v1552_v34 = vadd.f32 %v6049_v11, %v1120_v0  ;;  %v287_v33 = vmul.f32 %v9778_v20, %v6174_v59  ;;  %v6476_v58 = vpop.permute.xlu0 %1693 }
  0xe6   :  { %v1135_v55 = vadd.f32 %v9809_v22, %v9808_v30  ;;  %v1439_v29 = vmul.f32 %v9810_v45, %v6233_v31  ;;  %v1483_v38 = vmul.f32 %v5463_v12, %v6450_v23  ;;  %v1485_v62 = vmul.f32 %v5466_v13, %v6450_v23 }
  0xe7   :  { %v1482_v51 = vmul.f32 %v5475_v16, %v6450_v23  ;;  %v1484_v11 = vmul.f32 %v5478_v17, %v6450_v23  ;;  %v1712_v52 = vadd.f32 %v6278_v26, %v1536_v43  ;;  %v1728_v5 = vadd.f32 %v6302_v40, %v1552_v34  ;;  %v9812_v43 = vld [vmem:[#allocation78_spill] sm:$0xff] }
  0xe8   :  { %v719_v60 = vadd.f32 %v9811_v63, %v287_v33  ;;  %v289_v37 = vmul.f32 %v9779_v28, %v6174_v59  ;;  %v1611_v7 = vadd.f32 %v1483_v38, %v6352_v4  ;;  %v1613_v1 = vadd.f32 %v1485_v62, %v6355_v47  ;;  %v6481_v33 = vpop.permute.xlu1 %1678  ;;  %v9852_v38 = vld [vmem:[#allocation83_spill] sm:$0xff] }
  0xe9   :  { %v1610_v39 = vadd.f32 %v1482_v51, %v6359_v27  ;;  %v1612_v8 = vadd.f32 %v1484_v11, %v6373_v14  ;;  %v6478_v41 = vpack.c.bf16 %v1854_v10, %v1838_v21  ;;  %v1840_v0 = vmax.f32 %v1712_v52, 0.0  ;;  %v9818_v51 = vld [vmem:[#allocation67_spill] sm:$0xff] }
  0xea   :  { %v1856_v48 = vmax.f32 %v1728_v5, 0.0  ;;  %v1151_v34 = vadd.f32 %v9812_v43, %v719_v60  ;;  %v6484_v30 = vadd.f32 %v6476_v58, %v1611_v7  ;;  %v6487_v4 = vadd.f32 %v6476_v58, %v1613_v1  ;;  %v9813_v5 = vld [vmem:[#allocation107_spill] sm:$0xff]  ;;  %v9816_v1 = vld [vmem:[#allocation66_spill] sm:$0xff] }
  0xeb   :  { %v6490_v47 = vadd.f32 %v6476_v58, %v1610_v39  ;;  %v1567_v27 = vadd.f32 %v1439_v29, %v1135_v55  ;;  %v1739_v14 = vadd.f32 %v6481_v33, %v6261_v18  ;;  %v1741_v21 = vadd.f32 %v6481_v33, %v6269_v32 }
  0xec   :  { %v1738_v10 = vadd.f32 %v6481_v33, %v6272_v24  ;;  %v1740_v22 = vadd.f32 %v6481_v33, %v6275_v50  ;;  %v6504_v55 = vadd.f32 %v6476_v58, %v1612_v8  ;;  %v6506_v32 = vpack.c.bf16 %v1856_v48, %v1840_v0  ;;  %v9814_v50 = vld [vmem:[#allocation108_spill] sm:$0xff]  ;;  %v6511_v7 = vpop.permute.xlu1 %819 }
  0xed   :  { %v1867_v29 = vmax.f32 %v1739_v14, 0.0  ;;  %v1869_v18 = vmax.f32 %v1741_v21, 0.0  ;;  %v1583_v24 = vadd.f32 %v9813_v5, %v1151_v34  ;;  %v1743_v63 = vadd.f32 %v6481_v33, %v1567_v27  ;;  %9815 = vst [vmem:[#allocation36_spill] sm:$0xff] %v6511_v7 }
  0xee   :  { %v1866_v11 = vmax.f32 %v1738_v10, 0.0  ;;  %v1868_v52 = vmax.f32 %v1740_v22, 0.0  ;;  %v721_v60 = vadd.f32 %v9814_v50, %v289_v37  ;;  %v9817_v39 = vmax.f32 %v9816_v1, 0.0  ;;  %v9822_v22 = vld [vmem:[#allocation51_spill] sm:$0xff] }
  0xef   :  { %v9819_v8 = vmax.f32 %v9818_v51, 0.0  ;;  %v9820_v14 = vmax.f32 %v6252_v56, 0.0  ;;  %v9821_v0 = vmax.f32 %v6266_v25, 0.0  ;;  %v1067_v34 = vmul.f32 %v5400_v46, %v6511_v7  ;;  %v9823_v25 = vld [vmem:[#allocation115_spill] sm:$0xff] }
  0xf0   :  { %v4924_v43 = vpack.c.bf16 %v9817_v39, %v1867_v29  ;;  %v1069_v37 = vmul.f32 %v5407_v49, %v6511_v7  ;;  %v1066_v27 = vmul.f32 %v5455_v9, %v6511_v7  ;;  %v1068_v10 = vmul.f32 %v5472_v15, %v6511_v7  ;;  %v9824_v29 = vld [vmem:[#allocation134_spill] sm:$0xff]  ;;  %v9855_v7 = vld [vmem:[#allocation48_spill] sm:$0xff] }
  0xf1   :  { %v4940_v62 = vpack.c.bf16 %v9819_v8, %v1869_v18  ;;  %v4926_v21 = vpack.c.bf16 %v9820_v14, %v1866_v11  ;;  %v4942_v48 = vpack.c.bf16 %v9821_v0, %v1868_v52  ;;  %v1759_v51 = vadd.f32 %v9822_v22, %v1583_v24  ;;  %v9825_v11 = vld [vmem:[#allocation81_spill] sm:$0xff]  ;;  %v9827_v24 = vld [vmem:[#allocation27_spill] sm:$0xff] }
  0xf2   :  { %4925 = vmatprep.subr.bf16.mxu0 %v4924_v43  ;;  %v1137_v18 = vadd.f32 %v9824_v29, %v9823_v25  ;;  %v1153_v52 = vadd.f32 %v9825_v11, %v721_v60  ;;  %v1195_v5 = vadd.f32 %v1067_v34, %v6411_v19  ;;  %v1197_v50 = vadd.f32 %v1069_v37, %v6413_v36  ;;  %v6537_v43 = vpop.permute.xlu1 %823  ;;  %v9828_v0 = vld [vmem:[#allocation109_spill] sm:$0xff] }
  0xf3   :  { %4941 = vmatprep.subr.bf16.mxu1 %v4940_v62  ;;  %4927 = vmatpush1.bf16.msra.mxu0 %v4926_v21  ;;  %v1194_v1 = vadd.f32 %v1066_v27, %v6415_v2  ;;  %v1871_v39 = vmax.f32 %v1743_v63, 0.0  ;;  %9826 = vst [vmem:[#allocation80_spill] sm:$0xff] %v6537_v43  ;;  %v1196_v62 = vadd.f32 %v1068_v10, %v6419_v53  ;;  %v1887_v8 = vmax.f32 %v1759_v51, 0.0  ;;  %v9829_v21 = vld [vmem:[#allocation119_spill] sm:$0xff]  ;;  %v9830_v2 = vld [vmem:[#allocation121_spill] sm:$0xff]  ;;  %v9831_v53 = vld [vmem:[#allocation122_spill] sm:$0xff] }
  0xf4   :  { %4943 = vmatpush1.bf16.msra.mxu1 %v4942_v48  ;;  %v1441_v14 = vmul.f32 %v9827_v24, %v6233_v31  ;;  %v1585_v25 = vadd.f32 %v9828_v0, %v1153_v52  ;;  %v1083_v60 = vmul.f32 %v5400_v46, %v6537_v43  ;;  %v1627_v19 = vadd.f32 %v9829_v21, %v1195_v5  ;;  %v9832_v27 = vld [vmem:[#allocation123_spill] sm:$0xff]  ;;  %v9833_v5 = vld [vmem:[#allocation22_spill] sm:$0xff] }
  0xf5   :  { %v1085_v36 = vmul.f32 %v5407_v49, %v6537_v43  ;;  %v1629_v63 = vadd.f32 %v9830_v2, %v1197_v50  ;;  %v1082_v48 = vmul.f32 %v5455_v9, %v6537_v43  ;;  %v1626_v34 = vadd.f32 %v9831_v53, %v1194_v1  ;;  %v9838_v21 = vld [vmem:[#allocation110_spill] sm:$0xff] }
  0xf6   :  { %v1084_v37 = vmul.f32 %v5472_v15, %v6537_v43  ;;  %v1628_v10 = vadd.f32 %v9832_v27, %v1196_v62  ;;  %v1211_v51 = vadd.f32 %v1083_v60, %v6437_v42  ;;  %v6557_v29 = vpack.c.bf16 %v1887_v8, %v1871_v39  ;;  %v6564_v1 = vpop.permute.xlu1 %1255  ;;  %v9835_v62 = vld [vmem:[#allocation116_spill] sm:$0xff]  ;;  %v9836_v42 = vld [vmem:[#allocation135_spill] sm:$0xff] }
  0xf7   :  { %v1213_v46 = vadd.f32 %v1085_v36, %v6440_v44  ;;  %v1569_v11 = vadd.f32 %v1441_v14, %v1137_v18  ;;  %v1210_v49 = vadd.f32 %v1082_v48, %v6443_v61  ;;  %v1761_v9 = vadd.f32 %v9822_v22, %v1585_v25  ;;  %9834 = vst [vmem:[#allocation84_spill] sm:$0xff] %v6564_v1  ;;  %v9837_v44 = vld [vmem:[#allocation30_spill] sm:$0xff] }
  0xf8   :  { %v1212_v52 = vadd.f32 %v1084_v37, %v6447_v6  ;;  %v286_v50 = vmul.f32 %v9833_v5, %v6174_v59  ;;  %v1134_v0 = vadd.f32 %v9836_v42, %v9835_v62  ;;  %v1438_v39 = vmul.f32 %v9837_v44, %v6233_v31  ;;  %v9840_v42 = vld [vmem:[#allocation125_spill] sm:$0xff] }
  0xf9   :  { %v1745_v15 = vadd.f32 %v6481_v33, %v1569_v11  ;;  %v288_v61 = vmul.f32 %v9790_v57, %v6174_v59  ;;  %v1515_v6 = vmul.f32 %v5463_v12, %v6564_v1  ;;  %v1517_v18 = vmul.f32 %v5466_v13, %v6564_v1  ;;  %v9839_v12 = vld [vmem:[#allocation82_spill] sm:$0xff] }
  0xfa   :  { %v1514_v8 = vmul.f32 %v5475_v16, %v6564_v1  ;;  %v1516_v14 = vmul.f32 %v5478_v17, %v6564_v1  ;;  %v1889_v60 = vmax.f32 %v1761_v9, 0.0  ;;  %v718_v36 = vadd.f32 %v9838_v21, %v286_v50  ;;  %v6587_v56 = vpop.permute.xlu1 %1688  ;;  %v9841_v17 = vld [vmem:[#allocation124_spill] sm:$0xff]  ;;  %v9843_v50 = vld [vmem:[#allocation31_spill] sm:$0xff]  ;;  %v9850_v21 = vld [vmem:[#allocation117_spill] sm:$0xff] }
  0xfb   :  { %v1873_v25 = vmax.f32 %v1745_v15, 0.0  ;;  %v1566_v2 = vadd.f32 %v1438_v39, %v1134_v0  ;;  %v1643_v48 = vadd.f32 %v1515_v6, %v1211_v51  ;;  %v1645_v53 = vadd.f32 %v1517_v18, %v1213_v46  ;;  %v9842_v15 = vld [vmem:[#allocation29_spill] sm:$0xff]  ;;  %v9847_v18 = vld [vmem:[#allocation70_spill] sm:$0xff] }
  0xfc   :  { %v1642_v37 = vadd.f32 %v1514_v8, %v1210_v49  ;;  %v1644_v27 = vadd.f32 %v1516_v14, %v1212_v52  ;;  %v1150_v62 = vadd.f32 %v9839_v12, %v718_v36  ;;  %v720_v16 = vadd.f32 %v9840_v42, %v288_v61  ;;  %v9844_v51 = vld [vmem:[#allocation137_spill] sm:$0xff]  ;;  %v9845_v49 = vld [vmem:[#allocation139_spill] sm:$0xff]  ;;  %v9848_v8 = vld [vmem:[#allocation72_spill] sm:$0xff] }
  0xfd   :  { %v6582_v11 = vpack.c.bf16 %v1889_v60, %v1873_v25  ;;  %v1742_v13 = vadd.f32 %v6481_v33, %v1566_v2  ;;  %v1008_v9 = vmul.f32 %v9842_v15, %v9841_v17  ;;  %v1440_v0 = vmul.f32 %v9843_v50, %v6233_v31  ;;  %v9846_v39 = vld [vmem:[#allocation69_spill] sm:$0xff]  ;;  %v9849_v25 = vld [vmem:[#allocation35_spill] sm:$0xff]  ;;  %v9851_v12 = vld [vmem:[#allocation136_spill] sm:$0xff] }
  0xfe   :  { %v303_v46 = vmul.f32 %v9778_v20, %v9844_v51  ;;  %v319_v52 = vmul.f32 %v9778_v20, %v9845_v49  ;;  %v1771_v6 = vadd.f32 %v6587_v56, %v9846_v39  ;;  %v1773_v61 = vadd.f32 %v6587_v56, %v9847_v18  ;;  %v6608_v26 = vpop.permute.xlu1 %1698 }
  0xff   :  { %v1770_v14 = vadd.f32 %v6587_v56, %v9848_v8  ;;  %v1772_v60 = vadd.f32 %v6587_v56, %v9849_v25  ;;  %v1582_v36 = vadd.f32 %v9850_v21, %v1150_v62  ;;  %v1870_v2 = vmax.f32 %v1742_v13, 0.0  ;;  %9853 = vst [vmem:[#allocation11_spill] sm:$0xff] %v6608_v26  ;;  %v9854_v8 = vld [vmem:[#allocation126_spill] sm:$0xff]  ;;  %v9856_v25 = vld [vmem:[#allocation13_spill] sm:$0xff] }
 0x100   :  { %v1136_v42 = vadd.f32 %v1008_v9, %v9851_v12  ;;  %v1152_v31 = vadd.f32 %v9852_v38, %v720_v16  ;;  %v1899_v17 = vmax.f32 %v1771_v6, 0.0  ;;  %v1901_v59 = vmax.f32 %v1773_v61, 0.0 }
 0x101   :  { %v1898_v40 = vmax.f32 %v1770_v14, 0.0  ;;  %v1900_v39 = vmax.f32 %v1772_v60, 0.0  ;;  %v1758_v18 = vadd.f32 %v9822_v22, %v1582_v36  ;;  %v623_v35 = vmul.f32 %v9856_v25, %v9855_v7 }
 0x102   :  { %v1568_v1 = vadd.f32 %v1440_v0, %v1136_v42  ;;  %v1584_v43 = vadd.f32 %v9854_v8, %v1152_v31  ;;  %v9857_v62 = vmax.f32 %v6484_v30, 0.0  ;;  %v9858_v9 = vmax.f32 %v6487_v4, 0.0 }
 0x103   :  { %v9859_v16 = vmax.f32 %v6490_v47, 0.0  ;;  %v9860_v61 = vmax.f32 %v6504_v55, 0.0  ;;  %v1803_v60 = vadd.f32 %v6608_v26, %v1627_v19  ;;  %v1805_v0 = vadd.f32 %v6608_v26, %v1629_v63  ;;  %v9861_v47 = vld [vmem:[#allocation45_spill] sm:$0xff] }
 0x104   :  { %v4928_v13 = vpack.c.bf16 %v9857_v62, %v1899_v17  ;;  %v4944_v38 = vpack.c.bf16 %v9858_v9, %v1901_v59  ;;  %v1802_v31 = vadd.f32 %v6608_v26, %v1626_v34  ;;  %v1804_v21 = vadd.f32 %v6608_v26, %v1628_v10  ;;  %v6629_v17 = vpop.permute.xlu1 %1703 }
 0x105   :  { %v4930_v6 = vpack.c.bf16 %v9859_v16, %v1898_v40  ;;  %v4946_v14 = vpack.c.bf16 %v9860_v61, %v1900_v39  ;;  %v1886_v30 = vmax.f32 %v1758_v18, 0.0  ;;  %v1744_v4 = vadd.f32 %v6481_v33, %v1568_v1  ;;  %9862 = vst [vmem:[#allocation37_spill] sm:$0xff] %v6629_v17  ;;  %v9864_v16 = vld [vmem:[#allocation19_spill] sm:$0xff] }
 0x106   :  { %4929 = vmatprep.subr.bf16.mxu0 %v4928_v13  ;;  %4945 = vmatprep.subr.bf16.mxu1 %v4944_v38  ;;  %v1760_v59 = vadd.f32 %v9822_v22, %v1584_v43  ;;  %v735_v40 = vadd.f32 %v9861_v47, %v303_v46  ;;  %v1931_v55 = vmax.f32 %v1803_v60, 0.0  ;;  %v1933_v19 = vmax.f32 %v1805_v0, 0.0  ;;  %v9863_v38 = vld [vmem:[#allocation101_spill] sm:$0xff]  ;;  %v9866_v0 = vld [vmem:[#allocation127_spill] sm:$0xff] }
 0x107   :  { %4931 = vmatpush1.bf16.msra.mxu0 %v4930_v6  ;;  %4947 = vmatpush1.bf16.msra.mxu1 %v4946_v14  ;;  %v1930_v63 = vmax.f32 %v1802_v31, 0.0  ;;  %v1932_v36 = vmax.f32 %v1804_v21, 0.0  ;;  %v1819_v34 = vadd.f32 %v6629_v17, %v1643_v48  ;;  %v1821_v10 = vadd.f32 %v6629_v17, %v1645_v53  ;;  %v9865_v48 = vld [vmem:[#allocation88_spill] sm:$0xff]  ;;  %v9867_v21 = vld [vmem:[#allocation14_spill] sm:$0xff] }
 0x108   :  { %v1818_v12 = vadd.f32 %v6629_v17, %v1642_v37  ;;  %v1820_v1 = vadd.f32 %v6629_v17, %v1644_v27  ;;  %v6635_v42 = vpack.c.bf16 %v1886_v30, %v1870_v2  ;;  %v1872_v43 = vmax.f32 %v1744_v4, 0.0  ;;  %v9868_v4 = vld [vmem:[#allocation20_spill] sm:$0xff] }
 0x109   :  { %v1888_v46 = vmax.f32 %v1760_v59, 0.0  ;;  %v751_v39 = vadd.f32 %v623_v35, %v319_v52  ;;  %v1947_v18 = vmax.f32 %v1819_v34, 0.0  ;;  %v1949_v8 = vmax.f32 %v1821_v10, 0.0 }
 0x10a   :  { %v1946_v62 = vmax.f32 %v1818_v12, 0.0  ;;  %v1948_v13 = vmax.f32 %v1820_v1, 0.0  ;;  %v1055_v6 = vmul.f32 %v9864_v16, %v9863_v38  ;;  %v1167_v61 = vadd.f32 %v9865_v48, %v735_v40  ;;  %v6656_v40 = vld [vmem:[%s9419_s3] sm:$0xff]  ;;  %v6682_v48 = vld [vmem:[%s9419_s3 + $0x8] sm:$0xff] }
 0x10b   :  { %v4974_v9 = vpack.c.bf16 %v1888_v46, %v1872_v43  ;;  %v1487_v53 = vmul.f32 %v9810_v45, %v6450_v23  ;;  %v4932_v37 = vpack.c.bf16 %v1947_v18, %v1931_v55  ;;  %v4948_v27 = vpack.c.bf16 %v1949_v8, %v1933_v19  ;;  %v9870_v46 = vld [vmem:[#allocation90_spill] sm:$0xff]  ;;  %v9871_v18 = vld [vmem:[#allocation16_spill] sm:$0xff] }
 0x10c   :  { %v4934_v2 = vpack.c.bf16 %v1946_v62, %v1930_v63  ;;  %v4950_v14 = vpack.c.bf16 %v1948_v13, %v1932_v36  ;;  %v1183_v60 = vadd.f32 %v1055_v6, %v751_v39  ;;  %v1599_v35 = vadd.f32 %v9866_v0, %v1167_v61  ;;  %v9869_v63 = vld [vmem:[#allocation46_spill] sm:$0xff]  ;;  %v9873_v13 = vld [vmem:[#allocation23_spill] sm:$0xff] }
 0x10d   :  { %v305_v52 = vmul.f32 %v9779_v28, %v9844_v51  ;;  %v321_v31 = vmul.f32 %v9779_v28, %v9845_v49  ;;  %4933 = vmatprep.subr.bf16.mxu0 %v4932_v37  ;;  %4949 = vmatprep.subr.bf16.mxu1 %v4948_v27  ;;  %v625_v30 = vmul.f32 %v9867_v21, %v9855_v7  ;;  %v9876_v0 = vmov 0.0  }
 0x10e   :  { %v1057_v59 = vmul.f32 %v9868_v4, %v9863_v38  ;;  %v1489_v47 = vmul.f32 %v9827_v24, %v6450_v23  ;;  %4935 = vmatpush1.bf16.msra.mxu0 %v4934_v2  ;;  %4951 = vmatpush1.bf16.msra.mxu1 %v4950_v14  ;;  %v1615_v55 = vadd.f32 %v1487_v53, %v1183_v60  ;;  %v9874_v53 = vld [vmem:[#allocation128_spill] sm:$0xff] }
 0x10f   :  { %v1775_v19 = vadd.f32 %v6587_v56, %v1599_v35  ;;  %v737_v36 = vadd.f32 %v9869_v63, %v305_v52  ;;  %4953 = vmatprep.subr.bf16.mxu0 %v6431_v3  ;;  %4969 = vmatprep.subr.bf16.mxu1 %v6445_v54  ;;  %v753_v34 = vadd.f32 %v625_v30, %v321_v31  ;;  %v9872_v54 = vld [vmem:[#allocation47_spill] sm:$0xff]  ;;  %v9878_v63 = vld [vmem:[#allocation18_spill] sm:$0xff] }
 0x110   :  { %v302_v10 = vmul.f32 %v9833_v5, %v9844_v51  ;;  %v318_v12 = vmul.f32 %v9833_v5, %v9845_v49  ;;  %v1791_v1 = vadd.f32 %v6476_v58, %v1615_v55  ;;  %v622_v8 = vmul.f32 %v9871_v18, %v9855_v7  ;;  %v6707_v55 = vld [vmem:[%s9419_s3 + $0x10] sm:$0xff] }
 0x111   :  { %v1903_v43 = vmax.f32 %v1775_v19, 0.0  ;;  %v1169_v39 = vadd.f32 %v9870_v46, %v737_v36  ;;  %4824 = vmatmul.mubr.msk.f32.vlgmr.msra.gmra.mrb[0].mxu0 %vm2018_vm0, %v6656_v40  ;;  %4832 = vmatmul.mubr.msk.f32.vlgmr.msra.gmra.mrb[0].mxu1 %vm2018_vm0, %v6656_v40  ;;  %v1185_v3 = vadd.f32 %v1057_v59, %v753_v34  ;;  %v1054_v6 = vmul.f32 %v9873_v13, %v9863_v38  ;;  %v9879_v34 = vld [vmem:[#allocation49_spill] sm:$0xff] }
 0x112   :  { %v734_v62 = vadd.f32 %v9872_v54, %v302_v10  ;;  %4955 = vmatpush1.bf16.msra.mxu0 %v6478_v41  ;;  %4971 = vmatpush1.bf16.msra.mxu1 %v6506_v32  ;;  %v1919_v61 = vmax.f32 %v1791_v1, 0.0  ;;  %v750_v27 = vadd.f32 %v622_v8, %v318_v12  ;;  %v1486_v2 = vmul.f32 %v9837_v44, %v6450_v23  ;;  %v9875_v41 = vld [vmem:[#allocation91_spill] sm:$0xff] }
 0x113   :  { %v1601_v37 = vadd.f32 %v9874_v53, %v1169_v39  ;;  %4957 = vmatprep.subr.bf16.mxu0 %v6557_v29  ;;  %4973 = vmatprep.subr.bf16.mxu1 %v6582_v11  ;;  %v1617_v14 = vadd.f32 %v1489_v47, %v1185_v3  ;;  %v304_v32 = vmul.f32 %v9790_v57, %v9844_v51  ;;  %v9877_v11 = vld [vmem:[#allocation129_spill] sm:$0xff]  ;;  %v9880_v39 = vld [vmem:[#allocation92_spill] sm:$0xff]  ;;  %v9881_v3 = vld [vmem:[#allocation102_spill] sm:$0xff] }
 0x114   :  { %v1166_v60 = vadd.f32 %v9875_v41, %v734_v62  ;;  %2113 = vmatprep.mubr.f32.mxu0 %v9876_v0  ;;  %2226 = vmatprep.mubr.f32.mxu1 %v9876_v0  ;;  %v4960_v35 = vpack.c.bf16 %v1919_v61, %v1903_v43  ;;  %v1182_v31 = vadd.f32 %v1054_v6, %v750_v27  ;;  %v9882_v61 = vld [vmem:[#allocation52_spill] sm:$0xff]  ;;  %v9884_v41 = vld [vmem:[#allocation130_spill] sm:$0xff] }
 0x115   :  { %v1777_v52 = vadd.f32 %v6587_v56, %v1601_v37  ;;  %4825 = vmatmul.mubr.msk.f32.gmra.mrb[2].mxu0 %vm2018_vm0, %v6682_v48  ;;  %4833 = vmatmul.mubr.msk.f32.gmra.mrb[2].mxu1 %vm2018_vm0, %v6682_v48  ;;  %v1793_v29 = vadd.f32 %v6476_v58, %v1617_v14  ;;  %v320_v59 = vmul.f32 %v9790_v57, %v9845_v49  ;;  %v9883_v37 = vld [vmem:[#allocation10_spill] sm:$0xff] }
 0x116   :  { %v1598_v30 = vadd.f32 %v9877_v11, %v1166_v60  ;;  %4959 = vmatpush1.bf16.msra.mxu0 %v6635_v42  ;;  %4975 = vmatpush1.bf16.msra.mxu1 %v4974_v9  ;;  %v1614_v19 = vadd.f32 %v1486_v2, %v1182_v31  ;;  %v624_v36 = vmul.f32 %v9878_v63, %v9855_v7  ;;  %v9886_v31 = vld [vmem:[#allocation36_spill] sm:$0xff] }
 0x117   :  { %v1905_v47 = vmax.f32 %v1777_v52, 0.0  ;;  %v736_v10 = vadd.f32 %v9879_v34, %v304_v32  ;;  %4961 = vmatprep.subr.bf16.mxu0 %v4960_v35  ;;  %v1921_v12 = vmax.f32 %v1793_v29, 0.0  ;;  %2119 = vmatprep.mubr.f32.mxu0 %v9876_v0  ;;  %v1056_v42 = vmul.f32 %v9842_v15, %v9863_v38  ;;  %v9885_v32 = vld [vmem:[#allocation103_spill] sm:$0xff]  ;;  %v6739_v52 = vld [vmem:[%s9419_s3 + $0x18] sm:$0xff]  ;;  %v9887_v11 = vld [vmem:[#allocation80_spill] sm:$0xff] }
 0x118   :  { %v1774_v1 = vadd.f32 %v6587_v56, %v1598_v30  ;;  %v1488_v9 = vmul.f32 %v9843_v50, %v6450_v23  ;;  %2232 = vmatprep.mubr.f32.mxu1 %v9876_v0  ;;  %v1790_v43 = vadd.f32 %v6476_v58, %v1614_v19  ;;  %v752_v46 = vadd.f32 %v624_v36, %v320_v59  ;;  %v9888_v59 = vld [vmem:[#allocation84_spill] sm:$0xff] }
 0x119   :  { %v1168_v8 = vadd.f32 %v9880_v39, %v736_v10  ;;  %v335_v54 = vmul.f32 %v9778_v20, %v9881_v3  ;;  %v4976_v62 = vpack.c.bf16 %v1921_v12, %v1905_v47  ;;  %4826 = vmatmul.mubr.msk.f32.gmra.mrb[4].mxu0 %vm2018_vm0, %v6707_v55  ;;  %4834 = vmatmul.mubr.msk.f32.gmra.mrb[4].mxu1 %vm2018_vm0, %v6707_v55 }
 0x11a   :  { %v1902_v6 = vmax.f32 %v1774_v1, 0.0  ;;  %v351_v53 = vmul.f32 %v9778_v20, %v9882_v61  ;;  %v639_v27 = vmul.f32 %v9856_v25, %v9883_v37  ;;  %v1918_v2 = vmax.f32 %v1790_v43, 0.0  ;;  %2125 = vmatprep.mubr.f32.mxu0 %v9876_v0  ;;  %2238 = vmatprep.mubr.f32.mxu1 %v9876_v0 }
 0x11b   :  { %v1184_v14 = vadd.f32 %v1056_v42, %v752_v46  ;;  %v1600_v60 = vadd.f32 %v9884_v41, %v1168_v8  ;;  %v655_v35 = vmul.f32 %v9856_v25, %v9885_v32  ;;  %4977 = vmatprep.subr.bf16.mxu1 %v4976_v62  ;;  %v1071_v29 = vmul.f32 %v9864_v16, %v9886_v31  ;;  %v9889_v46 = vld [vmem:[#allocation131_spill] sm:$0xff] }
 0x11c   :  { %v767_v20 = vadd.f32 %v639_v27, %v335_v54  ;;  %v1087_v30 = vmul.f32 %v9864_v16, %v9887_v11  ;;  %v1519_v25 = vmul.f32 %v9810_v45, %v9888_v59  ;;  %v4962_v47 = vpack.c.bf16 %v1918_v2, %v1902_v6  ;;  %v9890_v27 = vld [vmem:[#allocation118_spill] sm:$0xff] }
 0x11d   :  { %v1616_v19 = vadd.f32 %v1488_v9, %v1184_v14  ;;  %v1776_v36 = vadd.f32 %v6587_v56, %v1600_v60  ;;  %v783_v34 = vadd.f32 %v655_v35, %v351_v53  ;;  %v337_v12 = vmul.f32 %v9779_v28, %v9881_v3  ;;  %4827 = vmatmul.mubr.msk.f32.gmra.mrb[6].mxu0 %vm2018_vm0, %v6739_v52 }
 0x11e   :  { %v1199_v10 = vadd.f32 %v1071_v29, %v767_v20  ;;  %v353_v1 = vmul.f32 %v9779_v28, %v9882_v61  ;;  %v641_v42 = vmul.f32 %v9867_v21, %v9883_v37  ;;  %4963 = vmatpush1.bf16.msra.mxu0 %v4962_v47  ;;  %v657_v43 = vmul.f32 %v9867_v21, %v9885_v32  ;;  %v6764_v28 = vld [vmem:[%s9419_s3 + $0x20] sm:$0xff] }
 0x11f   :  { %v1792_v45 = vadd.f32 %v6476_v58, %v1616_v19  ;;  %v1904_v16 = vmax.f32 %v1776_v36, 0.0  ;;  %v1215_v9 = vadd.f32 %v1087_v30, %v783_v34  ;;  %4835 = vmatmul.mubr.msk.f32.gmra.mrb[6].mxu1 %vm2018_vm0, %v6739_v52  ;;  %v1073_v54 = vmul.f32 %v9868_v4, %v9886_v31  ;;  %2131 = vmatprep.mubr.f32.mxu0 %v9876_v0 }
 0x120   :  { %v1631_v39 = vadd.f32 %v9889_v46, %v1199_v10  ;;  %v769_v8 = vadd.f32 %v641_v42, %v337_v12  ;;  %v1089_v62 = vmul.f32 %v9868_v4, %v9887_v11  ;;  %v785_v53 = vadd.f32 %v657_v43, %v353_v1  ;;  %2244 = vmatprep.mubr.f32.mxu1 %v9876_v0 }
 0x121   :  { %v1920_v21 = vmax.f32 %v1792_v45, 0.0  ;;  %v1647_v6 = vadd.f32 %v1519_v25, %v1215_v9  ;;  %v1505_v2 = vmul.f32 %v9827_v24, %v9890_v27  ;;  %v1521_v60 = vmul.f32 %v9827_v24, %v9888_v59  ;;  %4828 = vmatmul.mubr.msk.f32.gmra.mrb[8].mxu0 %vm2018_vm0, %v6764_v28  ;;  %v6790_v24 = vld [vmem:[%s9419_s3 + $0x28] sm:$0xff] }
 0x122   :  { %v1807_v14 = vadd.f32 %v6608_v26, %v1631_v39  ;;  %v1201_v41 = vadd.f32 %v1073_v54, %v769_v8  ;;  %v334_v35 = vmul.f32 %v9833_v5, %v9881_v3  ;;  %v1217_v29 = vadd.f32 %v1089_v62, %v785_v53  ;;  %2137 = vmatprep.mubr.f32.mxu0 %v9876_v0 }
 0x123   :  { %v4978_v4 = vpack.c.bf16 %v1920_v21, %v1904_v16  ;;  %v1823_v20 = vadd.f32 %v6629_v17, %v1647_v6  ;;  %v350_v30 = vmul.f32 %v9833_v5, %v9882_v61  ;;  %4836 = vmatmul.mubr.msk.f32.gmra.mrb[8].mxu1 %vm2018_vm0, %v6764_v28  ;;  %v638_v19 = vmul.f32 %v9871_v18, %v9883_v37 }
 0x124   :  { %v1935_v25 = vmax.f32 %v1807_v14, 0.0  ;;  %v1633_v47 = vadd.f32 %v1505_v2, %v1201_v41  ;;  %v654_v36 = vmul.f32 %v9871_v18, %v9885_v32  ;;  %2250 = vmatprep.mubr.f32.mxu1 %v9876_v0  ;;  %v1649_v34 = vadd.f32 %v1521_v60, %v1217_v29 }
 0x125   :  { %4979 = vmatpush1.bf16.msra.mxu1 %v4978_v4  ;;  %v1951_v5 = vmax.f32 %v1823_v20, 0.0  ;;  %v1070_v10 = vmul.f32 %v9873_v13, %v9886_v31  ;;  %v1086_v12 = vmul.f32 %v9873_v13, %v9887_v11  ;;  %v766_v42 = vadd.f32 %v638_v19, %v334_v35  ;;  %4829 = vmatmul.mubr.msk.f32.gmra.mrb[10].mxu0 %vm2018_vm0, %v6790_v24  ;;  %v6817_v13 = vld [vmem:[%s9419_s3 + $0x30] sm:$0xff]  ;;  %v6842_v20 = vld [vmem:[%s9419_s3 + $0x38] sm:$0xff]  ;;  %v9893_v19 = vld [vmem:[#allocation138_spill] sm:$0xff] }
 0x126   :  { %v1809_v1 = vadd.f32 %v6608_v26, %v1633_v47  ;;  %v782_v45 = vadd.f32 %v654_v36, %v350_v30  ;;  %v1502_v18 = vmul.f32 %v9837_v44, %v9890_v27  ;;  %v1825_v9 = vadd.f32 %v6629_v17, %v1649_v34  ;;  %2143 = vmatprep.mubr.f32.mxu0 %v9876_v0  ;;  %v9891_v30 = vld [vmem:[#allocation132_spill] sm:$0xff]  ;;  %v9894_v34 = vld [vmem:[#allocation43_spill] sm:$0xff] }
 0x127   :  { %v4964_v16 = vpack.c.bf16 %v1951_v5, %v1935_v25  ;;  %v1518_v43 = vmul.f32 %v9837_v44, %v9888_v59  ;;  %v336_v46 = vmul.f32 %v9790_v57, %v9881_v3  ;;  %4837 = vmatmul.mubr.msk.f32.gmra.mrb[10].mxu1 %vm2018_vm0, %v6790_v24  ;;  %v1198_v8 = vadd.f32 %v1070_v10, %v766_v42  ;;  %v9892_v25 = vld [vmem:[#allocation32_spill] sm:$0xff]  ;;  %v9895_v10 = vld [vmem:[#allocation34_spill] sm:$0xff]  ;;  %v9897_v42 = vld [vmem:[#allocation17_spill] sm:$0xff] }
 0x128   :  { %v1937_v39 = vmax.f32 %v1809_v1, 0.0  ;;  %v1214_v54 = vadd.f32 %v1086_v12, %v782_v45  ;;  %v352_v62 = vmul.f32 %v9790_v57, %v9882_v61  ;;  %2256 = vmatprep.mubr.f32.mxu1 %v9876_v0  ;;  %v1953_v44 = vmax.f32 %v1825_v9, 0.0  ;;  %v9896_v1 = vld [vmem:[#allocation9_spill] sm:$0xff]  ;;  %v9898_v45 = vld [vmem:[#allocation8_spill] sm:$0xff] }
 0x129   :  { %4965 = vmatprep.subr.bf16.mxu0 %v4964_v16  ;;  %v640_v21 = vmul.f32 %v9878_v63, %v9883_v37  ;;  %v656_v6 = vmul.f32 %v9878_v63, %v9885_v32  ;;  %v1072_v53 = vmul.f32 %v9842_v15, %v9886_v31  ;;  %v1630_v2 = vadd.f32 %v1502_v18, %v1198_v8  ;;  %v9901_v8 = vld [vmem:[#allocation65_spill] sm:$0xff] }
 0x12a   :  { %v1646_v14 = vadd.f32 %v1518_v43, %v1214_v54  ;;  %v1088_v57 = vmul.f32 %v9842_v15, %v9887_v11  ;;  %v1504_v41 = vmul.f32 %v9843_v50, %v9890_v27  ;;  %4830 = vmatmul.mubr.msk.f32.gmra.mrb[12].mxu0 %vm2018_vm0, %v6817_v13  ;;  %v4980_v60 = vpack.c.bf16 %v1953_v44, %v1937_v39 }
 0x12b   :  { %v768_v35 = vadd.f32 %v640_v21, %v336_v46  ;;  %v784_v4 = vadd.f32 %v656_v6, %v352_v62  ;;  %v1520_v63 = vmul.f32 %v9843_v50, %v9888_v59  ;;  %4838 = vmatmul.mubr.msk.f32.gmra.mrb[12].mxu1 %vm2018_vm0, %v6817_v13  ;;  %v1806_v15 = vadd.f32 %v6608_v26, %v1630_v2  ;;  %v9900_v46 = vld [vmem:[#allocation64_spill] sm:$0xff]  ;;  %v9902_v21 = vld [vmem:[#allocation89_spill] sm:$0xff] }
 0x12c   :  { %v1822_v29 = vadd.f32 %v6629_v17, %v1646_v14  ;;  %v243_v47 = vmul.f32 %v9892_v25, %v9891_v30  ;;  %v259_v36 = vmul.f32 %v9892_v25, %v9893_v19  ;;  %2149 = vmatprep.mubr.f32.mxu0 %v9876_v0  ;;  %4981 = vmatprep.subr.bf16.mxu1 %v4980_v60  ;;  %v9904_v60 = vld [vmem:[#allocation93_spill] sm:$0xff]  ;;  %v9918_v59 = vld [vmem:[#allocation56_spill] sm:$0xff] }
 0x12d   :  { %v1200_v50 = vadd.f32 %v1072_v53, %v768_v35  ;;  %v1216_v5 = vadd.f32 %v1088_v57, %v784_v4  ;;  %v979_v12 = vmul.f32 %v9895_v10, %v9894_v34  ;;  %v9899_v18 = vrot.slane %v9897_v42, %v9898_v45  ;;  %2262 = vmatprep.mubr.f32.mxu1 %v9876_v0  ;;  %v9903_v53 = vld [vmem:[#allocation111_spill] sm:$0xff]  ;;  %v9905_v4 = vld [vmem:[#allocation6_spill] sm:$0xff] }
 0x12e   :  { %v1934_v9 = vmax.f32 %v1806_v15, 0.0  ;;  %v1950_v43 = vmax.f32 %v1822_v29, 0.0  ;;  %v675_v39 = vadd.f32 %v9900_v46, %v243_v47  ;;  %v691_v54 = vadd.f32 %v9901_v8, %v259_v36  ;;  %4831 = vmatmul.mubr.msk.f32.gmra.mrb[14].mxu0 %vm2018_vm0, %v6842_v20  ;;  %v9906_v15 = vld [vmem:[#allocation87_spill] sm:$0xff]  ;;  %v9907_v29 = vld [vmem:[#allocation5_spill] sm:$0xff] }
 0x12f   :  { %v6857_v16 = vrot.slane %v9899_v18, %v9896_v1  ;;  %v1632_v62 = vadd.f32 %v1504_v41, %v1200_v50  ;;  %v1648_v44 = vadd.f32 %v1520_v63, %v1216_v5  ;;  %4839 = vmatmul.mubr.msk.f32.gmra.mrb[14].mxu1 %vm2018_vm0, %v6842_v20  ;;  %v9908_v47 = vrot.slane %v9906_v15, %v9907_v29  ;;  %v9909_v50 = vld [vmem:[#allocation4_spill] sm:$0xff]  ;;  %v9910_v5 = vld [vmem:[#allocation2_spill] sm:$0xff]  ;;  %v9916_v29 = vld [vmem:[#allocation71_spill] sm:$0xff] }
 0x130   :  { %v4966_v14 = vpack.c.bf16 %v1950_v43, %v1934_v9  ;;  %v1107_v57 = vadd.f32 %v979_v12, %v675_v39  ;;  %v1123_v35 = vadd.f32 %v9904_v60, %v691_v54  ;;  %2333 = vmatprep.mubr.f32.mxu0 %v9876_v0  ;;  %v9911_v42 = vrot.slane %v9906_v15, %v9910_v5  ;;  %v6889_v12 = vld [vmem:[%s9418_s0 + $0x28] sm:$0xff]  ;;  %v9913_v60 = vld [vmem:[#allocation24_spill] sm:$0xff] }
 0x131   :  { %v1411_v6 = vmul.f32 %v6857_v16, %v9902_v21  ;;  %v1427_v2 = vmul.f32 %v6857_v16, %v9903_v53  ;;  %v6875_v36 = vrot.slane %v9908_v47, %v9905_v4  ;;  %v1808_v41 = vadd.f32 %v6608_v26, %v1632_v62  ;;  %v9912_v9 = vld [vmem:[#allocation3_spill] sm:$0xff]  ;;  %2446 = vmatprep.mubr.f32.mxu1 %v9876_v0  ;;  %v9914_v47 = vld [vmem:[#allocation38_spill] sm:$0xff] }
 0x132   :  { %v1824_v63 = vadd.f32 %v6629_v17, %v1648_v44  ;;  %v6884_v18 = vrot.slane %v9911_v42, %v9909_v50  ;;  %v873_v43 = vrot.slane %v6889_v12, %v9912_v9  ;;  %4967 = vmatpush1.bf16.msra.mxu0 %v4966_v14  ;;  %v9915_v9 = vld [vmem:[#allocation68_spill] sm:$0xff]  ;;  %v1301_v61 = vrot.slane %v6889_v12, %v9896_v1 }
 0x133   :  { %v1539_v46 = vadd.f32 %v1411_v6, %v1107_v57  ;;  %v1555_v39 = vadd.f32 %v1427_v2, %v1123_v35  ;;  %v245_v8 = vmul.f32 %v6875_v36, %v9891_v30  ;;  %v261_v54 = vmul.f32 %v6875_v36, %v9893_v19  ;;  %v9917_v6 = vld [vmem:[#allocation7_spill] sm:$0xff] }
 0x134   :  { %v1936_v62 = vmax.f32 %v1808_v41, 0.0  ;;  %v1952_v44 = vmax.f32 %v1824_v63, 0.0  ;;  %v549_v15 = vmul.f32 %v6884_v18, %v9913_v60  ;;  %v565_v42 = vmul.f32 %v6884_v18, %v9914_v47  ;;  %v5208_v63 = vld [vmem:[%s9418_s0 + $0x20] sm:$0xff] }
 0x135   :  { %v1715_v5 = vadd.f32 %v9915_v9, %v1539_v46  ;;  %v1731_v14 = vadd.f32 %v9916_v29, %v1555_v39  ;;  %v6905_v2 = vrot.slane %v873_v43, %v9917_v6  ;;  %v1305_v57 = vrot.slane %v6889_v12, %v9898_v45  ;;  %4840 = vmatmul.mubr.msk.f32.vlgmr.msra.gmra.mrb[16].mxu0 %vm2018_vm0, %v6656_v40 }
 0x136   :  { %v4982_v35 = vpack.c.bf16 %v1952_v44, %v1936_v62  ;;  %v677_v17 = vadd.f32 %v549_v15, %v245_v8  ;;  %v693_v41 = vadd.f32 %v565_v42, %v261_v54  ;;  %v125_v46 = vrot.slane %v5208_v63, %v9905_v4  ;;  %2339 = vmatprep.mubr.f32.mxu0 %v9876_v0 }
 0x137   :  { %v1843_v26 = vmax.f32 %v1715_v5, 0.0  ;;  %v1859_v39 = vmax.f32 %v1731_v14, 0.0  ;;  %v981_v43 = vmul.f32 %v6905_v2, %v9894_v34  ;;  %v997_v45 = vmul.f32 %v6905_v2, %v9918_v59 }
 0x138   :  { %4983 = vmatpush1.bf16.msra.mxu1 %v4982_v35  ;;  %v6921_v8 = vrot.slane %v1305_v57, %v9896_v1  ;;  %v6924_v54 = vrot.slane %v125_v46, %v9905_v4  ;;  %v429_v62 = vrot.slane %v5208_v63, %v9909_v50  ;;  %v861_v5 = vrot.slane %v5208_v63, %v9917_v6 }
 0x139   :  { %v4984_v44 = vpack.c.bf16 %v1859_v39, %v1843_v26  ;;  %v1109_v15 = vadd.f32 %v981_v43, %v677_v17  ;;  %v1125_v42 = vadd.f32 %v997_v45, %v693_v41  ;;  %v1293_v14 = vrot.slane %v5208_v63, %v9896_v1  ;;  %4841 = vmatmul.mubr.msk.f32.gmra.mrb[18].mxu0 %vm2018_vm0, %v6682_v48 }
 0x13a   :  { %v1413_v27 = vmul.f32 %v6921_v8, %v9902_v21  ;;  %v1429_v35 = vmul.f32 %v6921_v8, %v9903_v53  ;;  %v242_v57 = vmul.f32 %v6924_v54, %v9891_v30  ;;  %v258_v46 = vmul.f32 %v6924_v54, %v9893_v19  ;;  %2345 = vmatprep.mubr.f32.mxu0 %v9876_v0 }
 0x13b   :  { %4985 = vmatprep.subr.bf16.mxu0 %v4984_v44  ;;  %4848 = vmatmul.mubr.msk.f32.vlgmr.msra.gmra.mrb[16].mxu1 %vm2018_vm0, %v6656_v40  ;;  %v6942_v26 = vrot.slane %v429_v62, %v9909_v50  ;;  %v6945_v17 = vrot.slane %v861_v5, %v9917_v6  ;;  %v6948_v45 = vrot.slane %v1293_v14, %v9896_v1 }
 0x13c   :  { %v1541_v41 = vadd.f32 %v1413_v27, %v1109_v15  ;;  %v1557_v63 = vadd.f32 %v1429_v35, %v1125_v42  ;;  %v133_v39 = vrot.slane %v6889_v12, %v9905_v4  ;;  %v437_v43 = vrot.slane %v6889_v12, %v9909_v50  ;;  %2452 = vmatprep.mubr.f32.mxu1 %v9876_v0 }
 0x13d   :  { %v546_v40 = vmul.f32 %v6942_v26, %v9913_v60  ;;  %v562_v62 = vmul.f32 %v6942_v26, %v9914_v47  ;;  %v978_v5 = vmul.f32 %v6945_v17, %v9894_v34  ;;  %v994_v27 = vmul.f32 %v6945_v17, %v9918_v59  ;;  %4842 = vmatmul.mubr.msk.f32.gmra.mrb[20].mxu0 %vm2018_vm0, %v6707_v55 }
 0x13e   :  { %v1717_v44 = vadd.f32 %v9915_v9, %v1541_v41  ;;  %v1733_v15 = vadd.f32 %v9916_v29, %v1557_v63  ;;  %v1410_v42 = vmul.f32 %v6948_v45, %v9902_v21  ;;  %v1426_v14 = vmul.f32 %v6948_v45, %v9903_v53  ;;  %2351 = vmatprep.mubr.f32.mxu0 %v9876_v0 }
 0x13f   :  { %v674_v35 = vadd.f32 %v546_v40, %v242_v57  ;;  %v690_v11 = vadd.f32 %v562_v62, %v258_v46  ;;  %v6973_v31 = vrot.slane %v133_v39, %v9905_v4  ;;  %v6976_v32 = vrot.slane %v437_v43, %v9909_v50  ;;  %4849 = vmatmul.mubr.msk.f32.gmra.mrb[18].mxu1 %vm2018_vm0, %v6682_v48 }
 0x140   :  { %v1845_v41 = vmax.f32 %v1717_v44, 0.0  ;;  %v1861_v63 = vmax.f32 %v1733_v15, 0.0  ;;  %v869_v37 = vrot.slane %v6889_v12, %v9917_v6  ;;  %2458 = vmatprep.mubr.f32.mxu1 %v9876_v0  ;;  %v9919_v44 = vld [vmem:[#allocation79_spill] sm:$0xff] }
 0x141   :  { %v1106_v57 = vadd.f32 %v978_v5, %v674_v35  ;;  %v1122_v46 = vadd.f32 %v994_v27, %v690_v11  ;;  %v244_v39 = vmul.f32 %v6973_v31, %v9891_v30  ;;  %v260_v48 = vmul.f32 %v6973_v31, %v9893_v19  ;;  %4843 = vmatmul.mubr.msk.f32.gmra.mrb[22].mxu0 %vm2018_vm0, %v6739_v52  ;;  %v9927_v19 = vld [vmem:[#allocation96_spill] sm:$0xff] }
 0x142   :  { %v5000_v43 = vpack.c.bf16 %v1861_v63, %v1845_v41  ;;  %v548_v40 = vmul.f32 %v6976_v32, %v9913_v60  ;;  %v564_v62 = vmul.f32 %v6976_v32, %v9914_v47  ;;  %v6995_v12 = vrot.slane %v869_v37, %v9917_v6  ;;  %2357 = vmatprep.mubr.f32.mxu0 %v9876_v0  ;;  %v9926_v60 = vld [vmem:[#allocation62_spill] sm:$0xff] }
 0x143   :  { %v1538_v11 = vadd.f32 %v1410_v42, %v1106_v57  ;;  %v1554_v5 = vadd.f32 %v1426_v14, %v1122_v46  ;;  %v7000_v27 = vrot.slane %v1301_v61, %v9896_v1  ;;  %v275_v15 = vmul.f32 %v9892_v25, %v9919_v44  ;;  %4850 = vmatmul.mubr.msk.f32.gmra.mrb[20].mxu1 %vm2018_vm0, %v6707_v55 }
 0x144   :  { %5001 = vmatprep.subr.bf16.mxu1 %v5000_v43  ;;  %v676_v35 = vadd.f32 %v548_v40, %v244_v39  ;;  %v692_v41 = vadd.f32 %v564_v62, %v260_v48  ;;  %v980_v37 = vmul.f32 %v6995_v12, %v9894_v34  ;;  %v996_v63 = vmul.f32 %v6995_v12, %v9918_v59  ;;  %v9920_v39 = vld [vmem:[#allocation50_spill] sm:$0xff]  ;;  %v9922_v40 = vld [vmem:[#allocation33_spill] sm:$0xff]  ;;  %v9923_v59 = vld [vmem:[#allocation100_spill] sm:$0xff] }
 0x145   :  { %v1714_v42 = vadd.f32 %v9915_v9, %v1538_v11  ;;  %v1730_v61 = vadd.f32 %v9916_v29, %v1554_v5  ;;  %v1412_v14 = vmul.f32 %v7000_v27, %v9902_v21  ;;  %v1428_v57 = vmul.f32 %v7000_v27, %v9903_v53  ;;  %2464 = vmatprep.mubr.f32.mxu1 %v9876_v0  ;;  %v9921_v43 = vld [vmem:[#allocation94_spill] sm:$0xff]  ;;  %v9924_v34 = vld [vmem:[#allocation124_spill] sm:$0xff] }
 0x146   :  { %v1108_v55 = vadd.f32 %v980_v37, %v676_v35  ;;  %v1124_v46 = vadd.f32 %v996_v63, %v692_v41  ;;  %v291_v48 = vmul.f32 %v9892_v25, %v9920_v39  ;;  %v579_v62 = vmul.f32 %v9922_v40, %v9921_v43  ;;  %4844 = vmatmul.mubr.msk.f32.gmra.mrb[24].mxu0 %vm2018_vm0, %v6764_v28  ;;  %v9925_v63 = vld [vmem:[#allocation57_spill] sm:$0xff] }
 0x147   :  { %v1842_v11 = vmax.f32 %v1714_v42, 0.0  ;;  %v1858_v5 = vmax.f32 %v1730_v61, 0.0  ;;  %v595_v21 = vmul.f32 %v9922_v40, %v9923_v59  ;;  %v1011_v53 = vmul.f32 %v9895_v10, %v9924_v34  ;;  %4851 = vmatmul.mubr.msk.f32.gmra.mrb[22].mxu1 %vm2018_vm0, %v6739_v52  ;;  %2363 = vmatprep.mubr.f32.mxu0 %v9876_v0 }
 0x148   :  { %v1540_v35 = vadd.f32 %v1412_v14, %v1108_v55  ;;  %v1556_v41 = vadd.f32 %v1428_v57, %v1124_v46  ;;  %v707_v37 = vadd.f32 %v579_v62, %v275_v15  ;;  %v1027_v47 = vmul.f32 %v9895_v10, %v9925_v63  ;;  %2470 = vmatprep.mubr.f32.mxu1 %v9876_v0 }
 0x149   :  { %v4986_v42 = vpack.c.bf16 %v1858_v5, %v1842_v11  ;;  %v723_v61 = vadd.f32 %v595_v21, %v291_v48  ;;  %v1443_v1 = vmul.f32 %v6857_v16, %v9926_v60  ;;  %v1459_v30 = vmul.f32 %v6857_v16, %v9927_v19 }
 0x14a   :  { %v1716_v52 = vadd.f32 %v9915_v9, %v1540_v35  ;;  %v1732_v14 = vadd.f32 %v9916_v29, %v1556_v41  ;;  %v1139_v15 = vadd.f32 %v1011_v53, %v707_v37  ;;  %v277_v57 = vmul.f32 %v6875_v36, %v9919_v44  ;;  %4845 = vmatmul.mubr.msk.f32.gmra.mrb[26].mxu0 %vm2018_vm0, %v6790_v24 }
 0x14b   :  { %4987 = vmatpush1.bf16.msra.mxu0 %v4986_v42  ;;  %v1155_v55 = vadd.f32 %v1027_v47, %v723_v61  ;;  %v293_v21 = vmul.f32 %v6875_v36, %v9920_v39  ;;  %v581_v46 = vmul.f32 %v6884_v18, %v9921_v43  ;;  %v597_v48 = vmul.f32 %v6884_v18, %v9923_v59 }
 0x14c   :  { %v1844_v62 = vmax.f32 %v1716_v52, 0.0  ;;  %v1860_v11 = vmax.f32 %v1732_v14, 0.0  ;;  %v1571_v5 = vadd.f32 %v1443_v1, %v1139_v15  ;;  %v1013_v53 = vmul.f32 %v6905_v2, %v9924_v34  ;;  %4852 = vmatmul.mubr.msk.f32.gmra.mrb[24].mxu1 %vm2018_vm0, %v6764_v28  ;;  %2369 = vmatprep.mubr.f32.mxu0 %v9876_v0 }
 0x14d   :  { %v1587_v47 = vadd.f32 %v1459_v30, %v1155_v55  ;;  %v709_v35 = vadd.f32 %v581_v46, %v277_v57  ;;  %v725_v41 = vadd.f32 %v597_v48, %v293_v21  ;;  %v1029_v37 = vmul.f32 %v6905_v2, %v9925_v63  ;;  %2476 = vmatprep.mubr.f32.mxu1 %v9876_v0 }
 0x14e   :  { %v5002_v42 = vpack.c.bf16 %v1860_v11, %v1844_v62  ;;  %v1747_v1 = vadd.f32 %v6481_v33, %v1571_v5  ;;  %v1445_v61 = vmul.f32 %v6921_v8, %v9926_v60  ;;  %v1461_v28 = vmul.f32 %v6921_v8, %v9927_v19  ;;  %4846 = vmatmul.mubr.msk.f32.gmra.mrb[28].mxu0 %vm2018_vm0, %v6817_v13 }
 0x14f   :  { %v1763_v30 = vadd.f32 %v9822_v22, %v1587_v47  ;;  %v1141_v52 = vadd.f32 %v1013_v53, %v709_v35  ;;  %v1157_v14 = vadd.f32 %v1029_v37, %v725_v41  ;;  %v274_v15 = vmul.f32 %v6924_v54, %v9919_v44  ;;  %2375 = vmatprep.mubr.f32.mxu0 %v9876_v0 }
 0x150   :  { %5003 = vmatpush1.bf16.msra.mxu1 %v5002_v42  ;;  %v1875_v57 = vmax.f32 %v1747_v1, 0.0  ;;  %v290_v55 = vmul.f32 %v6924_v54, %v9920_v39  ;;  %v578_v21 = vmul.f32 %v6942_v26, %v9921_v43  ;;  %v594_v46 = vmul.f32 %v6942_v26, %v9923_v59 }
 0x151   :  { %v1891_v48 = vmax.f32 %v1763_v30, 0.0  ;;  %v1573_v62 = vadd.f32 %v1445_v61, %v1141_v52  ;;  %v1589_v11 = vadd.f32 %v1461_v28, %v1157_v14  ;;  %v1010_v5 = vmul.f32 %v6945_v17, %v9924_v34  ;;  %4853 = vmatmul.mubr.msk.f32.gmra.mrb[26].mxu1 %vm2018_vm0, %v6790_v24 }
 0x152   :  { %v706_v53 = vadd.f32 %v578_v21, %v274_v15  ;;  %v722_v47 = vadd.f32 %v594_v46, %v290_v55  ;;  %v1026_v35 = vmul.f32 %v6945_v17, %v9925_v63  ;;  %v1442_v41 = vmul.f32 %v6948_v45, %v9926_v60  ;;  %2482 = vmatprep.mubr.f32.mxu1 %v9876_v0 }
 0x153   :  { %v4988_v37 = vpack.c.bf16 %v1891_v48, %v1875_v57  ;;  %v1749_v42 = vadd.f32 %v6481_v33, %v1573_v62  ;;  %v1765_v1 = vadd.f32 %v9822_v22, %v1589_v11  ;;  %v1458_v24 = vmul.f32 %v6948_v45, %v9927_v19  ;;  %4847 = vmatmul.mubr.msk.f32.gmra.mrb[30].mxu0 %vm2018_vm0, %v6842_v20 }
 0x154   :  { %v1138_v61 = vadd.f32 %v1010_v5, %v706_v53  ;;  %v1154_v28 = vadd.f32 %v1026_v35, %v722_v47  ;;  %v276_v30 = vmul.f32 %v6973_v31, %v9919_v44  ;;  %v292_v52 = vmul.f32 %v6973_v31, %v9920_v39  ;;  %2559 = vmatprep.mubr.f32.mxu0 %v9876_v0 }
 0x155   :  { %4989 = vmatprep.subr.bf16.mxu0 %v4988_v37  ;;  %v1877_v14 = vmax.f32 %v1749_v42, 0.0  ;;  %v1893_v15 = vmax.f32 %v1765_v1, 0.0  ;;  %v580_v57 = vmul.f32 %v6976_v32, %v9921_v43  ;;  %v596_v55 = vmul.f32 %v6976_v32, %v9923_v59  ;;  %4854 = vmatmul.mubr.msk.f32.gmra.mrb[28].mxu1 %vm2018_vm0, %v6817_v13 }
 0x156   :  { %v1570_v21 = vadd.f32 %v1442_v41, %v1138_v61  ;;  %v1586_v46 = vadd.f32 %v1458_v24, %v1154_v28  ;;  %v1012_v48 = vmul.f32 %v6995_v12, %v9924_v34  ;;  %v1028_v62 = vmul.f32 %v6995_v12, %v9925_v63  ;;  %2488 = vmatprep.mubr.f32.mxu1 %v9876_v0  ;;  %v9928_v61 = vld [vmem:[#allocation25_spill] sm:$0xff] }
 0x157   :  { %v5004_v11 = vpack.c.bf16 %v1893_v15, %v1877_v14  ;;  %v708_v5 = vadd.f32 %v580_v57, %v276_v30  ;;  %v724_v53 = vadd.f32 %v596_v55, %v292_v52  ;;  %v1444_v47 = vmul.f32 %v7000_v27, %v9926_v60  ;;  %v9929_v15 = vld [vmem:[#allocation74_spill] sm:$0xff] }
 0x158   :  { %v1746_v13 = vadd.f32 %v6481_v33, %v1570_v21  ;;  %v1762_v35 = vadd.f32 %v9822_v22, %v1586_v46  ;;  %v1460_v41 = vmul.f32 %v7000_v27, %v9927_v19  ;;  %v307_v37 = vmul.f32 %v9892_v25, %v9844_v51 }
 0x159   :  { %5005 = vmatprep.subr.bf16.mxu1 %v5004_v11  ;;  %v1140_v42 = vadd.f32 %v1012_v48, %v708_v5  ;;  %v1156_v1 = vadd.f32 %v1028_v62, %v724_v53  ;;  %v323_v24 = vmul.f32 %v9892_v25, %v9845_v49  ;;  %v611_v28 = vmul.f32 %v9922_v40, %v9928_v61  ;;  %v9930_v5 = vld [vmem:[#allocation105_spill] sm:$0xff] }
 0x15a   :  { %v1874_v30 = vmax.f32 %v1746_v13, 0.0  ;;  %v1890_v52 = vmax.f32 %v1762_v35, 0.0  ;;  %v627_v14 = vmul.f32 %v9922_v40, %v9855_v7  ;;  %v1043_v57 = vmul.f32 %v9895_v10, %v9929_v15  ;;  %4855 = vmatmul.mubr.msk.f32.gmra.mrb[30].mxu1 %vm2018_vm0, %v6842_v20 }
 0x15b   :  { %v1572_v55 = vadd.f32 %v1444_v47, %v1140_v42  ;;  %v1588_v21 = vadd.f32 %v1460_v41, %v1156_v1  ;;  %v739_v46 = vadd.f32 %v611_v28, %v307_v37  ;;  %v1059_v48 = vmul.f32 %v9895_v10, %v9863_v38  ;;  %2672 = vmatprep.mubr.f32.mxu1 %v9876_v0 }
 0x15c   :  { %v4990_v62 = vpack.c.bf16 %v1890_v52, %v1874_v30  ;;  %v755_v11 = vadd.f32 %v627_v14, %v323_v24  ;;  %v1475_v53 = vmul.f32 %v6857_v16, %v9930_v5  ;;  %v1491_v13 = vmul.f32 %v6857_v16, %v6450_v23 }
 0x15d   :  { %v1748_v35 = vadd.f32 %v6481_v33, %v1572_v55  ;;  %v1764_v20 = vadd.f32 %v9822_v22, %v1588_v21  ;;  %v1171_v47 = vadd.f32 %v1043_v57, %v739_v46  ;;  %v309_v41 = vmul.f32 %v6875_v36, %v9844_v51 }
 0x15e   :  { %4991 = vmatpush1.bf16.msra.mxu0 %v4990_v62  ;;  %v1187_v37 = vadd.f32 %v1059_v48, %v755_v11  ;;  %v325_v42 = vmul.f32 %v6875_v36, %v9845_v49  ;;  %v613_v1 = vmul.f32 %v6884_v18, %v9928_v61  ;;  %v629_v24 = vmul.f32 %v6884_v18, %v9855_v7 }
 0x15f   :  { %v1876_v28 = vmax.f32 %v1748_v35, 0.0  ;;  %v1892_v30 = vmax.f32 %v1764_v20, 0.0  ;;  %v1603_v52 = vadd.f32 %v1475_v53, %v1171_v47  ;;  %v1045_v14 = vmul.f32 %v6905_v2, %v9929_v15 }
 0x160   :  { %v1619_v57 = vadd.f32 %v1491_v13, %v1187_v37  ;;  %v741_v55 = vadd.f32 %v613_v1, %v309_v41  ;;  %v757_v21 = vadd.f32 %v629_v24, %v325_v42  ;;  %v1061_v46 = vmul.f32 %v6905_v2, %v9863_v38 }
 0x161   :  { %v5006_v48 = vpack.c.bf16 %v1892_v30, %v1876_v28  ;;  %v1779_v62 = vadd.f32 %v6587_v56, %v1603_v52  ;;  %v1477_v11 = vmul.f32 %v6921_v8, %v9930_v5  ;;  %v1493_v35 = vmul.f32 %v6921_v8, %v6450_v23 }
 0x162   :  { %v1795_v53 = vadd.f32 %v6476_v58, %v1619_v57  ;;  %v1173_v20 = vadd.f32 %v1045_v14, %v741_v55  ;;  %v1189_v47 = vadd.f32 %v1061_v46, %v757_v21  ;;  %v306_v13 = vmul.f32 %v6924_v54, %v9844_v51 }
 0x163   :  { %5007 = vmatpush1.bf16.msra.mxu1 %v5006_v48  ;;  %v1907_v41 = vmax.f32 %v1779_v62, 0.0  ;;  %v322_v37 = vmul.f32 %v6924_v54, %v9845_v49  ;;  %v610_v42 = vmul.f32 %v6942_v26, %v9928_v61  ;;  %v626_v1 = vmul.f32 %v6942_v26, %v9855_v7 }
 0x164   :  { %v1923_v24 = vmax.f32 %v1795_v53, 0.0  ;;  %v1605_v28 = vadd.f32 %v1477_v11, %v1173_v20  ;;  %v1621_v30 = vadd.f32 %v1493_v35, %v1189_v47  ;;  %v1042_v52 = vmul.f32 %v6945_v17, %v9929_v15 }
 0x165   :  { %v738_v14 = vadd.f32 %v610_v42, %v306_v13  ;;  %v754_v57 = vadd.f32 %v626_v1, %v322_v37  ;;  %v1058_v55 = vmul.f32 %v6945_v17, %v9863_v38  ;;  %v1474_v21 = vmul.f32 %v6948_v45, %v9930_v5 }
 0x166   :  { %v4992_v46 = vpack.c.bf16 %v1923_v24, %v1907_v41  ;;  %v1781_v48 = vadd.f32 %v6587_v56, %v1605_v28  ;;  %v1797_v62 = vadd.f32 %v6476_v58, %v1621_v30  ;;  %v1490_v11 = vmul.f32 %v6948_v45, %v6450_v23 }
 0x167   :  { %v1170_v35 = vadd.f32 %v1042_v52, %v738_v14  ;;  %v1186_v53 = vadd.f32 %v1058_v55, %v754_v57  ;;  %v308_v20 = vmul.f32 %v6973_v31, %v9844_v51  ;;  %v324_v47 = vmul.f32 %v6973_v31, %v9845_v49 }
 0x168   :  { %4993 = vmatprep.subr.bf16.mxu0 %v4992_v46  ;;  %v1909_v13 = vmax.f32 %v1781_v48, 0.0  ;;  %v1925_v37 = vmax.f32 %v1797_v62, 0.0  ;;  %v612_v41 = vmul.f32 %v6976_v32, %v9928_v61  ;;  %v628_v42 = vmul.f32 %v6976_v32, %v9855_v7  ;;  %v9937_v7 = vld [vmem:[#allocation84_spill] sm:$0xff] }
 0x169   :  { %v1602_v1 = vadd.f32 %v1474_v21, %v1170_v35  ;;  %v1618_v24 = vadd.f32 %v1490_v11, %v1186_v53  ;;  %v1044_v28 = vmul.f32 %v6995_v12, %v9929_v15  ;;  %v1060_v30 = vmul.f32 %v6995_v12, %v9863_v38  ;;  %v9931_v53 = vld [vmem:[#allocation52_spill] sm:$0xff] }
 0x16a   :  { %v5008_v52 = vpack.c.bf16 %v1925_v37, %v1909_v13  ;;  %v740_v14 = vadd.f32 %v612_v41, %v308_v20  ;;  %v756_v57 = vadd.f32 %v628_v42, %v324_v47  ;;  %v1476_v55 = vmul.f32 %v7000_v27, %v9930_v5  ;;  %v9932_v47 = vld [vmem:[#allocation10_spill] sm:$0xff]  ;;  %v9933_v42 = vld [vmem:[#allocation103_spill] sm:$0xff] }
 0x16b   :  { %v1778_v46 = vadd.f32 %v6587_v56, %v1602_v1  ;;  %v1794_v48 = vadd.f32 %v6476_v58, %v1618_v24  ;;  %v1492_v21 = vmul.f32 %v7000_v27, %v6450_v23  ;;  %v339_v62 = vmul.f32 %v9892_v25, %v9881_v3  ;;  %v9934_v24 = vld [vmem:[#allocation36_spill] sm:$0xff] }
 0x16c   :  { %5009 = vmatprep.subr.bf16.mxu1 %v5008_v52  ;;  %v1172_v11 = vadd.f32 %v1044_v28, %v740_v14  ;;  %v1188_v35 = vadd.f32 %v1060_v30, %v756_v57  ;;  %v355_v20 = vmul.f32 %v9892_v25, %v9931_v53  ;;  %v643_v13 = vmul.f32 %v9922_v40, %v9932_v47  ;;  %v9935_v52 = vld [vmem:[#allocation80_spill] sm:$0xff]  ;;  %v9936_v25 = vld [vmem:[#allocation118_spill] sm:$0xff] }
 0x16d   :  { %v1906_v37 = vmax.f32 %v1778_v46, 0.0  ;;  %v1922_v41 = vmax.f32 %v1794_v48, 0.0  ;;  %v659_v1 = vmul.f32 %v9922_v40, %v9933_v42  ;;  %v1075_v23 = vmul.f32 %v9895_v10, %v9934_v24 }
 0x16e   :  { %v1604_v5 = vadd.f32 %v1476_v55, %v1172_v11  ;;  %v1620_v38 = vadd.f32 %v1492_v21, %v1188_v35  ;;  %v771_v15 = vadd.f32 %v643_v13, %v339_v62  ;;  %v1091_v28 = vmul.f32 %v9895_v10, %v9935_v52 }
 0x16f   :  { %v4994_v30 = vpack.c.bf16 %v1922_v41, %v1906_v37  ;;  %v787_v14 = vadd.f32 %v659_v1, %v355_v20  ;;  %v1507_v57 = vmul.f32 %v6857_v16, %v9936_v25  ;;  %v1523_v46 = vmul.f32 %v6857_v16, %v9937_v7 }
 0x170   :  { %v1780_v48 = vadd.f32 %v6587_v56, %v1604_v5  ;;  %v1796_v40 = vadd.f32 %v6476_v58, %v1620_v38  ;;  %v1203_v61 = vadd.f32 %v1075_v23, %v771_v15  ;;  %v341_v55 = vmul.f32 %v6875_v36, %v9881_v3 }
 0x171   :  { %4995 = vmatpush1.bf16.msra.mxu0 %v4994_v30  ;;  %v1219_v21 = vadd.f32 %v1091_v28, %v787_v14  ;;  %v357_v10 = vmul.f32 %v6875_v36, %v9931_v53  ;;  %v645_v62 = vmul.f32 %v6884_v18, %v9932_v47  ;;  %v661_v11 = vmul.f32 %v6884_v18, %v9933_v42  ;;  %v9938_v36 = vld [vmem:[#allocation11_spill] sm:$0xff]  ;;  %v9939_v28 = vld [vmem:[#allocation37_spill] sm:$0xff] }
 0x172   :  { %v1908_v16 = vmax.f32 %v1780_v48, 0.0  ;;  %v1924_v35 = vmax.f32 %v1796_v40, 0.0  ;;  %v1635_v5 = vadd.f32 %v1507_v57, %v1203_v61  ;;  %v1077_v23 = vmul.f32 %v6905_v2, %v9934_v24 }
 0x173   :  { %v1651_v38 = vadd.f32 %v1523_v46, %v1219_v21  ;;  %v773_v15 = vadd.f32 %v645_v62, %v341_v55  ;;  %v789_v20 = vadd.f32 %v661_v11, %v357_v10  ;;  %v1093_v13 = vmul.f32 %v6905_v2, %v9935_v52 }
 0x174   :  { %v5010_v37 = vpack.c.bf16 %v1924_v35, %v1908_v16  ;;  %v1811_v41 = vadd.f32 %v9938_v36, %v1635_v5  ;;  %v1509_v1 = vmul.f32 %v6921_v8, %v9936_v25  ;;  %v1525_v18 = vmul.f32 %v6921_v8, %v9937_v7 }
 0x175   :  { %v1827_v61 = vadd.f32 %v9939_v28, %v1651_v38  ;;  %v1205_v30 = vadd.f32 %v1077_v23, %v773_v15  ;;  %v1221_v14 = vadd.f32 %v1093_v13, %v789_v20  ;;  %v338_v57 = vmul.f32 %v6924_v54, %v9881_v3 }
 0x176   :  { %5011 = vmatpush1.bf16.msra.mxu1 %v5010_v37  ;;  %v1939_v46 = vmax.f32 %v1811_v41, 0.0  ;;  %v354_v2 = vmul.f32 %v6924_v54, %v9931_v53  ;;  %v642_v48 = vmul.f32 %v6942_v26, %v9932_v47  ;;  %v658_v40 = vmul.f32 %v6942_v26, %v9933_v42 }
 0x177   :  { %v1955_v55 = vmax.f32 %v1827_v61, 0.0  ;;  %v1637_v8 = vadd.f32 %v1509_v1, %v1205_v30  ;;  %v1653_v21 = vadd.f32 %v1525_v18, %v1221_v14  ;;  %v1074_v10 = vmul.f32 %v6945_v17, %v9934_v24 }
 0x178   :  { %v770_v62 = vadd.f32 %v642_v48, %v338_v57  ;;  %v786_v11 = vadd.f32 %v658_v40, %v354_v2  ;;  %v1090_v16 = vmul.f32 %v6945_v17, %v9935_v52  ;;  %v1506_v54 = vmul.f32 %v6948_v45, %v9936_v25 }
 0x179   :  { %v4996_v35 = vpack.c.bf16 %v1955_v55, %v1939_v46  ;;  %v1813_v5 = vadd.f32 %v9938_v36, %v1637_v8  ;;  %v1829_v23 = vadd.f32 %v9939_v28, %v1653_v21  ;;  %v1522_v26 = vmul.f32 %v6948_v45, %v9937_v7  ;;  %v9940_v55 = vld [vmem:[#allocation5_spill] sm:$0xff] }
 0x17a   :  { %v1202_v38 = vadd.f32 %v1074_v10, %v770_v62  ;;  %v1218_v15 = vadd.f32 %v1090_v16, %v786_v11  ;;  %v340_v20 = vmul.f32 %v6973_v31, %v9881_v3  ;;  %v356_v13 = vmul.f32 %v6973_v31, %v9931_v53  ;;  %v7256_v31 = vld [vmem:[%s9418_s0 + $0x30] sm:$0xff]  ;;  %v9941_v10 = vld [vmem:[#allocation2_spill] sm:$0xff]  ;;  %v9942_v11 = vld [vmem:[#allocation3_spill] sm:$0xff] }
 0x17b   :  { %4997 = vmatprep.subr.bf16.mxu0 %v4996_v35  ;;  %v1941_v17 = vmax.f32 %v1813_v5, 0.0  ;;  %v1957_v37 = vmax.f32 %v1829_v23, 0.0  ;;  %v644_v41 = vmul.f32 %v6976_v32, %v9932_v47  ;;  %v660_v1 = vmul.f32 %v6976_v32, %v9933_v42  ;;  %v9943_v23 = vld [vmem:[#allocation8_spill] sm:$0xff] }
 0x17c   :  { %v1634_v18 = vadd.f32 %v1506_v54, %v1202_v38  ;;  %v1650_v61 = vadd.f32 %v1522_v26, %v1218_v15  ;;  %v1076_v45 = vmul.f32 %v6995_v12, %v9934_v24  ;;  %v1092_v30 = vmul.f32 %v6995_v12, %v9935_v52 }
 0x17d   :  { %v5012_v14 = vpack.c.bf16 %v1957_v37, %v1941_v17  ;;  %v772_v57 = vadd.f32 %v644_v41, %v340_v20  ;;  %v788_v46 = vadd.f32 %v660_v1, %v356_v13  ;;  %v1508_v2 = vmul.f32 %v7000_v27, %v9936_v25  ;;  %v9944_v17 = vld [vmem:[#allocation132_spill] sm:$0xff]  ;;  %v9945_v41 = vld [vmem:[#allocation138_spill] sm:$0xff] }
 0x17e   :  { %v1810_v32 = vadd.f32 %v9938_v36, %v1634_v18  ;;  %v1826_v48 = vadd.f32 %v9939_v28, %v1650_v61  ;;  %v1524_v40 = vmul.f32 %v7000_v27, %v9937_v7  ;;  %v145_v12 = vrot.slane %v7256_v31, %v9940_v55  ;;  %v9946_v18 = vld [vmem:[#allocation9_spill] sm:$0xff] }
 0x17f   :  { %5013 = vmatprep.subr.bf16.mxu1 %v5012_v14  ;;  %v1204_v8 = vadd.f32 %v1076_v45, %v772_v57  ;;  %v1220_v21 = vadd.f32 %v1092_v30, %v788_v46  ;;  %v449_v62 = vrot.slane %v7256_v31, %v9941_v10  ;;  %v881_v16 = vrot.slane %v7256_v31, %v9942_v11  ;;  %v9947_v14 = vld [vmem:[#allocation24_spill] sm:$0xff]  ;;  %v9948_v46 = vld [vmem:[#allocation38_spill] sm:$0xff] }
 0x180   :  { %v1938_v54 = vmax.f32 %v1810_v32, 0.0  ;;  %v1954_v35 = vmax.f32 %v1826_v48, 0.0  ;;  %v7271_v5 = vrot.slane %v145_v12, %v9905_v4  ;;  %v1313_v27 = vrot.slane %v7256_v31, %v9943_v23  ;;  %v7297_v32 = vld [vmem:[%s9418_s0 + $0x38] sm:$0xff]  ;;  %v9949_v48 = vld [vmem:[#allocation43_spill] sm:$0xff]  ;;  %v9950_v12 = vld [vmem:[#allocation56_spill] sm:$0xff] }
 0x181   :  { %v1636_v26 = vadd.f32 %v1508_v2, %v1204_v8  ;;  %v1652_v38 = vadd.f32 %v1524_v40, %v1220_v21  ;;  %v7276_v15 = vrot.slane %v449_v62, %v9909_v50  ;;  %v7279_v20 = vrot.slane %v881_v16, %v9917_v6  ;;  %v9951_v21 = vld [vmem:[#allocation89_spill] sm:$0xff]  ;;  %v9952_v16 = vld [vmem:[#allocation111_spill] sm:$0xff] }
 0x182   :  { %v4998_v13 = vpack.c.bf16 %v1954_v35, %v1938_v54  ;;  %v247_v37 = vmul.f32 %v7271_v5, %v9944_v17  ;;  %v263_v1 = vmul.f32 %v7271_v5, %v9945_v41  ;;  %v7286_v61 = vrot.slane %v1313_v27, %v9946_v18 }
 0x183   :  { %v1812_v45 = vadd.f32 %v9938_v36, %v1636_v26  ;;  %v1828_v30 = vadd.f32 %v9939_v28, %v1652_v38  ;;  %v551_v57 = vmul.f32 %v7276_v15, %v9947_v14  ;;  %v567_v2 = vmul.f32 %v7276_v15, %v9948_v46 }
 0x184   :  { %4999 = vmatpush1.bf16.msra.mxu0 %v4998_v13  ;;  %v983_v40 = vmul.f32 %v7279_v20, %v9949_v48  ;;  %v999_v8 = vmul.f32 %v7279_v20, %v9950_v12  ;;  %v1415_v62 = vmul.f32 %v7286_v61, %v9951_v21  ;;  %v1431_v54 = vmul.f32 %v7286_v61, %v9952_v16 }
 0x185   :  { %v1940_v35 = vmax.f32 %v1812_v45, 0.0  ;;  %v1956_v27 = vmax.f32 %v1828_v30, 0.0  ;;  %v679_v26 = vadd.f32 %v551_v57, %v247_v37  ;;  %v695_v38 = vadd.f32 %v567_v2, %v263_v1  ;;  %v7318_v37 = vld [vmem:[%s9419_s3] sm:$0xff] }
 0x186   :  { %v153_v28 = vrot.slane %v7297_v32, %v9940_v55  ;;  %v457_v13 = vrot.slane %v7297_v32, %v9941_v10  ;;  %v889_v36 = vrot.slane %v7297_v32, %v9942_v11  ;;  %v1321_v7 = vrot.slane %v7297_v32, %v9943_v23  ;;  %9953 = vst [vmem:[#allocation12_spill] sm:$0xff] %v7318_v37 }
 0x187   :  { %v5014_v25 = vpack.c.bf16 %v1956_v27, %v1940_v35  ;;  %v1111_v52 = vadd.f32 %v983_v40, %v679_v26  ;;  %v1127_v24 = vadd.f32 %v999_v8, %v695_v38  ;;  %4856 = vmatmul.mubr.msk.f32.vlgmr.msra.gmra.mrb[32].mxu0 %vm2018_vm0, %v7318_v37  ;;  %v141_v55 = vrot.slane %v7256_v31, %v9905_v4 }
 0x188   :  { %v7325_v10 = vrot.slane %v153_v28, %v9905_v4  ;;  %v7328_v11 = vrot.slane %v457_v13, %v9909_v50  ;;  %v7331_v23 = vrot.slane %v889_v36, %v9917_v6  ;;  %v7334_v1 = vrot.slane %v1321_v7, %v9946_v18  ;;  %2565 = vmatprep.mubr.f32.mxu0 %v9876_v0 }
 0x189   :  { %5015 = vmatpush1.bf16.msra.mxu1 %v5014_v25  ;;  %v1543_v45 = vadd.f32 %v1415_v62, %v1111_v52  ;;  %v1559_v30 = vadd.f32 %v1431_v54, %v1127_v24  ;;  %v7338_v57 = vrot.slane %v141_v55, %v9905_v4  ;;  %v445_v28 = vrot.slane %v7256_v31, %v9909_v50  ;;  %v7359_v62 = vld [vmem:[%s9419_s3 + $0x8] sm:$0xff] }
 0x18a   :  { %v249_v2 = vmul.f32 %v7325_v10, %v9944_v17  ;;  %v265_v36 = vmul.f32 %v7325_v10, %v9945_v41  ;;  %v553_v7 = vmul.f32 %v7328_v11, %v9947_v14  ;;  %v569_v25 = vmul.f32 %v7328_v11, %v9948_v46 }
 0x18b   :  { %v1719_v24 = vadd.f32 %v9915_v9, %v1543_v45  ;;  %v1735_v52 = vadd.f32 %v9916_v29, %v1559_v30  ;;  %v985_v40 = vmul.f32 %v7331_v23, %v9949_v48  ;;  %v1001_v8 = vmul.f32 %v7331_v23, %v9950_v12  ;;  %4857 = vmatmul.mubr.msk.f32.gmra.mrb[34].mxu0 %vm2018_vm0, %v7359_v62 }
 0x18c   :  { %v681_v54 = vadd.f32 %v553_v7, %v249_v2  ;;  %v697_v35 = vadd.f32 %v569_v25, %v265_v36  ;;  %v1417_v27 = vmul.f32 %v7334_v1, %v9951_v21  ;;  %v1433_v26 = vmul.f32 %v7334_v1, %v9952_v16  ;;  %4864 = vmatmul.mubr.msk.f32.vlgmr.msra.gmra.mrb[32].mxu1 %vm2018_vm0, %v7318_v37 }
 0x18d   :  { %v1847_v38 = vmax.f32 %v1719_v24, 0.0  ;;  %v1863_v13 = vmax.f32 %v1735_v52, 0.0  ;;  %v246_v55 = vmul.f32 %v7338_v57, %v9944_v17  ;;  %v262_v45 = vmul.f32 %v7338_v57, %v9945_v41  ;;  %2678 = vmatprep.mubr.f32.mxu1 %v9876_v0  ;;  %2571 = vmatprep.mubr.f32.mxu0 %v9876_v0 }
 0x18e   :  { %v1113_v30 = vadd.f32 %v985_v40, %v681_v54  ;;  %v1129_v2 = vadd.f32 %v1001_v8, %v697_v35  ;;  %v7376_v36 = vrot.slane %v445_v28, %v9909_v50  ;;  %v877_v7 = vrot.slane %v7256_v31, %v9917_v6  ;;  %v7389_v40 = vld [vmem:[%s9419_s3 + $0x10] sm:$0xff] }
 0x18f   :  { %v5016_v25 = vpack.c.bf16 %v1863_v13, %v1847_v38  ;;  %v1309_v24 = vrot.slane %v7256_v31, %v9946_v18  ;;  %v149_v52 = vrot.slane %v7297_v32, %v9905_v4  ;;  %v453_v37 = vrot.slane %v7297_v32, %v9909_v50  ;;  %4858 = vmatmul.mubr.msk.f32.gmra.mrb[36].mxu0 %vm2018_vm0, %v7389_v40 }
 0x190   :  { %v1545_v28 = vadd.f32 %v1417_v27, %v1113_v30  ;;  %v1561_v8 = vadd.f32 %v1433_v26, %v1129_v2  ;;  %v550_v54 = vmul.f32 %v7376_v36, %v9947_v14  ;;  %v566_v31 = vmul.f32 %v7376_v36, %v9948_v46  ;;  %4865 = vmatmul.mubr.msk.f32.gmra.mrb[34].mxu1 %vm2018_vm0, %v7359_v62 }
 0x191   :  { %5017 = vmatprep.subr.bf16.mxu0 %v5016_v25  ;;  %v7400_v35 = vrot.slane %v877_v7, %v9917_v6  ;;  %v7403_v38 = vrot.slane %v1309_v24, %v9946_v18  ;;  %v7406_v13 = vrot.slane %v149_v52, %v9905_v4  ;;  %v7409_v27 = vrot.slane %v453_v37, %v9909_v50  ;;  %v7432_v52 = vld [vmem:[%s9419_s3 + $0x18] sm:$0xff] }
 0x192   :  { %v1721_v26 = vadd.f32 %v9915_v9, %v1545_v28  ;;  %v1737_v30 = vadd.f32 %v9916_v29, %v1561_v8  ;;  %v678_v2 = vadd.f32 %v550_v54, %v246_v55  ;;  %v694_v42 = vadd.f32 %v566_v31, %v262_v45  ;;  %2684 = vmatprep.mubr.f32.mxu1 %v9876_v0 }
 0x193   :  { %v982_v7 = vmul.f32 %v7400_v35, %v9949_v48  ;;  %v998_v25 = vmul.f32 %v7400_v35, %v9950_v12  ;;  %v1414_v4 = vmul.f32 %v7403_v38, %v9951_v21  ;;  %v1430_v50 = vmul.f32 %v7403_v38, %v9952_v16  ;;  %2577 = vmatprep.mubr.f32.mxu0 %v9876_v0 }
 0x194   :  { %v1849_v37 = vmax.f32 %v1721_v26, 0.0  ;;  %v1865_v24 = vmax.f32 %v1737_v30, 0.0  ;;  %v248_v55 = vmul.f32 %v7406_v13, %v9944_v17  ;;  %v264_v45 = vmul.f32 %v7406_v13, %v9945_v41  ;;  %4866 = vmatmul.mubr.msk.f32.gmra.mrb[36].mxu1 %vm2018_vm0, %v7389_v40  ;;  %4859 = vmatmul.mubr.msk.f32.gmra.mrb[38].mxu0 %vm2018_vm0, %v7432_v52 }
 0x195   :  { %v1110_v28 = vadd.f32 %v982_v7, %v678_v2  ;;  %v1126_v8 = vadd.f32 %v998_v25, %v694_v42  ;;  %v552_v54 = vmul.f32 %v7409_v27, %v9947_v14  ;;  %v568_v17 = vmul.f32 %v7409_v27, %v9948_v46  ;;  %2690 = vmatprep.mubr.f32.mxu1 %v9876_v0 }
 0x196   :  { %v5032_v41 = vpack.c.bf16 %v1865_v24, %v1849_v37  ;;  %v885_v31 = vrot.slane %v7297_v32, %v9917_v6  ;;  %v1317_v26 = vrot.slane %v7297_v32, %v9946_v18  ;;  %v279_v30 = vmul.f32 %v7271_v5, %v9919_v44  ;;  %2583 = vmatprep.mubr.f32.mxu0 %v9876_v0 }
 0x197   :  { %v1542_v42 = vadd.f32 %v1414_v4, %v1110_v28  ;;  %v1558_v2 = vadd.f32 %v1430_v50, %v1126_v8  ;;  %v680_v14 = vadd.f32 %v552_v54, %v248_v55  ;;  %v696_v7 = vadd.f32 %v568_v17, %v264_v45 }
 0x198   :  { %5033 = vmatprep.subr.bf16.mxu1 %v5032_v41  ;;  %v7449_v46 = vrot.slane %v885_v31, %v9917_v6  ;;  %v7452_v25 = vrot.slane %v1317_v26, %v9946_v18  ;;  %v295_v37 = vmul.f32 %v7271_v5, %v9920_v39  ;;  %v583_v32 = vmul.f32 %v7276_v15, %v9921_v43  ;;  %v7478_v31 = vld [vmem:[%s9419_s3 + $0x20] sm:$0xff] }
 0x199   :  { %v1718_v24 = vadd.f32 %v9915_v9, %v1542_v42  ;;  %v1734_v4 = vadd.f32 %v9916_v29, %v1558_v2  ;;  %v599_v50 = vmul.f32 %v7276_v15, %v9923_v59  ;;  %v1015_v6 = vmul.f32 %v7279_v20, %v9924_v34  ;;  %4867 = vmatmul.mubr.msk.f32.gmra.mrb[38].mxu1 %vm2018_vm0, %v7432_v52 }
 0x19a   :  { %v984_v18 = vmul.f32 %v7449_v46, %v9949_v48  ;;  %v1000_v55 = vmul.f32 %v7449_v46, %v9950_v12  ;;  %v1416_v45 = vmul.f32 %v7452_v25, %v9951_v21  ;;  %v1432_v28 = vmul.f32 %v7452_v25, %v9952_v16  ;;  %2696 = vmatprep.mubr.f32.mxu1 %v9876_v0 }
 0x19b   :  { %v1846_v8 = vmax.f32 %v1718_v24, 0.0  ;;  %v1862_v54 = vmax.f32 %v1734_v4, 0.0  ;;  %v711_v17 = vadd.f32 %v583_v32, %v279_v30  ;;  %v727_v41 = vadd.f32 %v599_v50, %v295_v37  ;;  %4860 = vmatmul.mubr.msk.f32.gmra.mrb[40].mxu0 %vm2018_vm0, %v7478_v31 }
 0x19c   :  { %v1112_v48 = vadd.f32 %v984_v18, %v680_v14  ;;  %v1128_v12 = vadd.f32 %v1000_v55, %v696_v7  ;;  %v1031_v21 = vmul.f32 %v7279_v20, %v9925_v63  ;;  %v1447_v16 = vmul.f32 %v7286_v61, %v9926_v60  ;;  %2589 = vmatprep.mubr.f32.mxu0 %v9876_v0 }
 0x19d   :  { %v5018_v26 = vpack.c.bf16 %v1862_v54, %v1846_v8  ;;  %v1143_v30 = vadd.f32 %v1015_v6, %v711_v17  ;;  %v1463_v42 = vmul.f32 %v7286_v61, %v9927_v19  ;;  %v281_v2 = vmul.f32 %v7325_v10, %v9919_v44  ;;  %4868 = vmatmul.mubr.msk.f32.gmra.mrb[40].mxu1 %vm2018_vm0, %v7478_v31  ;;  %v7509_v8 = vld [vmem:[%s9419_s3 + $0x28] sm:$0xff] }
 0x19e   :  { %v1544_v14 = vadd.f32 %v1416_v45, %v1112_v48  ;;  %v1560_v7 = vadd.f32 %v1432_v28, %v1128_v12  ;;  %v1159_v37 = vadd.f32 %v1031_v21, %v727_v41  ;;  %v297_v32 = vmul.f32 %v7325_v10, %v9920_v39  ;;  %2702 = vmatprep.mubr.f32.mxu1 %v9876_v0 }
 0x19f   :  { %5019 = vmatpush1.bf16.msra.mxu0 %v5018_v26  ;;  %v1575_v24 = vadd.f32 %v1447_v16, %v1143_v30  ;;  %v585_v4 = vmul.f32 %v7328_v11, %v9921_v43  ;;  %v601_v50 = vmul.f32 %v7328_v11, %v9923_v59  ;;  %v1017_v6 = vmul.f32 %v7331_v23, %v9924_v34 }
 0x1a0   :  { %v1720_v18 = vadd.f32 %v9915_v9, %v1544_v14  ;;  %v1736_v55 = vadd.f32 %v9916_v29, %v1560_v7  ;;  %v1591_v45 = vadd.f32 %v1463_v42, %v1159_v37  ;;  %v1033_v28 = vmul.f32 %v7331_v23, %v9925_v63  ;;  %4861 = vmatmul.mubr.msk.f32.gmra.mrb[42].mxu0 %vm2018_vm0, %v7509_v8 }
 0x1a1   :  { %v1751_v54 = vadd.f32 %v6481_v33, %v1575_v24  ;;  %v713_v17 = vadd.f32 %v585_v4, %v281_v2  ;;  %v729_v41 = vadd.f32 %v601_v50, %v297_v32  ;;  %v1449_v9 = vmul.f32 %v7334_v1, %v9926_v60  ;;  %4869 = vmatmul.mubr.msk.f32.gmra.mrb[42].mxu1 %vm2018_vm0, %v7509_v8  ;;  %v7532_v32 = vld [vmem:[%s9419_s3 + $0x30] sm:$0xff] }
 0x1a2   :  { %v1848_v29 = vmax.f32 %v1720_v18, 0.0  ;;  %v1864_v48 = vmax.f32 %v1736_v55, 0.0  ;;  %v1767_v12 = vadd.f32 %v9822_v22, %v1591_v45  ;;  %v1465_v21 = vmul.f32 %v7334_v1, %v9927_v19  ;;  %2595 = vmatprep.mubr.f32.mxu0 %v9876_v0  ;;  %2708 = vmatprep.mubr.f32.mxu1 %v9876_v0 }
 0x1a3   :  { %v1879_v16 = vmax.f32 %v1751_v54, 0.0  ;;  %v1145_v26 = vadd.f32 %v1017_v6, %v713_v17  ;;  %v1161_v30 = vadd.f32 %v1033_v28, %v729_v41  ;;  %v278_v42 = vmul.f32 %v7338_v57, %v9919_v44 }
 0x1a4   :  { %v5034_v2 = vpack.c.bf16 %v1864_v48, %v1848_v29  ;;  %v1895_v14 = vmax.f32 %v1767_v12, 0.0  ;;  %v294_v7 = vmul.f32 %v7338_v57, %v9920_v39  ;;  %v582_v37 = vmul.f32 %v7376_v36, %v9921_v43  ;;  %4862 = vmatmul.mubr.msk.f32.gmra.mrb[44].mxu0 %vm2018_vm0, %v7532_v32 }
 0x1a5   :  { %v1577_v24 = vadd.f32 %v1449_v9, %v1145_v26  ;;  %v1593_v4 = vadd.f32 %v1465_v21, %v1161_v30  ;;  %v598_v50 = vmul.f32 %v7376_v36, %v9923_v59  ;;  %v1014_v6 = vmul.f32 %v7400_v35, %v9924_v34  ;;  %4870 = vmatmul.mubr.msk.f32.gmra.mrb[44].mxu1 %vm2018_vm0, %v7532_v32 }
 0x1a6   :  { %5035 = vmatpush1.bf16.msra.mxu1 %v5034_v2  ;;  %v5020_v18 = vpack.c.bf16 %v1895_v14, %v1879_v16  ;;  %v710_v55 = vadd.f32 %v582_v37, %v278_v42  ;;  %v1030_v45 = vmul.f32 %v7400_v35, %v9925_v63  ;;  %v1446_v28 = vmul.f32 %v7403_v38, %v9926_v60  ;;  %v7563_v2 = vld [vmem:[%s9419_s3 + $0x38] sm:$0xff] }
 0x1a7   :  { %v1753_v54 = vadd.f32 %v6481_v33, %v1577_v24  ;;  %v1769_v17 = vadd.f32 %v9822_v22, %v1593_v4  ;;  %v726_v41 = vadd.f32 %v598_v50, %v294_v7  ;;  %v1462_v9 = vmul.f32 %v7403_v38, %v9927_v19  ;;  %2601 = vmatprep.mubr.f32.mxu0 %v9876_v0 }
 0x1a8   :  { %5021 = vmatprep.subr.bf16.mxu0 %v5020_v18  ;;  %v1142_v29 = vadd.f32 %v1014_v6, %v710_v55  ;;  %v280_v48 = vmul.f32 %v7406_v13, %v9919_v44  ;;  %v296_v12 = vmul.f32 %v7406_v13, %v9920_v39  ;;  %v584_v21 = vmul.f32 %v7409_v27, %v9921_v43  ;;  %v9954_v55 = vld [vmem:[#allocation25_spill] sm:$0xff] }
 0x1a9   :  { %v1881_v16 = vmax.f32 %v1753_v54, 0.0  ;;  %v1897_v26 = vmax.f32 %v1769_v17, 0.0  ;;  %v1158_v30 = vadd.f32 %v1030_v45, %v726_v41  ;;  %v600_v42 = vmul.f32 %v7409_v27, %v9923_v59  ;;  %2714 = vmatprep.mubr.f32.mxu1 %v9876_v0  ;;  %4863 = vmatmul.mubr.msk.f32.gmra.mrb[46].mxu0 %vm2018_vm0, %v7563_v2  ;;  %v9955_v17 = vld [vmem:[#allocation48_spill] sm:$0xff]  ;;  %v9956_v41 = vld [vmem:[#allocation74_spill] sm:$0xff] }
 0x1aa   :  { %v1574_v44 = vadd.f32 %v1446_v28, %v1142_v29  ;;  %v712_v39 = vadd.f32 %v584_v21, %v280_v48  ;;  %v1016_v43 = vmul.f32 %v7449_v46, %v9924_v34  ;;  %v1032_v14 = vmul.f32 %v7449_v46, %v9925_v63  ;;  %4871 = vmatmul.mubr.msk.f32.gmra.mrb[46].mxu1 %vm2018_vm0, %v7563_v2  ;;  %v9957_v21 = vld [vmem:[#allocation101_spill] sm:$0xff] }
 0x1ab   :  { %v5036_v59 = vpack.c.bf16 %v1897_v26, %v1881_v16  ;;  %v1590_v7 = vadd.f32 %v1462_v9, %v1158_v30  ;;  %v728_v37 = vadd.f32 %v600_v42, %v296_v12  ;;  %v1448_v24 = vmul.f32 %v7452_v25, %v9926_v60  ;;  %2785 = vmatprep.mubr.f32.mxu0 %v9876_v0  ;;  %v9958_v42 = vld [vmem:[#allocation105_spill] sm:$0xff] }
 0x1ac   :  { %v1750_v4 = vadd.f32 %v6481_v33, %v1574_v44  ;;  %v1144_v50 = vadd.f32 %v1016_v43, %v712_v39  ;;  %v1464_v34 = vmul.f32 %v7452_v25, %v9927_v19  ;;  %v311_v63 = vmul.f32 %v7271_v5, %v9844_v51  ;;  %2898 = vmatprep.mubr.f32.mxu1 %v9876_v0  ;;  %v9959_v39 = vld [vmem:[#allocation104_spill] sm:$0xff] }
 0x1ad   :  { %5037 = vmatprep.subr.bf16.mxu1 %v5036_v59  ;;  %v1766_v6 = vadd.f32 %v9822_v22, %v1590_v7  ;;  %v1160_v18 = vadd.f32 %v1032_v14, %v728_v37  ;;  %v327_v60 = vmul.f32 %v7271_v5, %v9845_v49  ;;  %v615_v45 = vmul.f32 %v7276_v15, %v9954_v55 }
 0x1ae   :  { %v1878_v28 = vmax.f32 %v1750_v4, 0.0  ;;  %v1576_v54 = vadd.f32 %v1448_v24, %v1144_v50  ;;  %v631_v19 = vmul.f32 %v7276_v15, %v9955_v17  ;;  %v1047_v9 = vmul.f32 %v7279_v20, %v9956_v41 }
 0x1af   :  { %v1894_v29 = vmax.f32 %v1766_v6, 0.0  ;;  %v1592_v48 = vadd.f32 %v1464_v34, %v1160_v18  ;;  %v743_v12 = vadd.f32 %v615_v45, %v311_v63  ;;  %v1063_v16 = vmul.f32 %v7279_v20, %v9957_v21 }
 0x1b0   :  { %v1752_v26 = vadd.f32 %v6481_v33, %v1576_v54  ;;  %v759_v30 = vadd.f32 %v631_v19, %v327_v60  ;;  %v1479_v44 = vmul.f32 %v7286_v61, %v9958_v42  ;;  %v1495_v43 = vmul.f32 %v7286_v61, %v9959_v39 }
 0x1b1   :  { %v5022_v14 = vpack.c.bf16 %v1894_v29, %v1878_v28  ;;  %v1768_v59 = vadd.f32 %v9822_v22, %v1592_v48  ;;  %v1175_v7 = vadd.f32 %v1047_v9, %v743_v12  ;;  %v313_v37 = vmul.f32 %v7325_v10, %v9844_v51 }
 0x1b2   :  { %v1880_v24 = vmax.f32 %v1752_v26, 0.0  ;;  %v1191_v4 = vadd.f32 %v1063_v16, %v759_v30  ;;  %v329_v50 = vmul.f32 %v7325_v10, %v9845_v49  ;;  %v617_v33 = vmul.f32 %v7328_v11, %v9954_v55 }
 0x1b3   :  { %5023 = vmatpush1.bf16.msra.mxu0 %v5022_v14  ;;  %v1896_v34 = vmax.f32 %v1768_v59, 0.0  ;;  %v1607_v63 = vadd.f32 %v1479_v44, %v1175_v7  ;;  %v633_v6 = vmul.f32 %v7328_v11, %v9955_v17  ;;  %v1049_v22 = vmul.f32 %v7331_v23, %v9956_v41 }
 0x1b4   :  { %v1623_v18 = vadd.f32 %v1495_v43, %v1191_v4  ;;  %v745_v60 = vadd.f32 %v617_v33, %v313_v37  ;;  %v1065_v45 = vmul.f32 %v7331_v23, %v9957_v21  ;;  %v1481_v28 = vmul.f32 %v7334_v1, %v9958_v42 }
 0x1b5   :  { %v5038_v54 = vpack.c.bf16 %v1896_v34, %v1880_v24  ;;  %v1783_v19 = vadd.f32 %v6587_v56, %v1607_v63  ;;  %v761_v9 = vadd.f32 %v633_v6, %v329_v50  ;;  %v1497_v29 = vmul.f32 %v7334_v1, %v9959_v39 }
 0x1b6   :  { %v1799_v48 = vadd.f32 %v6476_v58, %v1623_v18  ;;  %v1177_v12 = vadd.f32 %v1049_v22, %v745_v60  ;;  %v310_v16 = vmul.f32 %v7338_v57, %v9844_v51  ;;  %v326_v26 = vmul.f32 %v7338_v57, %v9845_v49 }
 0x1b7   :  { %5039 = vmatpush1.bf16.msra.mxu1 %v5038_v54  ;;  %v1911_v30 = vmax.f32 %v1783_v19, 0.0  ;;  %v1193_v44 = vadd.f32 %v1065_v45, %v761_v9  ;;  %v614_v43 = vmul.f32 %v7376_v36, %v9954_v55  ;;  %v630_v14 = vmul.f32 %v7376_v36, %v9955_v17 }
 0x1b8   :  { %v1927_v59 = vmax.f32 %v1799_v48, 0.0  ;;  %v1609_v7 = vadd.f32 %v1481_v28, %v1177_v12  ;;  %v1046_v37 = vmul.f32 %v7400_v35, %v9956_v41  ;;  %v1062_v24 = vmul.f32 %v7400_v35, %v9957_v21 }
 0x1b9   :  { %v1625_v4 = vadd.f32 %v1497_v29, %v1193_v44  ;;  %v742_v50 = vadd.f32 %v614_v43, %v310_v16  ;;  %v758_v33 = vadd.f32 %v630_v14, %v326_v26  ;;  %v1478_v34 = vmul.f32 %v7403_v38, %v9958_v42 }
 0x1ba   :  { %v5024_v63 = vpack.c.bf16 %v1927_v59, %v1911_v30  ;;  %v1785_v6 = vadd.f32 %v6587_v56, %v1609_v7  ;;  %v1494_v22 = vmul.f32 %v7403_v38, %v9959_v39  ;;  %v312_v18 = vmul.f32 %v7406_v13, %v9844_v51 }
 0x1bb   :  { %v1801_v60 = vadd.f32 %v6476_v58, %v1625_v4  ;;  %v1174_v45 = vadd.f32 %v1046_v37, %v742_v50  ;;  %v1190_v28 = vadd.f32 %v1062_v24, %v758_v33  ;;  %v328_v54 = vmul.f32 %v7406_v13, %v9845_v49  ;;  %v9961_v50 = vld [vmem:[#allocation36_spill] sm:$0xff] }
 0x1bc   :  { %5025 = vmatprep.subr.bf16.mxu0 %v5024_v63  ;;  %v1913_v19 = vmax.f32 %v1785_v6, 0.0  ;;  %v616_v9 = vmul.f32 %v7409_v27, %v9954_v55  ;;  %v632_v29 = vmul.f32 %v7409_v27, %v9955_v17  ;;  %v1048_v48 = vmul.f32 %v7449_v46, %v9956_v41 }
 0x1bd   :  { %v1929_v12 = vmax.f32 %v1801_v60, 0.0  ;;  %v1606_v51 = vadd.f32 %v1478_v34, %v1174_v45  ;;  %v1622_v16 = vadd.f32 %v1494_v22, %v1190_v28  ;;  %v1064_v26 = vmul.f32 %v7449_v46, %v9957_v21  ;;  %v9962_v22 = vld [vmem:[#allocation80_spill] sm:$0xff]  ;;  %v9963_v45 = vld [vmem:[#allocation118_spill] sm:$0xff] }
 0x1be   :  { %v744_v30 = vadd.f32 %v616_v9, %v312_v18  ;;  %v760_v44 = vadd.f32 %v632_v29, %v328_v54  ;;  %v1480_v49 = vmul.f32 %v7452_v25, %v9958_v42  ;;  %v1496_v55 = vmul.f32 %v7452_v25, %v9959_v39  ;;  %v9960_v39 = vld [vmem:[#allocation103_spill] sm:$0xff]  ;;  %v9964_v54 = vld [vmem:[#allocation84_spill] sm:$0xff] }
 0x1bf   :  { %v5040_v43 = vpack.c.bf16 %v1929_v12, %v1913_v19  ;;  %v1782_v17 = vadd.f32 %v6587_v56, %v1606_v51  ;;  %v1798_v14 = vadd.f32 %v6476_v58, %v1622_v16  ;;  %v343_v41 = vmul.f32 %v7271_v5, %v9881_v3 }
 0x1c0   :  { %v1176_v59 = vadd.f32 %v1048_v48, %v744_v30  ;;  %v1192_v7 = vadd.f32 %v1064_v26, %v760_v44  ;;  %v359_v21 = vmul.f32 %v7271_v5, %v9931_v53  ;;  %v647_v37 = vmul.f32 %v7276_v15, %v9932_v47 }
 0x1c1   :  { %5041 = vmatprep.subr.bf16.mxu1 %v5040_v43  ;;  %v1910_v42 = vmax.f32 %v1782_v17, 0.0  ;;  %v1926_v24 = vmax.f32 %v1798_v14, 0.0  ;;  %v663_v4 = vmul.f32 %v7276_v15, %v9960_v39  ;;  %v1079_v33 = vmul.f32 %v7279_v20, %v9961_v50 }
 0x1c2   :  { %v1608_v34 = vadd.f32 %v1480_v49, %v1176_v59  ;;  %v1624_v63 = vadd.f32 %v1496_v55, %v1192_v7  ;;  %v775_v6 = vadd.f32 %v647_v37, %v343_v41  ;;  %v1095_v18 = vmul.f32 %v7279_v20, %v9962_v22  ;;  %v9966_v41 = vld [vmem:[#allocation37_spill] sm:$0xff] }
 0x1c3   :  { %v5026_v60 = vpack.c.bf16 %v1926_v24, %v1910_v42  ;;  %v791_v5 = vadd.f32 %v663_v4, %v359_v21  ;;  %v1511_v28 = vmul.f32 %v7286_v61, %v9963_v45  ;;  %v1527_v19 = vmul.f32 %v7286_v61, %v9964_v54 }
 0x1c4   :  { %v1784_v9 = vadd.f32 %v6587_v56, %v1608_v34  ;;  %v1800_v15 = vadd.f32 %v6476_v58, %v1624_v63  ;;  %v1207_v29 = vadd.f32 %v1079_v33, %v775_v6  ;;  %v345_v48 = vmul.f32 %v7325_v10, %v9881_v3 }
 0x1c5   :  { %5027 = vmatpush1.bf16.msra.mxu0 %v5026_v60  ;;  %v1223_v12 = vadd.f32 %v1095_v18, %v791_v5  ;;  %v361_v20 = vmul.f32 %v7325_v10, %v9931_v53  ;;  %v649_v51 = vmul.f32 %v7328_v11, %v9932_v47  ;;  %v665_v16 = vmul.f32 %v7328_v11, %v9960_v39  ;;  %v9965_v10 = vld [vmem:[#allocation11_spill] sm:$0xff] }
 0x1c6   :  { %v1912_v61 = vmax.f32 %v1784_v9, 0.0  ;;  %v1928_v26 = vmax.f32 %v1800_v15, 0.0  ;;  %v1639_v56 = vadd.f32 %v1511_v28, %v1207_v29  ;;  %v1081_v58 = vmul.f32 %v7331_v23, %v9961_v50 }
 0x1c7   :  { %v1655_v30 = vadd.f32 %v1527_v19, %v1223_v12  ;;  %v777_v44 = vadd.f32 %v649_v51, %v345_v48  ;;  %v793_v49 = vadd.f32 %v665_v16, %v361_v20  ;;  %v1097_v55 = vmul.f32 %v7331_v23, %v9962_v22 }
 0x1c8   :  { %v5042_v43 = vpack.c.bf16 %v1928_v26, %v1912_v61  ;;  %v1815_v17 = vadd.f32 %v9965_v10, %v1639_v56  ;;  %v1513_v14 = vmul.f32 %v7334_v1, %v9963_v45  ;;  %v1529_v11 = vmul.f32 %v7334_v1, %v9964_v54 }
 0x1c9   :  { %v1831_v59 = vadd.f32 %v9966_v41, %v1655_v30  ;;  %v1209_v7 = vadd.f32 %v1081_v58, %v777_v44  ;;  %v1225_v21 = vadd.f32 %v1097_v55, %v793_v49  ;;  %v342_v37 = vmul.f32 %v7338_v57, %v9881_v3 }
 0x1ca   :  { %5043 = vmatpush1.bf16.msra.mxu1 %v5042_v43  ;;  %v1943_v42 = vmax.f32 %v1815_v17, 0.0  ;;  %v358_v23 = vmul.f32 %v7338_v57, %v9931_v53  ;;  %v646_v24 = vmul.f32 %v7376_v36, %v9932_v47  ;;  %v662_v4 = vmul.f32 %v7376_v36, %v9960_v39 }
 0x1cb   :  { %v1959_v33 = vmax.f32 %v1831_v59, 0.0  ;;  %v1641_v1 = vadd.f32 %v1513_v14, %v1209_v7  ;;  %v1657_v34 = vadd.f32 %v1529_v11, %v1225_v21  ;;  %v1078_v63 = vmul.f32 %v7400_v35, %v9961_v50  ;;  %v7744_v59 = vpop.permute.xlu0 %1980  ;;  %v7749_v7 = vpop.permute.xlu1 %1985 }
 0x1cc   :  { %v774_v6 = vadd.f32 %v646_v24, %v342_v37  ;;  %v790_v18 = vadd.f32 %v662_v4, %v358_v23  ;;  %v1094_v60 = vmul.f32 %v7400_v35, %v9962_v22  ;;  %v1510_v57 = vmul.f32 %v7403_v38, %v9963_v45 }
 0x1cd   :  { %v5028_v5 = vpack.c.bf16 %v1959_v33, %v1943_v42  ;;  %v1817_v28 = vadd.f32 %v9965_v10, %v1641_v1  ;;  %v1833_v19 = vadd.f32 %v9966_v41, %v1657_v34  ;;  %v1526_v36 = vmul.f32 %v7403_v38, %v9964_v54 }
 0x1ce   :  { %v1206_v9 = vadd.f32 %v1078_v63, %v774_v6  ;;  %v1222_v15 = vadd.f32 %v1094_v60, %v790_v18  ;;  %v344_v29 = vmul.f32 %v7406_v13, %v9881_v3  ;;  %v360_v48 = vmul.f32 %v7406_v13, %v9931_v53 }
 0x1cf   :  { %5029 = vmatprep.subr.bf16.mxu0 %v5028_v5  ;;  %v1945_v35 = vmax.f32 %v1817_v28, 0.0  ;;  %v1961_v12 = vmax.f32 %v1833_v19, 0.0  ;;  %v648_v20 = vmul.f32 %v7409_v27, %v9932_v47  ;;  %v664_v51 = vmul.f32 %v7409_v27, %v9960_v39 }
 0x1d0   :  { %v1638_v16 = vadd.f32 %v1510_v57, %v1206_v9  ;;  %v1654_v61 = vadd.f32 %v1526_v36, %v1222_v15  ;;  %v1080_v38 = vmul.f32 %v7449_v46, %v9961_v50  ;;  %v1096_v3 = vmul.f32 %v7449_v46, %v9962_v22 }
 0x1d1   :  { %v5044_v26 = vpack.c.bf16 %v1961_v12, %v1945_v35  ;;  %v776_v56 = vadd.f32 %v648_v20, %v344_v29  ;;  %v792_v53 = vadd.f32 %v664_v51, %v360_v48  ;;  %v1528_v47 = vmul.f32 %v7452_v25, %v9964_v54  ;;  %v9967_v54 = vld [vmem:[#allocation12_spill] sm:$0xff]  ;;  %v7768_v12 = vpop.permute.xlu0 %1990 }
 0x1d2   :  { %v1814_v13 = vadd.f32 %v9965_v10, %v1638_v16  ;;  %v1830_v58 = vadd.f32 %v9966_v41, %v1654_v61  ;;  %v1512_v30 = vmul.f32 %v7452_v25, %v9963_v45  ;;  %v7775_v61 = vpop.permute.xlu1 %1995 }
 0x1d3   :  { %5045 = vmatprep.subr.bf16.mxu1 %v5044_v26  ;;  %v1208_v27 = vadd.f32 %v1080_v38, %v776_v56  ;;  %v1224_v39 = vadd.f32 %v1096_v3, %v792_v53 }
 0x1d4   :  { %v1942_v50 = vmax.f32 %v1814_v13, 0.0  ;;  %v1958_v44 = vmax.f32 %v1830_v58, 0.0 }
 0x1d5   :  { %v1640_v49 = vadd.f32 %v1512_v30, %v1208_v27  ;;  %v1656_v46 = vadd.f32 %v1528_v47, %v1224_v39 }
 0x1d6   :  { %v5030_v22 = vpack.c.bf16 %v1958_v44, %v1942_v50 }
 0x1d7   :  { %v1816_v55 = vadd.f32 %v9965_v10, %v1640_v49  ;;  %v1832_v43 = vadd.f32 %v9966_v41, %v1656_v46 }
 0x1d8   :  { %5031 = vmatpush1.bf16.msra.mxu0 %v5030_v22 }
 0x1d9   :  { %v1944_v17 = vmax.f32 %v1816_v55, 0.0  ;;  %v1960_v14 = vmax.f32 %v1832_v43, 0.0 }
 0x1db   :  { %v5046_v11 = vpack.c.bf16 %v1960_v14, %v1944_v17  ;;  %4872 = vmatmul.mubr.msk.f32.vlgmr.msra.gmra.mrb[48].mxu0 %vm2018_vm0, %v9967_v54 }
 0x1dc   :  { %2791 = vmatprep.mubr.f32.mxu0 %v9876_v0 }
 0x1dd   :  { %5047 = vmatpush1.bf16.msra.mxu1 %v5046_v11 }
 0x1df   :  { %4873 = vmatmul.mubr.msk.f32.gmra.mrb[50].mxu0 %vm2018_vm0, %v7359_v62 }
 0x1e0   :  { %4880 = vmatmul.mubr.msk.f32.vlgmr.msra.gmra.mrb[48].mxu1 %vm2018_vm0, %v9967_v54  ;;  %2797 = vmatprep.mubr.f32.mxu0 %v9876_v0  ;;  %v7792_v54 = vpop.permute.xlu0 %2000 }
 0x1e1   :  { %2904 = vmatprep.mubr.f32.mxu1 %v9876_v0 }
 0x1e3   :  { %4874 = vmatmul.mubr.msk.f32.gmra.mrb[52].mxu0 %vm2018_vm0, %v7389_v40 }
 0x1e4   :  { %4881 = vmatmul.mubr.msk.f32.gmra.mrb[50].mxu1 %vm2018_vm0, %v7359_v62  ;;  %2803 = vmatprep.mubr.f32.mxu0 %v9876_v0  ;;  %v2109_v25 = vpop.f32.mrb[0].mxu0  ;;  %v2222_v45 = vpop.f32.mrb[0].mxu1 }
 0x1e5   :  { %2910 = vmatprep.mubr.f32.mxu1 %v9876_v0  ;;  %v2111_v10 = vpop.f32.mrb[1].mxu0  ;;  %v2224_v41 = vpop.f32.mrb[1].mxu1  ;;  %v2110_v62 = vadd.f32 %v2109_v25, %v7744_v59  ;;  %v2223_v21 = vadd.f32 %v2222_v45, %v7744_v59 }
 0x1e6   :  { %v2112_v37 = vadd.f32 %v2111_v10, %v7744_v59  ;;  %v2225_v42 = vadd.f32 %v2224_v41, %v7744_v59 }
 0x1e7   :  { %4875 = vmatmul.mubr.msk.f32.gmra.mrb[54].mxu0 %vm2018_vm0, %v7432_v52  ;;  %v2947_v6 = vmax.f32 %v2110_v62, 0.0  ;;  %v2949_v18 = vmax.f32 %v2223_v21, 0.0  ;;  %v7799_v21 = vpop.permute.xlu1 %2005 }
 0x1e8   :  { %4882 = vmatmul.mubr.msk.f32.gmra.mrb[52].mxu1 %vm2018_vm0, %v7389_v40  ;;  %2809 = vmatprep.mubr.f32.mxu0 %v9876_v0  ;;  %v2115_v23 = vpop.f32.mrb[2].mxu0  ;;  %v2228_v24 = vpop.f32.mrb[2].mxu1  ;;  %v2948_v5 = vmax.f32 %v2112_v37, 0.0  ;;  %v2950_v28 = vmax.f32 %v2225_v42, 0.0 }
 0x1e9   :  { %2916 = vmatprep.mubr.f32.mxu1 %v9876_v0  ;;  %v2116_v40 = vadd.f32 %v2115_v23, %v7749_v7  ;;  %v2229_v4 = vadd.f32 %v2228_v24, %v7749_v7  ;;  %v2117_v33 = vpop.f32.mrb[3].mxu0  ;;  %v2230_v1 = vpop.f32.mrb[3].mxu1 }
 0x1ea   :  { %v2118_v34 = vadd.f32 %v2117_v33, %v7749_v7  ;;  %v2231_v63 = vadd.f32 %v2230_v1, %v7749_v7 }
 0x1eb   :  { %4876 = vmatmul.mubr.msk.f32.gmra.mrb[56].mxu0 %vm2018_vm0, %v7478_v31  ;;  %v2963_v60 = vmax.f32 %v2116_v40, 0.0  ;;  %v2965_v57 = vmax.f32 %v2229_v4, 0.0 }
 0x1ec   :  { %4883 = vmatmul.mubr.msk.f32.gmra.mrb[54].mxu1 %vm2018_vm0, %v7432_v52  ;;  %2815 = vmatprep.mubr.f32.mxu0 %v9876_v0  ;;  %v2964_v19 = vmax.f32 %v2118_v34, 0.0  ;;  %v2966_v36 = vmax.f32 %v2231_v63, 0.0  ;;  %v2121_v9 = vpop.f32.mrb[4].mxu0  ;;  %v2234_v15 = vpop.f32.mrb[4].mxu1 }
 0x1ed   :  { %2922 = vmatprep.mubr.f32.mxu1 %v9876_v0  ;;  %v5050_v52 = vpack.c.bf16 %v2963_v60, %v2947_v6  ;;  %v5066_v29 = vpack.c.bf16 %v2965_v57, %v2949_v18  ;;  %v2123_v48 = vpop.f32.mrb[5].mxu0  ;;  %v2236_v35 = vpop.f32.mrb[5].mxu1  ;;  %v2122_v16 = vadd.f32 %v2121_v9, %v7768_v12  ;;  %v2235_v38 = vadd.f32 %v2234_v15, %v7768_v12 }
 0x1ee   :  { %v5048_v20 = vpack.c.bf16 %v2964_v19, %v2948_v5  ;;  %v5064_v51 = vpack.c.bf16 %v2966_v36, %v2950_v28  ;;  %v2124_v3 = vadd.f32 %v2123_v48, %v7768_v12 }
 0x1ef   :  { %4877 = vmatmul.mubr.msk.f32.gmra.mrb[58].mxu0 %vm2018_vm0, %v7509_v8  ;;  %v2979_v39 = vmax.f32 %v2122_v16, 0.0  ;;  %v2981_v44 = vmax.f32 %v2235_v38, 0.0  ;;  %v7814_v38 = vpop.permute.xlu1 %2015 }
 0x1f0   :  { %4884 = vmatmul.mubr.msk.f32.gmra.mrb[56].mxu1 %vm2018_vm0, %v7478_v31  ;;  %2821 = vmatprep.mubr.f32.mxu0 %v9876_v0  ;;  %v2127_v26 = vpop.f32.mrb[6].mxu0  ;;  %v2237_v31 = vadd.f32 %v2236_v35, %v7768_v12  ;;  %v2980_v49 = vmax.f32 %v2124_v3, 0.0 }
 0x1f1   :  { %2928 = vmatprep.mubr.f32.mxu1 %v9876_v0  ;;  %5049 = vmatprep.subr.bf16.mxu0 %v5048_v20  ;;  %v2128_v56 = vadd.f32 %v2127_v26, %v7775_v61  ;;  %v2129_v13 = vpop.f32.mrb[7].mxu0 }
 0x1f2   :  { %5065 = vmatprep.subr.bf16.mxu1 %v5064_v51  ;;  %v2240_v53 = vpop.f32.mrb[6].mxu1  ;;  %v2130_v47 = vadd.f32 %v2129_v13, %v7775_v61  ;;  %5051 = vmatpush1.bf16.msra.mxu0 %v5050_v52 }
 0x1f3   :  { %4878 = vmatmul.mubr.msk.f32.gmra.mrb[60].mxu0 %vm2018_vm0, %v7532_v32  ;;  %5067 = vmatpush1.bf16.msra.mxu1 %v5066_v29  ;;  %v2241_v58 = vadd.f32 %v2240_v53, %v7775_v61  ;;  %v2242_v27 = vpop.f32.mrb[7].mxu1  ;;  %v2995_v30 = vmax.f32 %v2128_v56, 0.0  ;;  %v7811_v29 = vpop.permute.xlu0 %2010 }
 0x1f4   :  { %4885 = vmatmul.mubr.msk.f32.gmra.mrb[58].mxu1 %vm2018_vm0, %v7509_v8  ;;  %2827 = vmatprep.mubr.f32.mxu0 %v9876_v0  ;;  %v2243_v50 = vadd.f32 %v2242_v27, %v7775_v61  ;;  %v2996_v22 = vmax.f32 %v2130_v47, 0.0  ;;  %v2133_v55 = vpop.f32.mrb[8].mxu0  ;;  %v2982_v8 = vmax.f32 %v2237_v31, 0.0 }
 0x1f5   :  { %2934 = vmatprep.mubr.f32.mxu1 %v9876_v0  ;;  %v2997_v46 = vmax.f32 %v2241_v58, 0.0  ;;  %v5054_v43 = vpack.c.bf16 %v2995_v30, %v2979_v39  ;;  %v2135_v11 = vpop.f32.mrb[9].mxu0  ;;  %v2134_v62 = vadd.f32 %v2133_v55, %v7792_v54 }
 0x1f6   :  { %v2998_v17 = vmax.f32 %v2243_v50, 0.0  ;;  %v2246_v14 = vpop.f32.mrb[8].mxu1  ;;  %v5052_v45 = vpack.c.bf16 %v2996_v22, %v2980_v49  ;;  %v2136_v42 = vadd.f32 %v2135_v11, %v7792_v54 }
 0x1f7   :  { %4879 = vmatmul.mubr.msk.f32.gmra.mrb[62].mxu0 %vm2018_vm0, %v7563_v2  ;;  %v5070_v25 = vpack.c.bf16 %v2997_v46, %v2981_v44  ;;  %v2248_v10 = vpop.f32.mrb[9].mxu1  ;;  %v2247_v37 = vadd.f32 %v2246_v14, %v7792_v54  ;;  %v3011_v63 = vmax.f32 %v2134_v62, 0.0 }
 0x1f8   :  { %4886 = vmatmul.mubr.msk.f32.gmra.mrb[60].mxu1 %vm2018_vm0, %v7532_v32  ;;  %v5068_v41 = vpack.c.bf16 %v2998_v17, %v2982_v8  ;;  %3179 = vmatprep.mubr.f32.mxu0 %v9876_v0  ;;  %v2139_v23 = vpop.f32.mrb[10].mxu0  ;;  %v2249_v32 = vadd.f32 %v2248_v10, %v7792_v54  ;;  %v3012_v57 = vmax.f32 %v2136_v42, 0.0 }
 0x1f9   :  { %2940 = vmatprep.mubr.f32.mxu1 %v9876_v0  ;;  %5053 = vmatprep.subr.bf16.mxu0 %v5052_v45  ;;  %v2140_v24 = vadd.f32 %v2139_v23, %v7799_v21  ;;  %v2141_v4 = vpop.f32.mrb[11].mxu0  ;;  %v3013_v60 = vmax.f32 %v2247_v37, 0.0 }
 0x1fa   :  { %v2252_v40 = vpop.f32.mrb[10].mxu1  ;;  %5069 = vmatprep.subr.bf16.mxu1 %v5068_v41  ;;  %5055 = vmatpush1.bf16.msra.mxu0 %v5054_v43  ;;  %v2142_v1 = vadd.f32 %v2141_v4, %v7799_v21  ;;  %v3014_v36 = vmax.f32 %v2249_v32, 0.0  ;;  %v7826_v41 = vld [vmem:[%s9420_s5] sm:$0xff] }
 0x1fb   :  { %v2253_v33 = vadd.f32 %v2252_v40, %v7799_v21  ;;  %v2254_v34 = vpop.f32.mrb[11].mxu1  ;;  %v3027_v6 = vmax.f32 %v2140_v24, 0.0  ;;  %5071 = vmatpush1.bf16.msra.mxu1 %v5070_v25 }
 0x1fc   :  { %4887 = vmatmul.mubr.msk.f32.gmra.mrb[62].mxu1 %vm2018_vm0, %v7563_v2  ;;  %v2255_v18 = vadd.f32 %v2254_v34, %v7799_v21  ;;  %v3028_v28 = vmax.f32 %v2142_v1, 0.0 }
 0x1fd   :  { %3268 = vmatprep.mubr.f32.mxu1 %v9876_v0  ;;  %v3029_v5 = vmax.f32 %v2253_v33, 0.0  ;;  %v2145_v19 = vpop.f32.mrb[12].mxu0  ;;  %v5058_v9 = vpack.c.bf16 %v3027_v6, %v3011_v63  ;;  %v7840_v33 = vld [vmem:[%s9420_s5 + $0x8] sm:$0xff] }
 0x1fe   :  { %v3030_v2 = vmax.f32 %v2255_v18, 0.0  ;;  %v2258_v15 = vpop.f32.mrb[12].mxu1  ;;  %v2147_v52 = vpop.f32.mrb[13].mxu0  ;;  %v5056_v35 = vpack.c.bf16 %v3028_v28, %v3012_v57  ;;  %v2146_v16 = vadd.f32 %v2145_v19, %v7811_v29 }
 0x1ff   :  { %v5074_v48 = vpack.c.bf16 %v3029_v5, %v3013_v60  ;;  %v2260_v20 = vpop.f32.mrb[13].mxu1  ;;  %v2259_v3 = vadd.f32 %v2258_v15, %v7811_v29  ;;  %v2148_v26 = vadd.f32 %v2147_v52, %v7811_v29 }
 0x200   :  { %v5072_v51 = vpack.c.bf16 %v3030_v2, %v3014_v36  ;;  %5057 = vmatprep.subr.bf16.mxu0 %v5056_v35  ;;  %v2261_v56 = vadd.f32 %v2260_v20, %v7811_v29  ;;  %v3043_v30 = vmax.f32 %v2146_v16, 0.0 }
 0x201   :  { %v2151_v31 = vpop.f32.mrb[14].mxu0  ;;  %5059 = vmatpush1.bf16.msra.mxu0 %v5058_v9  ;;  %v3045_v49 = vmax.f32 %v2259_v3, 0.0  ;;  %v3044_v46 = vmax.f32 %v2148_v26, 0.0 }
 0x202   :  { %v2152_v53 = vadd.f32 %v2151_v31, %v7814_v38  ;;  %v2264_v13 = vpop.f32.mrb[14].mxu1  ;;  %5073 = vmatprep.subr.bf16.mxu1 %v5072_v51  ;;  %v2153_v58 = vpop.f32.mrb[15].mxu0  ;;  %v3046_v8 = vmax.f32 %v2261_v56, 0.0 }
 0x203   :  { %v2265_v47 = vadd.f32 %v2264_v13, %v7814_v38  ;;  %v2154_v27 = vadd.f32 %v2153_v58, %v7814_v38  ;;  %v2266_v39 = vpop.f32.mrb[15].mxu1  ;;  %5075 = vmatpush1.bf16.msra.mxu1 %v5074_v48  ;;  %v7857_v48 = vld [vmem:[%s9420_s5 + $0x10] sm:$0xff] }
 0x204   :  { %v3059_v50 = vmax.f32 %v2152_v53, 0.0  ;;  %v2267_v44 = vadd.f32 %v2266_v39, %v7814_v38 }
 0x205   :  { %v3061_v22 = vmax.f32 %v2265_v47, 0.0  ;;  %v3060_v55 = vmax.f32 %v2154_v27, 0.0 }
 0x206   :  { %v5062_v43 = vpack.c.bf16 %v3059_v50, %v3043_v30  ;;  %v3062_v17 = vmax.f32 %v2267_v44, 0.0  ;;  %v7871_v50 = vld [vmem:[%s9420_s5 + $0x18] sm:$0xff] }
 0x207   :  { %v5078_v14 = vpack.c.bf16 %v3061_v22, %v3045_v49  ;;  %v5060_v11 = vpack.c.bf16 %v3060_v55, %v3044_v46 }
 0x208   :  { %v5076_v25 = vpack.c.bf16 %v3062_v17, %v3046_v8  ;;  %v2335_v45 = vpop.f32.mrb[16].mxu0 }
 0x209   :  { %v2337_v10 = vpop.f32.mrb[17].mxu0  ;;  %5061 = vmatprep.subr.bf16.mxu0 %v5060_v11  ;;  %v2336_v62 = vadd.f32 %v2335_v45, %v7744_v59 }
 0x20a   :  { %5077 = vmatprep.subr.bf16.mxu1 %v5076_v25  ;;  %5063 = vmatpush1.bf16.msra.mxu0 %v5062_v43  ;;  %v2338_v37 = vadd.f32 %v2337_v10, %v7744_v59 }
 0x20b   :  { %5079 = vmatpush1.bf16.msra.mxu1 %v5078_v14  ;;  %v2951_v1 = vmax.f32 %v2336_v62, 0.0 }
 0x20c   :  { %v2341_v42 = vpop.f32.mrb[18].mxu0  ;;  %v2952_v6 = vmax.f32 %v2338_v37, 0.0 }
 0x20d   :  { %v2342_v32 = vadd.f32 %v2341_v42, %v7749_v7  ;;  %v2343_v24 = vpop.f32.mrb[19].mxu0  ;;  %4888 = vmatmul.mubr.msk.f32.vlgmr.msra.gmra.mrb[64].mxu0 %vm2018_vm0, %v7826_v41 }
 0x20e   :  { %v2448_v23 = vpop.f32.mrb[16].mxu1  ;;  %v2344_v4 = vadd.f32 %v2343_v24, %v7749_v7  ;;  %4892 = vmatmul.mubr.msk.f32.vlgmr.msra.gmra.mrb[64].mxu1 %vm2018_vm0, %v7826_v41  ;;  %3185 = vmatprep.mubr.f32.mxu0 %v9876_v0 }
 0x20f   :  { %v2450_v40 = vpop.f32.mrb[17].mxu1  ;;  %v2967_v34 = vmax.f32 %v2342_v32, 0.0  ;;  %3274 = vmatprep.mubr.f32.mxu1 %v9876_v0  ;;  %v2449_v63 = vadd.f32 %v2448_v23, %v7744_v59 }
 0x210   :  { %v2968_v18 = vmax.f32 %v2344_v4, 0.0  ;;  %v2347_v60 = vpop.f32.mrb[20].mxu0  ;;  %v2451_v57 = vadd.f32 %v2450_v40, %v7744_v59 }
 0x211   :  { %v5082_v5 = vpack.c.bf16 %v2967_v34, %v2951_v1  ;;  %v2349_v19 = vpop.f32.mrb[21].mxu0  ;;  %4889 = vmatmul.mubr.msk.f32.gmra.mrb[66].mxu0 %vm2018_vm0, %v7840_v33  ;;  %v2348_v52 = vadd.f32 %v2347_v60, %v7768_v12  ;;  %v2953_v35 = vmax.f32 %v2449_v63, 0.0 }
 0x212   :  { %v2454_v28 = vpop.f32.mrb[18].mxu1  ;;  %v5080_v9 = vpack.c.bf16 %v2968_v18, %v2952_v6  ;;  %4893 = vmatmul.mubr.msk.f32.gmra.mrb[66].mxu1 %vm2018_vm0, %v7840_v33  ;;  %3191 = vmatprep.mubr.f32.mxu0 %v9876_v0  ;;  %v2350_v51 = vadd.f32 %v2349_v19, %v7768_v12  ;;  %v2954_v3 = vmax.f32 %v2451_v57, 0.0 }
 0x213   :  { %v2455_v36 = vadd.f32 %v2454_v28, %v7749_v7  ;;  %v2456_v2 = vpop.f32.mrb[19].mxu1  ;;  %3280 = vmatprep.mubr.f32.mxu1 %v9876_v0  ;;  %v2983_v39 = vmax.f32 %v2348_v52, 0.0 }
 0x214   :  { %v2457_v15 = vadd.f32 %v2456_v2, %v7749_v7  ;;  %v2353_v16 = vpop.f32.mrb[22].mxu0  ;;  %5081 = vmatprep.subr.bf16.mxu0 %v5080_v9  ;;  %v2984_v49 = vmax.f32 %v2350_v51, 0.0 }
 0x215   :  { %v2969_v20 = vmax.f32 %v2455_v36, 0.0  ;;  %v2354_v56 = vadd.f32 %v2353_v16, %v7775_v61  ;;  %v2355_v53 = vpop.f32.mrb[23].mxu0  ;;  %5083 = vmatpush1.bf16.msra.mxu0 %v5082_v5 }
 0x216   :  { %v2970_v26 = vmax.f32 %v2457_v15, 0.0  ;;  %v2460_v31 = vpop.f32.mrb[20].mxu1  ;;  %v2356_v47 = vadd.f32 %v2355_v53, %v7775_v61  ;;  %4890 = vmatmul.mubr.msk.f32.gmra.mrb[68].mxu0 %vm2018_vm0, %v7857_v48  ;;  %4894 = vmatmul.mubr.msk.f32.gmra.mrb[68].mxu1 %vm2018_vm0, %v7857_v48 }
 0x217   :  { %v5098_v13 = vpack.c.bf16 %v2969_v20, %v2953_v35  ;;  %v2462_v58 = vpop.f32.mrb[21].mxu1  ;;  %v2999_v30 = vmax.f32 %v2354_v56, 0.0  ;;  %3197 = vmatprep.mubr.f32.mxu0 %v9876_v0  ;;  %3286 = vmatprep.mubr.f32.mxu1 %v9876_v0  ;;  %v2461_v44 = vadd.f32 %v2460_v31, %v7768_v12 }
 0x218   :  { %v5096_v27 = vpack.c.bf16 %v2970_v26, %v2954_v3  ;;  %v3000_v46 = vmax.f32 %v2356_v47, 0.0  ;;  %v2463_v22 = vadd.f32 %v2462_v58, %v7768_v12 }
 0x219   :  { %v5086_v55 = vpack.c.bf16 %v2999_v30, %v2983_v39  ;;  %v2359_v43 = vpop.f32.mrb[24].mxu0  ;;  %v2985_v10 = vmax.f32 %v2461_v44, 0.0 }
 0x21a   :  { %v2466_v8 = vpop.f32.mrb[22].mxu1  ;;  %5097 = vmatprep.subr.bf16.mxu1 %v5096_v27  ;;  %v5084_v14 = vpack.c.bf16 %v3000_v46, %v2984_v49  ;;  %v2361_v25 = vpop.f32.mrb[25].mxu0  ;;  %4891 = vmatmul.mubr.msk.f32.gmra.mrb[70].mxu0 %vm2018_vm0, %v7871_v50  ;;  %v2986_v37 = vmax.f32 %v2463_v22, 0.0  ;;  %v2360_v23 = vadd.f32 %v2359_v43, %v7792_v54 }
 0x21b   :  { %v2467_v17 = vadd.f32 %v2466_v8, %v7775_v61  ;;  %v2468_v11 = vpop.f32.mrb[23].mxu1  ;;  %5099 = vmatpush1.bf16.msra.mxu1 %v5098_v13  ;;  %3357 = vmatprep.mubr.f32.mxu0 %v9876_v0  ;;  %v2362_v40 = vadd.f32 %v2361_v25, %v7792_v54 }
 0x21c   :  { %v2469_v45 = vadd.f32 %v2468_v11, %v7775_v61  ;;  %4895 = vmatmul.mubr.msk.f32.gmra.mrb[70].mxu1 %vm2018_vm0, %v7871_v50  ;;  %5085 = vmatprep.subr.bf16.mxu0 %v5084_v14  ;;  %v3015_v60 = vmax.f32 %v2360_v23, 0.0 }
 0x21d   :  { %v3001_v62 = vmax.f32 %v2467_v17, 0.0  ;;  %3446 = vmatprep.mubr.f32.mxu1 %v9876_v0  ;;  %5087 = vmatpush1.bf16.msra.mxu0 %v5086_v55  ;;  %v2365_v4 = vpop.f32.mrb[26].mxu0  ;;  %v3016_v28 = vmax.f32 %v2362_v40, 0.0 }
 0x21e   :  { %v3002_v42 = vmax.f32 %v2469_v45, 0.0  ;;  %v2366_v63 = vadd.f32 %v2365_v4, %v7799_v21  ;;  %v2367_v6 = vpop.f32.mrb[27].mxu0 }
 0x21f   :  { %v5102_v32 = vpack.c.bf16 %v3001_v62, %v2985_v10  ;;  %v2472_v24 = vpop.f32.mrb[24].mxu1  ;;  %v2368_v18 = vadd.f32 %v2367_v6, %v7799_v21 }
 0x220   :  { %v5100_v1 = vpack.c.bf16 %v3002_v42, %v2986_v37  ;;  %v2474_v34 = vpop.f32.mrb[25].mxu1  ;;  %v3031_v57 = vmax.f32 %v2366_v63, 0.0  ;;  %v2473_v5 = vadd.f32 %v2472_v24, %v7792_v54 }
 0x221   :  { %v3032_v19 = vmax.f32 %v2368_v18, 0.0  ;;  %v2371_v36 = vpop.f32.mrb[28].mxu0  ;;  %v2475_v9 = vadd.f32 %v2474_v34, %v7792_v54 }
 0x222   :  { %5101 = vmatprep.subr.bf16.mxu1 %v5100_v1  ;;  %v5090_v2 = vpack.c.bf16 %v3031_v57, %v3015_v60  ;;  %v2373_v52 = vpop.f32.mrb[29].mxu0  ;;  %v2372_v3 = vadd.f32 %v2371_v36, %v7811_v29  ;;  %v3017_v26 = vmax.f32 %v2473_v5, 0.0 }
 0x223   :  { %5103 = vmatpush1.bf16.msra.mxu1 %v5102_v32  ;;  %v5088_v20 = vpack.c.bf16 %v3032_v19, %v3016_v28  ;;  %v2374_v56 = vadd.f32 %v2373_v52, %v7811_v29  ;;  %v3018_v13 = vmax.f32 %v2475_v9, 0.0 }
 0x224   :  { %v2478_v15 = vpop.f32.mrb[26].mxu1  ;;  %v3047_v22 = vmax.f32 %v2372_v3, 0.0 }
 0x225   :  { %v2479_v35 = vadd.f32 %v2478_v15, %v7799_v21  ;;  %v2480_v51 = vpop.f32.mrb[27].mxu1  ;;  %5089 = vmatprep.subr.bf16.mxu0 %v5088_v20  ;;  %v3048_v8 = vmax.f32 %v2374_v56, 0.0 }
 0x226   :  { %v2481_v16 = vadd.f32 %v2480_v51, %v7799_v21  ;;  %v2377_v53 = vpop.f32.mrb[30].mxu0  ;;  %5091 = vmatpush1.bf16.msra.mxu0 %v5090_v2 }
 0x227   :  { %v3033_v31 = vmax.f32 %v2479_v35, 0.0  ;;  %v2378_v27 = vadd.f32 %v2377_v53, %v7814_v38  ;;  %v2379_v39 = vpop.f32.mrb[31].mxu0 }
 0x228   :  { %v3034_v58 = vmax.f32 %v2481_v16, 0.0  ;;  %v2484_v47 = vpop.f32.mrb[28].mxu1  ;;  %v2380_v49 = vadd.f32 %v2379_v39, %v7814_v38 }
 0x229   :  { %v5106_v30 = vpack.c.bf16 %v3033_v31, %v3017_v26  ;;  %v2486_v44 = vpop.f32.mrb[29].mxu1  ;;  %v3063_v55 = vmax.f32 %v2378_v27, 0.0  ;;  %v2485_v17 = vadd.f32 %v2484_v47, %v7811_v29 }
 0x22a   :  { %v5104_v46 = vpack.c.bf16 %v3034_v58, %v3018_v13  ;;  %v3064_v43 = vmax.f32 %v2380_v49, 0.0  ;;  %v2487_v11 = vadd.f32 %v2486_v44, %v7811_v29 }
 0x22b   :  { %v5094_v14 = vpack.c.bf16 %v3063_v55, %v3047_v22  ;;  %v3049_v42 = vmax.f32 %v2485_v17, 0.0 }
 0x22c   :  { %5105 = vmatprep.subr.bf16.mxu1 %v5104_v46  ;;  %v5092_v45 = vpack.c.bf16 %v3064_v43, %v3048_v8  ;;  %v3050_v32 = vmax.f32 %v2487_v11, 0.0 }
 0x22d   :  { %v2490_v25 = vpop.f32.mrb[30].mxu1  ;;  %5107 = vmatpush1.bf16.msra.mxu1 %v5106_v30 }
 0x22e   :  { %v2491_v10 = vadd.f32 %v2490_v25, %v7814_v38  ;;  %v2492_v62 = vpop.f32.mrb[31].mxu1  ;;  %5093 = vmatprep.subr.bf16.mxu0 %v5092_v45 }
 0x22f   :  { %v2493_v37 = vadd.f32 %v2492_v62, %v7814_v38  ;;  %5095 = vmatpush1.bf16.msra.mxu0 %v5094_v14 }
 0x230   :  { %v3065_v23 = vmax.f32 %v2491_v10, 0.0 }
 0x231   :  { %v3066_v24 = vmax.f32 %v2493_v37, 0.0 }
 0x232   :  { %v5110_v40 = vpack.c.bf16 %v3065_v23, %v3049_v42  ;;  %4896 = vmatmul.mubr.msk.f32.vlgmr.msra.gmra.mrb[72].mxu0 %vm2018_vm0, %v7826_v41 }
 0x233   :  { %v5108_v4 = vpack.c.bf16 %v3066_v24, %v3050_v32  ;;  %3363 = vmatprep.mubr.f32.mxu0 %v9876_v0 }
 0x235   :  { %5109 = vmatprep.subr.bf16.mxu1 %v5108_v4 }
 0x236   :  { %5111 = vmatpush1.bf16.msra.mxu1 %v5110_v40  ;;  %4897 = vmatmul.mubr.msk.f32.gmra.mrb[74].mxu0 %vm2018_vm0, %v7840_v33 }
 0x237   :  { %3369 = vmatprep.mubr.f32.mxu0 %v9876_v0 }
 0x239   :  { %4900 = vmatmul.mubr.msk.f32.vlgmr.msra.gmra.mrb[72].mxu1 %vm2018_vm0, %v7826_v41 }
 0x23a   :  { %3452 = vmatprep.mubr.f32.mxu1 %v9876_v0  ;;  %4898 = vmatmul.mubr.msk.f32.gmra.mrb[76].mxu0 %vm2018_vm0, %v7857_v48 }
 0x23b   :  { %3375 = vmatprep.mubr.f32.mxu0 %v9876_v0 }
 0x23d   :  { %4901 = vmatmul.mubr.msk.f32.gmra.mrb[74].mxu1 %vm2018_vm0, %v7840_v33 }
 0x23e   :  { %3458 = vmatprep.mubr.f32.mxu1 %v9876_v0  ;;  %4899 = vmatmul.mubr.msk.f32.gmra.mrb[78].mxu0 %vm2018_vm0, %v7871_v50 }
 0x23f   :  { %3535 = vmatprep.mubr.f32.mxu0 %v9876_v0 }
 0x241   :  { %4902 = vmatmul.mubr.msk.f32.gmra.mrb[76].mxu1 %vm2018_vm0, %v7857_v48 }
 0x242   :  { %3464 = vmatprep.mubr.f32.mxu1 %v9876_v0 }
 0x245   :  { %4903 = vmatmul.mubr.msk.f32.gmra.mrb[78].mxu1 %vm2018_vm0, %v7871_v50 }
 0x246   :  { %3624 = vmatprep.mubr.f32.mxu1 %v9876_v0 }
 0x25a   :  { %v2561_v1 = vpop.f32.mrb[32].mxu0 }
 0x25b   :  { %v2563_v34 = vpop.f32.mrb[33].mxu0  ;;  %v2562_v63 = vadd.f32 %v2561_v1, %v7744_v59 }
 0x25c   :  { %v2564_v6 = vadd.f32 %v2563_v34, %v7744_v59 }
 0x25d   :  { %v2955_v36 = vmax.f32 %v2562_v63, 0.0 }
 0x25e   :  { %v2567_v18 = vpop.f32.mrb[34].mxu0  ;;  %v2956_v15 = vmax.f32 %v2564_v6, 0.0 }
 0x25f   :  { %v2674_v60 = vpop.f32.mrb[32].mxu1  ;;  %v2568_v57 = vadd.f32 %v2567_v18, %v7749_v7  ;;  %v2569_v5 = vpop.f32.mrb[35].mxu0 }
 0x260   :  { %v2676_v28 = vpop.f32.mrb[33].mxu1  ;;  %v2570_v19 = vadd.f32 %v2569_v5, %v7749_v7  ;;  %v2675_v2 = vadd.f32 %v2674_v60, %v7744_v59 }
 0x261   :  { %v2971_v9 = vmax.f32 %v2568_v57, 0.0  ;;  %v2677_v20 = vadd.f32 %v2676_v28, %v7744_v59 }
 0x262   :  { %v2972_v52 = vmax.f32 %v2570_v19, 0.0  ;;  %v2573_v35 = vpop.f32.mrb[36].mxu0  ;;  %v2957_v13 = vmax.f32 %v2675_v2, 0.0 }
 0x263   :  { %v5114_v51 = vpack.c.bf16 %v2971_v9, %v2955_v36  ;;  %v2680_v16 = vpop.f32.mrb[34].mxu1  ;;  %v2575_v3 = vpop.f32.mrb[37].mxu0  ;;  %v2574_v47 = vadd.f32 %v2573_v35, %v7768_v12  ;;  %v2958_v27 = vmax.f32 %v2677_v20, 0.0 }
 0x264   :  { %v2681_v26 = vadd.f32 %v2680_v16, %v7749_v7  ;;  %v5112_v31 = vpack.c.bf16 %v2972_v52, %v2956_v15  ;;  %v2682_v56 = vpop.f32.mrb[35].mxu1  ;;  %v2576_v44 = vadd.f32 %v2575_v3, %v7768_v12 }
 0x265   :  { %v2683_v53 = vadd.f32 %v2682_v56, %v7749_v7  ;;  %v2987_v14 = vmax.f32 %v2574_v47, 0.0 }
 0x266   :  { %v2973_v58 = vmax.f32 %v2681_v26, 0.0  ;;  %5113 = vmatprep.subr.bf16.mxu0 %v5112_v31  ;;  %v2988_v45 = vmax.f32 %v2576_v44, 0.0 }
 0x267   :  { %v2974_v39 = vmax.f32 %v2683_v53, 0.0  ;;  %v2686_v30 = vpop.f32.mrb[36].mxu1  ;;  %v2579_v49 = vpop.f32.mrb[38].mxu0  ;;  %5115 = vmatpush1.bf16.msra.mxu0 %v5114_v51 }
 0x268   :  { %v5130_v46 = vpack.c.bf16 %v2973_v58, %v2957_v13  ;;  %v2688_v22 = vpop.f32.mrb[37].mxu1  ;;  %v2580_v55 = vadd.f32 %v2579_v49, %v7775_v61  ;;  %v2581_v8 = vpop.f32.mrb[39].mxu0  ;;  %v2687_v25 = vadd.f32 %v2686_v30, %v7768_v12 }
 0x269   :  { %v5128_v43 = vpack.c.bf16 %v2974_v39, %v2958_v27  ;;  %v2582_v17 = vadd.f32 %v2581_v8, %v7775_v61  ;;  %v2689_v62 = vadd.f32 %v2688_v22, %v7768_v12 }
 0x26a   :  { %v3003_v11 = vmax.f32 %v2580_v55, 0.0  ;;  %v2989_v1 = vmax.f32 %v2687_v25, 0.0 }
 0x26b   :  { %5129 = vmatprep.subr.bf16.mxu1 %v5128_v43  ;;  %v3004_v10 = vmax.f32 %v2582_v17, 0.0  ;;  %v2990_v6 = vmax.f32 %v2689_v62, 0.0 }
 0x26c   :  { %v5118_v37 = vpack.c.bf16 %v3003_v11, %v2987_v14  ;;  %v2692_v42 = vpop.f32.mrb[38].mxu1  ;;  %5131 = vmatpush1.bf16.msra.mxu1 %v5130_v46 }
 0x26d   :  { %v2693_v23 = vadd.f32 %v2692_v42, %v7775_v61  ;;  %v5116_v32 = vpack.c.bf16 %v3004_v10, %v2988_v45  ;;  %v2694_v24 = vpop.f32.mrb[39].mxu1 }
 0x26e   :  { %v2695_v40 = vadd.f32 %v2694_v24, %v7775_v61  ;;  %v2585_v4 = vpop.f32.mrb[40].mxu0 }
 0x26f   :  { %v3005_v34 = vmax.f32 %v2693_v23, 0.0  ;;  %v2587_v63 = vpop.f32.mrb[41].mxu0  ;;  %5117 = vmatprep.subr.bf16.mxu0 %v5116_v32  ;;  %v2586_v19 = vadd.f32 %v2585_v4, %v7792_v54 }
 0x270   :  { %v3006_v18 = vmax.f32 %v2695_v40, 0.0  ;;  %v2698_v60 = vpop.f32.mrb[40].mxu1  ;;  %5119 = vmatpush1.bf16.msra.mxu0 %v5118_v37  ;;  %v2588_v9 = vadd.f32 %v2587_v63, %v7792_v54 }
 0x271   :  { %v5134_v57 = vpack.c.bf16 %v3005_v34, %v2989_v1  ;;  %v2700_v5 = vpop.f32.mrb[41].mxu1  ;;  %v2699_v36 = vadd.f32 %v2698_v60, %v7792_v54  ;;  %v3019_v26 = vmax.f32 %v2586_v19, 0.0 }
 0x272   :  { %v5132_v28 = vpack.c.bf16 %v3006_v18, %v2990_v6  ;;  %v2701_v15 = vadd.f32 %v2700_v5, %v7792_v54  ;;  %v3020_v13 = vmax.f32 %v2588_v9, 0.0 }
 0x273   :  { %v2591_v2 = vpop.f32.mrb[42].mxu0  ;;  %v3021_v53 = vmax.f32 %v2699_v36, 0.0 }
 0x274   :  { %v2592_v52 = vadd.f32 %v2591_v2, %v7799_v21  ;;  %v2704_v35 = vpop.f32.mrb[42].mxu1  ;;  %5133 = vmatprep.subr.bf16.mxu1 %v5132_v28  ;;  %v2593_v20 = vpop.f32.mrb[43].mxu0  ;;  %v3022_v39 = vmax.f32 %v2701_v15, 0.0 }
 0x275   :  { %v2705_v51 = vadd.f32 %v2704_v35, %v7799_v21  ;;  %v2594_v16 = vadd.f32 %v2593_v20, %v7799_v21  ;;  %v2706_v3 = vpop.f32.mrb[43].mxu1  ;;  %5135 = vmatpush1.bf16.msra.mxu1 %v5134_v57 }
 0x276   :  { %v3035_v31 = vmax.f32 %v2592_v52, 0.0  ;;  %v2707_v56 = vadd.f32 %v2706_v3, %v7799_v21 }
 0x277   :  { %v3037_v58 = vmax.f32 %v2705_v51, 0.0  ;;  %v3036_v47 = vmax.f32 %v2594_v16, 0.0  ;;  %v2597_v27 = vpop.f32.mrb[44].mxu0 }
 0x278   :  { %v5122_v30 = vpack.c.bf16 %v3035_v31, %v3019_v26  ;;  %v3038_v44 = vmax.f32 %v2707_v56, 0.0  ;;  %v2710_v49 = vpop.f32.mrb[44].mxu1  ;;  %v2599_v46 = vpop.f32.mrb[45].mxu0  ;;  %v2598_v17 = vadd.f32 %v2597_v27, %v7811_v29 }
 0x279   :  { %v5138_v22 = vpack.c.bf16 %v3037_v58, %v3021_v53  ;;  %v5120_v55 = vpack.c.bf16 %v3036_v47, %v3020_v13  ;;  %v2712_v8 = vpop.f32.mrb[45].mxu1  ;;  %v2711_v14 = vadd.f32 %v2710_v49, %v7811_v29  ;;  %v2600_v11 = vadd.f32 %v2599_v46, %v7811_v29 }
 0x27a   :  { %v5136_v43 = vpack.c.bf16 %v3038_v44, %v3022_v39  ;;  %v2713_v45 = vadd.f32 %v2712_v8, %v7811_v29  ;;  %v3051_v24 = vmax.f32 %v2598_v17, 0.0 }
 0x27b   :  { %5121 = vmatprep.subr.bf16.mxu0 %v5120_v55  ;;  %v3053_v1 = vmax.f32 %v2711_v14, 0.0  ;;  %v3052_v34 = vmax.f32 %v2600_v11, 0.0 }
 0x27c   :  { %v2603_v25 = vpop.f32.mrb[46].mxu0  ;;  %5137 = vmatprep.subr.bf16.mxu1 %v5136_v43  ;;  %5123 = vmatpush1.bf16.msra.mxu0 %v5122_v30  ;;  %v3054_v18 = vmax.f32 %v2713_v45, 0.0 }
 0x27d   :  { %v2604_v10 = vadd.f32 %v2603_v25, %v7814_v38  ;;  %v2716_v62 = vpop.f32.mrb[46].mxu1  ;;  %v2605_v37 = vpop.f32.mrb[47].mxu0  ;;  %5139 = vmatpush1.bf16.msra.mxu1 %v5138_v22 }
 0x27e   :  { %v2717_v42 = vadd.f32 %v2716_v62, %v7814_v38  ;;  %v2606_v23 = vadd.f32 %v2605_v37, %v7814_v38  ;;  %v2718_v32 = vpop.f32.mrb[47].mxu1 }
 0x27f   :  { %v3067_v40 = vmax.f32 %v2604_v10, 0.0  ;;  %v2719_v4 = vadd.f32 %v2718_v32, %v7814_v38 }
 0x280   :  { %v3069_v63 = vmax.f32 %v2717_v42, 0.0  ;;  %v3068_v6 = vmax.f32 %v2606_v23, 0.0 }
 0x281   :  { %v5126_v60 = vpack.c.bf16 %v3067_v40, %v3051_v24  ;;  %v3070_v57 = vmax.f32 %v2719_v4, 0.0 }
 0x282   :  { %v5142_v5 = vpack.c.bf16 %v3069_v63, %v3053_v1  ;;  %v5124_v28 = vpack.c.bf16 %v3068_v6, %v3052_v34 }
 0x283   :  { %v5140_v19 = vpack.c.bf16 %v3070_v57, %v3054_v18 }
 0x284   :  { %5125 = vmatprep.subr.bf16.mxu0 %v5124_v28 }
 0x285   :  { %5141 = vmatprep.subr.bf16.mxu1 %v5140_v19  ;;  %5127 = vmatpush1.bf16.msra.mxu0 %v5126_v60 }
 0x286   :  { %5143 = vmatpush1.bf16.msra.mxu1 %v5142_v5 }
 0x288   :  { %4904 = vmatmul.mubr.msk.f32.vlgmr.msra.gmra.mrb[80].mxu0 %vm2018_vm0, %v7826_v41 }
 0x289   :  { %4908 = vmatmul.mubr.msk.f32.vlgmr.msra.gmra.mrb[80].mxu1 %vm2018_vm0, %v7826_v41  ;;  %3541 = vmatprep.mubr.f32.mxu0 %v9876_v0 }
 0x28a   :  { %3630 = vmatprep.mubr.f32.mxu1 %v9876_v0 }
 0x28c   :  { %4905 = vmatmul.mubr.msk.f32.gmra.mrb[82].mxu0 %vm2018_vm0, %v7840_v33 }
 0x28d   :  { %4909 = vmatmul.mubr.msk.f32.gmra.mrb[82].mxu1 %vm2018_vm0, %v7840_v33  ;;  %3547 = vmatprep.mubr.f32.mxu0 %v9876_v0 }
 0x28e   :  { %3636 = vmatprep.mubr.f32.mxu1 %v9876_v0 }
 0x290   :  { %4906 = vmatmul.mubr.msk.f32.gmra.mrb[84].mxu0 %vm2018_vm0, %v7857_v48 }
 0x291   :  { %4910 = vmatmul.mubr.msk.f32.gmra.mrb[84].mxu1 %vm2018_vm0, %v7857_v48  ;;  %3553 = vmatprep.mubr.f32.mxu0 %v9876_v0 }
 0x292   :  { %3642 = vmatprep.mubr.f32.mxu1 %v9876_v0 }
 0x294   :  { %4907 = vmatmul.mubr.msk.f32.gmra.mrb[86].mxu0 %vm2018_vm0, %v7871_v50 }
 0x295   :  { %4911 = vmatmul.mubr.msk.f32.gmra.mrb[86].mxu1 %vm2018_vm0, %v7871_v50  ;;  %3713 = vmatprep.mubr.f32.mxu0 %v9876_v0 }
 0x296   :  { %3802 = vmatprep.mubr.f32.mxu1 %v9876_v0 }
 0x2ae   :  { %v2787_v36 = vpop.f32.mrb[48].mxu0 }
 0x2af   :  { %v2789_v9 = vpop.f32.mrb[49].mxu0  ;;  %v2788_v2 = vadd.f32 %v2787_v36, %v7744_v59 }
 0x2b0   :  { %v2790_v15 = vadd.f32 %v2789_v9, %v7744_v59 }
 0x2b1   :  { %v2959_v26 = vmax.f32 %v2788_v2, 0.0 }
 0x2b2   :  { %v2793_v52 = vpop.f32.mrb[50].mxu0  ;;  %v2960_v53 = vmax.f32 %v2790_v15, 0.0 }
 0x2b3   :  { %v2900_v35 = vpop.f32.mrb[48].mxu1  ;;  %v2794_v20 = vadd.f32 %v2793_v52, %v7749_v7  ;;  %v2795_v51 = vpop.f32.mrb[51].mxu0 }
 0x2b4   :  { %v2902_v16 = vpop.f32.mrb[49].mxu1  ;;  %v2796_v3 = vadd.f32 %v2795_v51, %v7749_v7  ;;  %v2901_v56 = vadd.f32 %v2900_v35, %v7744_v59 }
 0x2b5   :  { %v2975_v31 = vmax.f32 %v2794_v20, 0.0  ;;  %v2903_v47 = vadd.f32 %v2902_v16, %v7744_v59 }
 0x2b6   :  { %v2976_v13 = vmax.f32 %v2796_v3, 0.0  ;;  %v2799_v58 = vpop.f32.mrb[52].mxu0  ;;  %v2961_v8 = vmax.f32 %v2901_v56, 0.0 }
 0x2b7   :  { %v5146_v27 = vpack.c.bf16 %v2975_v31, %v2959_v26  ;;  %v2906_v39 = vpop.f32.mrb[50].mxu1  ;;  %v2801_v30 = vpop.f32.mrb[53].mxu0  ;;  %v2800_v55 = vadd.f32 %v2799_v58, %v7768_v12  ;;  %v2962_v11 = vmax.f32 %v2903_v47, 0.0 }
 0x2b8   :  { %v2907_v44 = vadd.f32 %v2906_v39, %v7749_v7  ;;  %v5144_v49 = vpack.c.bf16 %v2976_v13, %v2960_v53  ;;  %v2908_v46 = vpop.f32.mrb[51].mxu1  ;;  %v2802_v17 = vadd.f32 %v2801_v30, %v7768_v12 }
 0x2b9   :  { %v2909_v22 = vadd.f32 %v2908_v46, %v7749_v7  ;;  %v2991_v23 = vmax.f32 %v2800_v55, 0.0 }
 0x2ba   :  { %v2977_v43 = vmax.f32 %v2907_v44, 0.0  ;;  %v2805_v14 = vpop.f32.mrb[54].mxu0  ;;  %5145 = vmatprep.subr.bf16.mxu0 %v5144_v49  ;;  %v2992_v40 = vmax.f32 %v2802_v17, 0.0 }
 0x2bb   :  { %v2978_v25 = vmax.f32 %v2909_v22, 0.0  ;;  %v2912_v59 = vpop.f32.mrb[52].mxu1  ;;  %v2806_v45 = vadd.f32 %v2805_v14, %v7775_v61  ;;  %v2807_v10 = vpop.f32.mrb[55].mxu0  ;;  %5147 = vmatpush1.bf16.msra.mxu0 %v5146_v27 }
 0x2bc   :  { %v5162_v62 = vpack.c.bf16 %v2977_v43, %v2961_v8  ;;  %v2914_v37 = vpop.f32.mrb[53].mxu1  ;;  %v2808_v42 = vadd.f32 %v2807_v10, %v7775_v61  ;;  %v2913_v24 = vadd.f32 %v2912_v59, %v7768_v12 }
 0x2bd   :  { %v5160_v7 = vpack.c.bf16 %v2978_v25, %v2962_v11  ;;  %v3007_v32 = vmax.f32 %v2806_v45, 0.0  ;;  %v2915_v34 = vadd.f32 %v2914_v37, %v7768_v12 }
 0x2be   :  { %v3008_v4 = vmax.f32 %v2808_v42, 0.0  ;;  %v2811_v1 = vpop.f32.mrb[56].mxu0  ;;  %v2993_v36 = vmax.f32 %v2913_v24, 0.0 }
 0x2bf   :  { %v5150_v63 = vpack.c.bf16 %v3007_v32, %v2991_v23  ;;  %v2918_v6 = vpop.f32.mrb[54].mxu1  ;;  %5161 = vmatprep.subr.bf16.mxu1 %v5160_v7  ;;  %v2813_v18 = vpop.f32.mrb[57].mxu0  ;;  %v2812_v19 = vadd.f32 %v2811_v1, %v7792_v54  ;;  %v2994_v12 = vmax.f32 %v2915_v34, 0.0 }
 0x2c0   :  { %v2919_v60 = vadd.f32 %v2918_v6, %v7775_v61  ;;  %v5148_v57 = vpack.c.bf16 %v3008_v4, %v2992_v40  ;;  %v2920_v5 = vpop.f32.mrb[55].mxu1  ;;  %5163 = vmatpush1.bf16.msra.mxu1 %v5162_v62  ;;  %v2814_v2 = vadd.f32 %v2813_v18, %v7792_v54 }
 0x2c1   :  { %v2921_v28 = vadd.f32 %v2920_v5, %v7775_v61  ;;  %v3023_v31 = vmax.f32 %v2812_v19, 0.0 }
 0x2c2   :  { %v3009_v9 = vmax.f32 %v2919_v60, 0.0  ;;  %v2817_v15 = vpop.f32.mrb[58].mxu0  ;;  %5149 = vmatprep.subr.bf16.mxu0 %v5148_v57  ;;  %v3024_v13 = vmax.f32 %v2814_v2, 0.0  ;;  %v8010_v60 = vpop.permute.xlu1 %3090 }
 0x2c3   :  { %v3010_v52 = vmax.f32 %v2921_v28, 0.0  ;;  %v2924_v35 = vpop.f32.mrb[56].mxu1  ;;  %v2818_v20 = vadd.f32 %v2817_v15, %v7799_v21  ;;  %v2819_v51 = vpop.f32.mrb[59].mxu0  ;;  %5151 = vmatpush1.bf16.msra.mxu0 %v5150_v63 }
 0x2c4   :  { %v5166_v16 = vpack.c.bf16 %v3009_v9, %v2993_v36  ;;  %v2926_v3 = vpop.f32.mrb[57].mxu1  ;;  %v2820_v26 = vadd.f32 %v2819_v51, %v7799_v21  ;;  %v2925_v53 = vadd.f32 %v2924_v35, %v7792_v54 }
 0x2c5   :  { %v5164_v61 = vpack.c.bf16 %v3010_v52, %v2994_v12  ;;  %v3039_v56 = vmax.f32 %v2818_v20, 0.0  ;;  %v2927_v27 = vadd.f32 %v2926_v3, %v7792_v54 }
 0x2c6   :  { %v3040_v58 = vmax.f32 %v2820_v26, 0.0  ;;  %v2823_v47 = vpop.f32.mrb[60].mxu0  ;;  %v3025_v43 = vmax.f32 %v2925_v53, 0.0  ;;  %v8017_v15 = vpop.permute.xlu1 %3100 }
 0x2c7   :  { %v5154_v39 = vpack.c.bf16 %v3039_v56, %v3023_v31  ;;  %v2930_v30 = vpop.f32.mrb[58].mxu1  ;;  %5165 = vmatprep.subr.bf16.mxu1 %v5164_v61  ;;  %v2825_v44 = vpop.f32.mrb[61].mxu0  ;;  %v2824_v8 = vadd.f32 %v2823_v47, %v7811_v29  ;;  %v3026_v54 = vmax.f32 %v2927_v27, 0.0 }
 0x2c8   :  { %v2931_v49 = vadd.f32 %v2930_v30, %v7799_v21  ;;  %v5152_v46 = vpack.c.bf16 %v3040_v58, %v3024_v13  ;;  %v2932_v22 = vpop.f32.mrb[59].mxu1  ;;  %5167 = vmatpush1.bf16.msra.mxu1 %v5166_v16  ;;  %v2826_v14 = vadd.f32 %v2825_v44, %v7811_v29 }
 0x2c9   :  { %v2933_v55 = vadd.f32 %v2932_v22, %v7799_v21  ;;  %v3055_v7 = vmax.f32 %v2824_v8, 0.0 }
 0x2ca   :  { %v3041_v17 = vmax.f32 %v2931_v49, 0.0  ;;  %v2829_v11 = vpop.f32.mrb[62].mxu0  ;;  %5153 = vmatprep.subr.bf16.mxu0 %v5152_v46  ;;  %v3056_v24 = vmax.f32 %v2826_v14, 0.0  ;;  %v8027_v12 = vpop.permute.xlu1 %3896 }
 0x2cb   :  { %v3042_v25 = vmax.f32 %v2933_v55, 0.0  ;;  %v2936_v59 = vpop.f32.mrb[60].mxu1  ;;  %v2830_v45 = vadd.f32 %v2829_v11, %v7814_v38  ;;  %v2831_v10 = vpop.f32.mrb[63].mxu0  ;;  %5155 = vmatpush1.bf16.msra.mxu0 %v5154_v39 }
 0x2cc   :  { %v5170_v62 = vpack.c.bf16 %v3041_v17, %v3025_v43  ;;  %v2938_v37 = vpop.f32.mrb[61].mxu1  ;;  %v2832_v42 = vadd.f32 %v2831_v10, %v7814_v38  ;;  %v2937_v32 = vadd.f32 %v2936_v59, %v7811_v29 }
 0x2cd   :  { %v5168_v21 = vpack.c.bf16 %v3042_v25, %v3026_v54  ;;  %v3071_v23 = vmax.f32 %v2830_v45, 0.0  ;;  %v2939_v4 = vadd.f32 %v2938_v37, %v7811_v29  ;;  %v8013_v29 = vpop.permute.xlu0 %3085 }
 0x2ce   :  { %v3072_v40 = vmax.f32 %v2832_v42, 0.0  ;;  %v3057_v5 = vmax.f32 %v2937_v32, 0.0  ;;  %v8038_v35 = vpop.permute.xlu1 %3900 }
 0x2cf   :  { %v5158_v1 = vpack.c.bf16 %v3071_v23, %v3055_v7  ;;  %v2942_v34 = vpop.f32.mrb[62].mxu1  ;;  %5169 = vmatprep.subr.bf16.mxu1 %v5168_v21  ;;  %v3058_v19 = vmax.f32 %v2939_v4, 0.0 }
 0x2d0   :  { %v2943_v63 = vadd.f32 %v2942_v34, %v7814_v38  ;;  %v5156_v6 = vpack.c.bf16 %v3072_v40, %v3056_v24  ;;  %v2944_v18 = vpop.f32.mrb[63].mxu1  ;;  %5171 = vmatpush1.bf16.msra.mxu1 %v5170_v62 }
 0x2d1   :  { %v2945_v57 = vadd.f32 %v2944_v18, %v7814_v38  ;;  %v8022_v38 = vpop.permute.xlu0 %3095 }
 0x2d2   :  { %v3073_v28 = vmax.f32 %v2943_v63, 0.0  ;;  %5157 = vmatprep.subr.bf16.mxu0 %v5156_v6 }
 0x2d3   :  { %v3074_v36 = vmax.f32 %v2945_v57, 0.0  ;;  %5159 = vmatpush1.bf16.msra.mxu0 %v5158_v1 }
 0x2d4   :  { %v5174_v9 = vpack.c.bf16 %v3073_v28, %v3057_v5 }
 0x2d5   :  { %v5172_v2 = vpack.c.bf16 %v3074_v36, %v3058_v19  ;;  %v8035_v52 = vpop.permute.xlu0 %3892 }
 0x2d6   :  { %4912 = vmatmul.mubr.msk.f32.vlgmr.msra.gmra.mrb[88].mxu0 %vm2018_vm0, %v7826_v41 }
 0x2d7   :  { %5173 = vmatprep.subr.bf16.mxu1 %v5172_v2  ;;  %3719 = vmatprep.mubr.f32.mxu0 %v9876_v0 }
 0x2d8   :  { %5175 = vmatpush1.bf16.msra.mxu1 %v5174_v9 }
 0x2d9   :  { %v8051_v56 = vpop.permute.xlu0 %3904 }
 0x2da   :  { %4913 = vmatmul.mubr.msk.f32.gmra.mrb[90].mxu0 %vm2018_vm0, %v7840_v33 }
 0x2db   :  { %4916 = vmatmul.mubr.msk.f32.vlgmr.msra.gmra.mrb[88].mxu1 %vm2018_vm0, %v7826_v41  ;;  %3725 = vmatprep.mubr.f32.mxu0 %v9876_v0 }
 0x2dc   :  { %3808 = vmatprep.mubr.f32.mxu1 %v9876_v0 }
 0x2dd   :  { %v8066_v46 = vpop.permute.xlu0 %3976 }
 0x2de   :  { %4914 = vmatmul.mubr.msk.f32.gmra.mrb[92].mxu0 %vm2018_vm0, %v7857_v48 }
 0x2df   :  { %4917 = vmatmul.mubr.msk.f32.gmra.mrb[90].mxu1 %vm2018_vm0, %v7840_v33  ;;  %3731 = vmatprep.mubr.f32.mxu0 %v9876_v0 }
 0x2e0   :  { %3814 = vmatprep.mubr.f32.mxu1 %v9876_v0  ;;  %v3181_v41 = vpop.f32.mrb[64].mxu0 }
 0x2e1   :  { %v3182_v20 = vadd.f32 %v3181_v41, %v8013_v29  ;;  %v8043_v51 = vpop.f32.mrb[64].mxu1  ;;  %v3183_v16 = vpop.f32.mrb[65].mxu0 }
 0x2e2   :  { %4915 = vmatmul.mubr.msk.f32.gmra.mrb[94].mxu0 %vm2018_vm0, %v7871_v50  ;;  %v3184_v33 = vadd.f32 %v3183_v16, %v8013_v29  ;;  %v8048_v3 = vpop.f32.mrb[65].mxu1 }
 0x2e3   :  { %4918 = vmatmul.mubr.msk.f32.gmra.mrb[92].mxu1 %vm2018_vm0, %v7857_v48  ;;  %v3827_v26 = vmax.f32 %v3182_v20, 0.0  ;;  %v8059_v48 = vpop.permute.xlu1 %3972 }
 0x2e4   :  { %3820 = vmatprep.mubr.f32.mxu1 %v9876_v0  ;;  %v3828_v61 = vmax.f32 %v3184_v33, 0.0  ;;  %v3187_v31 = vpop.f32.mrb[66].mxu0 }
 0x2e5   :  { %v3188_v53 = vadd.f32 %v3187_v31, %v8010_v60  ;;  %v8054_v13 = vpop.f32.mrb[66].mxu1  ;;  %v3189_v58 = vpop.f32.mrb[67].mxu0  ;;  %v3907_v47 = vmul.f32 %v8035_v52, %v3827_v26 }
 0x2e6   :  { %v3190_v27 = vadd.f32 %v3189_v58, %v8010_v60  ;;  %v8062_v0 = vpop.f32.mrb[67].mxu1  ;;  %v3908_v39 = vmul.f32 %v8035_v52, %v3828_v61 }
 0x2e7   :  { %4919 = vmatmul.mubr.msk.f32.gmra.mrb[94].mxu1 %vm2018_vm0, %v7871_v50  ;;  %v3843_v30 = vmax.f32 %v3188_v53, 0.0  ;;  %v3987_v44 = vadd.f32 %v8059_v48, %v3907_v47  ;;  %v8075_v10 = vpop.permute.xlu1 %3980 }
 0x2e8   :  { %v3844_v49 = vmax.f32 %v3190_v27, 0.0  ;;  %v3988_v22 = vadd.f32 %v8059_v48, %v3908_v39 }
 0x2e9   :  { %v3923_v55 = vmul.f32 %v8027_v12, %v3843_v30  ;;  %v3193_v8 = vpop.f32.mrb[68].mxu0  ;;  %v3282_v50 = vpop.f32.mrb[68].mxu1  ;;  %4051 = vxpose.xlu0.b32.start [1/4] (short) %v3987_v44, 128  ;;  %v3271_v30 = vadd.f32 %v8043_v51, %v8013_v29  ;;  %v3273_v44 = vadd.f32 %v8048_v3, %v8013_v29 }
 0x2ea   :  { %v3924_v43 = vmul.f32 %v8027_v12, %v3844_v49  ;;  %v3194_v17 = vadd.f32 %v3193_v8, %v8022_v38  ;;  %v3195_v14 = vpop.f32.mrb[69].mxu0  ;;  %v3284_v11 = vpop.f32.mrb[69].mxu1  ;;  %4083 = vxpose.xlu1.b32.start [1/4] (short) %v3988_v22, 128  ;;  %v3277_v22 = vadd.f32 %v8054_v13, %v8010_v60  ;;  %v3279_v8 = vadd.f32 %v8062_v0, %v8010_v60 }
 0x2eb   :  { %v3196_v54 = vadd.f32 %v3195_v14, %v8022_v38  ;;  %v4003_v25 = vadd.f32 %v8066_v46, %v3923_v55  ;;  %v8084_v18 = vpop.permute.xlu1 %3984  ;;  %v3829_v49 = vmax.f32 %v3271_v30, 0.0  ;;  %v3830_v55 = vmax.f32 %v3273_v44, 0.0 }
 0x2ec   :  { %v3859_v59 = vmax.f32 %v3194_v17, 0.0  ;;  %v4004_v45 = vadd.f32 %v8066_v46, %v3924_v43  ;;  %v3845_v43 = vmax.f32 %v3277_v22, 0.0  ;;  %v3283_v17 = vadd.f32 %v3282_v50, %v8022_v38 }
 0x2ed   :  { %v3860_v62 = vmax.f32 %v3196_v54, 0.0  ;;  %v3199_v37 = vpop.f32.mrb[70].mxu0  ;;  %4052 = vxpose.xlu0.b32.cont [2/4] (short) %v4003_v25, 128  ;;  %v3909_v14 = vmul.f32 %v8035_v52, %v3829_v49  ;;  %v3846_v54 = vmax.f32 %v3279_v8, 0.0  ;;  %v3285_v25 = vadd.f32 %v3284_v11, %v8022_v38 }
 0x2ee   :  { %v3939_v42 = vmul.f32 %v8038_v35, %v3859_v59  ;;  %v3200_v21 = vadd.f32 %v3199_v37, %v8017_v15  ;;  %v3201_v23 = vpop.f32.mrb[71].mxu0  ;;  %4084 = vxpose.xlu1.b32.cont [2/4] (short) %v4004_v45, 128  ;;  %v3910_v51 = vmul.f32 %v8035_v52, %v3830_v55  ;;  %v3925_v3 = vmul.f32 %v8027_v12, %v3845_v43 }
 0x2ef   :  { %v3288_v7 = vpop.f32.mrb[70].mxu1  ;;  %v3940_v32 = vmul.f32 %v8038_v35, %v3860_v62  ;;  %v3202_v24 = vadd.f32 %v3201_v23, %v8017_v15  ;;  %v3861_v59 = vmax.f32 %v3283_v17, 0.0  ;;  %v3989_v13 = vadd.f32 %v8059_v48, %v3909_v14 }
 0x2f0   :  { %v3290_v40 = vpop.f32.mrb[71].mxu1  ;;  %v4019_v4 = vadd.f32 %v8075_v10, %v3939_v42  ;;  %v3875_v1 = vmax.f32 %v3200_v21, 0.0  ;;  %v3289_v45 = vadd.f32 %v3288_v7, %v8017_v15  ;;  %v3926_v62 = vmul.f32 %v8027_v12, %v3846_v54 }
 0x2f1   :  { %v4020_v34 = vadd.f32 %v8075_v10, %v3940_v32  ;;  %v3876_v63 = vmax.f32 %v3202_v24, 0.0  ;;  %v3862_v0 = vmax.f32 %v3285_v25, 0.0  ;;  %v3291_v37 = vadd.f32 %v3290_v40, %v8017_v15 }
 0x2f2   :  { %v3955_v6 = vmul.f32 %v8051_v56, %v3875_v1  ;;  %4053 = vxpose.xlu0.b32.cont [3/4] (short) %v4019_v4, 128  ;;  %v3990_v50 = vadd.f32 %v8059_v48, %v3910_v51  ;;  %v3941_v11 = vmul.f32 %v8038_v35, %v3861_v59  ;;  %v3877_v42 = vmax.f32 %v3289_v45, 0.0 }
 0x2f3   :  { %v3956_v57 = vmul.f32 %v8051_v56, %v3876_v63  ;;  %4085 = vxpose.xlu1.b32.cont [3/4] (short) %v4020_v34, 128  ;;  %v4005_v21 = vadd.f32 %v8066_v46, %v3925_v3  ;;  %v3942_v23 = vmul.f32 %v8038_v35, %v3862_v0  ;;  %v3878_v32 = vmax.f32 %v3291_v37, 0.0 }
 0x2f4   :  { %v4035_v5 = vadd.f32 %v8084_v18, %v3955_v6  ;;  %v4006_v7 = vadd.f32 %v8066_v46, %v3926_v62  ;;  %v4021_v24 = vadd.f32 %v8075_v10, %v3941_v11  ;;  %v3957_v40 = vmul.f32 %v8051_v56, %v3877_v42 }
 0x2f5   :  { %v4036_v28 = vadd.f32 %v8084_v18, %v3956_v57  ;;  %v4022_v4 = vadd.f32 %v8075_v10, %v3942_v23  ;;  %v3958_v1 = vmul.f32 %v8051_v56, %v3878_v32 }
 0x2f6   :  { %4054 = vxpose.xlu0.b32.end [4/4] (short) %v4035_v5, 128  ;;  %v4037_v34 = vadd.f32 %v8084_v18, %v3957_v40 }
 0x2f7   :  { %4086 = vxpose.xlu1.b32.end [4/4] (short) %v4036_v28, 128  ;;  %v4038_v63 = vadd.f32 %v8084_v18, %v3958_v1 }
 0x305   :  { %v3359_v19 = vpop.f32.mrb[72].mxu0 }
 0x306   :  { %v3361_v36 = vpop.f32.mrb[73].mxu0  ;;  %v3360_v6 = vadd.f32 %v3359_v19, %v8013_v29 }
 0x307   :  { %v3362_v57 = vadd.f32 %v3361_v36, %v8013_v29 }
 0x308   :  { %v3831_v5 = vmax.f32 %v3360_v6, 0.0 }
 0x309   :  { %v3365_v9 = vpop.f32.mrb[74].mxu0  ;;  %v3832_v44 = vmax.f32 %v3362_v57, 0.0 }
 0x30a   :  { %v3367_v2 = vpop.f32.mrb[75].mxu0  ;;  %v3366_v28 = vadd.f32 %v3365_v9, %v8010_v60  ;;  %v3911_v43 = vmul.f32 %v8035_v52, %v3831_v5 }
 0x30b   :  { %v3368_v49 = vadd.f32 %v3367_v2, %v8010_v60  ;;  %v3912_v9 = vmul.f32 %v8035_v52, %v3832_v44 }
 0x30c   :  { %v8089_v41 = vpop.f32.mrb[72].mxu1  ;;  %v3847_v17 = vmax.f32 %v3366_v28, 0.0  ;;  %v3991_v3 = vadd.f32 %v8059_v48, %v3911_v43 }
 0x30d   :  { %v8091_v20 = vpop.f32.mrb[73].mxu1  ;;  %v3371_v16 = vpop.f32.mrb[76].mxu0  ;;  %v3848_v14 = vmax.f32 %v3368_v49, 0.0  ;;  %v3992_v62 = vadd.f32 %v8059_v48, %v3912_v9 }
 0x30e   :  { %v8093_v33 = vpop.f32.mrb[77].mxu0  ;;  %v3372_v19 = vadd.f32 %v3371_v16, %v8022_v38  ;;  %v3927_v59 = vmul.f32 %v8027_v12, %v3847_v17 }
 0x30f   :  { %v3374_v54 = vadd.f32 %v8093_v33, %v8022_v38  ;;  %v3928_v33 = vmul.f32 %v8027_v12, %v3848_v14 }
 0x310   :  { %v8095_v26 = vpop.f32.mrb[74].mxu1  ;;  %v3863_v45 = vmax.f32 %v3372_v19, 0.0 }
 0x311   :  { %v8097_v61 = vpop.f32.mrb[75].mxu1  ;;  %v8099_v31 = vpop.f32.mrb[78].mxu0  ;;  %v3864_v0 = vmax.f32 %v3374_v54, 0.0 }
 0x312   :  { %v8101_v53 = vpop.f32.mrb[79].mxu0  ;;  %v3378_v16 = vadd.f32 %v8099_v31, %v8017_v15  ;;  %v4007_v31 = vadd.f32 %v8066_v46, %v3927_v59 }
 0x313   :  { %v3380_v37 = vadd.f32 %v8101_v53, %v8017_v15 }
 0x314   :  { %v8103_v58 = vpop.f32.mrb[76].mxu1  ;;  %v3879_v23 = vmax.f32 %v3378_v16, 0.0 }
 0x315   :  { %v8105_v47 = vpop.f32.mrb[77].mxu1  ;;  %v3880_v53 = vmax.f32 %v3380_v37, 0.0 }
 0x317   :  { %v3960_v5 = vmul.f32 %v8051_v56, %v3880_v53 }
 0x318   :  { %v8107_v27 = vpop.f32.mrb[78].mxu1 }
 0x319   :  { %v8109_v39 = vpop.f32.mrb[79].mxu1  ;;  %v4040_v43 = vadd.f32 %v8084_v18, %v3960_v5 }
 0x327   :  { %4115 = vxpose.xlu0.b32.start [1/4] (short) %v3989_v13, 128 }
 0x328   :  { %4147 = vxpose.xlu1.b32.start [1/4] (short) %v3990_v50, 128 }
 0x32b   :  { %4116 = vxpose.xlu0.b32.cont [2/4] (short) %v4005_v21, 128  ;;  %v3943_v21 = vmul.f32 %v8038_v35, %v3863_v45 }
 0x32c   :  { %4148 = vxpose.xlu1.b32.cont [2/4] (short) %v4006_v7, 128  ;;  %v4008_v7 = vadd.f32 %v8066_v46, %v3928_v33 }
 0x32f   :  { %4117 = vxpose.xlu0.b32.cont [3/4] (short) %v4021_v24, 128  ;;  %v3944_v24 = vmul.f32 %v8038_v35, %v3864_v0 }
 0x330   :  { %4149 = vxpose.xlu1.b32.cont [3/4] (short) %v4022_v4, 128 }
 0x331   :  { %v4024_v57 = vadd.f32 %v8075_v10, %v3944_v24 }
 0x333   :  { %4118 = vxpose.xlu0.b32.end [4/4] (short) %v4037_v34, 128  ;;  %v4023_v34 = vadd.f32 %v8075_v10, %v3943_v21 }
 0x334   :  { %4150 = vxpose.xlu1.b32.end [4/4] (short) %v4038_v63, 128  ;;  %v3959_v63 = vmul.f32 %v8051_v56, %v3879_v23 }
 0x336   :  { %v4039_v44 = vadd.f32 %v8084_v18, %v3959_v63  ;;  %v3451_v63 = vadd.f32 %v8091_v20, %v8013_v29  ;;  %v3457_v20 = vadd.f32 %v8097_v61, %v8010_v60 }
 0x35b   :  { %v8142_v30 = vpop.f32.mrb[80].mxu0 }
 0x35c   :  { %v8145_v22 = vpop.f32.mrb[80].mxu1  ;;  %v8147_v55 = vpop.f32.mrb[81].mxu0 }
 0x35d   :  { %v8149_v8 = vpop.f32.mrb[81].mxu1 }
 0x35f   :  { %v8153_v36 = vpop.f32.mrb[82].mxu0 }
 0x360   :  { %v8158_v2 = vpop.f32.mrb[82].mxu1  ;;  %v8160_v25 = vpop.f32.mrb[83].mxu0 }
 0x361   :  { %v8162_v51 = vpop.f32.mrb[83].mxu1 }
 0x363   :  { %v8168_v13 = vpop.f32.mrb[84].mxu0 }
 0x364   :  { %v8174_v50 = vpop.f32.mrb[84].mxu1  ;;  %v8176_v11 = vpop.f32.mrb[85].mxu0  ;;  %4179 = vxpose.xlu0.b32.start [1/4] (short) %v3991_v3, 128 }
 0x365   :  { %v8178_v42 = vpop.f32.mrb[85].mxu1  ;;  %4211 = vxpose.xlu1.b32.start [1/4] (short) %v3992_v62, 128 }
 0x367   :  { %v8182_v32 = vpop.f32.mrb[86].mxu0 }
 0x368   :  { %v8186_v40 = vpop.f32.mrb[86].mxu1  ;;  %v8188_v4 = vpop.f32.mrb[87].mxu0  ;;  %4180 = vxpose.xlu0.b32.cont [2/4] (short) %v4007_v31, 128 }
 0x369   :  { %v8190_v1 = vpop.f32.mrb[87].mxu1  ;;  %4212 = vxpose.xlu1.b32.cont [2/4] (short) %v4008_v7, 128 }
 0x36a   :  { %v4067_v6 = vpop.trf.xlu0 }
 0x36b   :  { %4564 = vst.msk [vmem:[%s9421_s7] sm:$0xff] %vm4563_vm1, %v4067_v6  ;;  %v4099_v28 = vpop.trf.xlu1 }
 0x36c   :  { %4580 = vst.msk [vmem:[%s9421_s7 + $0x80] sm:$0xff] %vm4563_vm1, %v4099_v28  ;;  %4181 = vxpose.xlu0.b32.cont [3/4] (short) %v4023_v34, 128  ;;  %v3449_v34 = vadd.f32 %v8089_v41, %v8013_v29  ;;  %v3455_v28 = vadd.f32 %v8095_v26, %v8010_v60  ;;  %v3834_v41 = vmax.f32 %v3451_v63, 0.0  ;;  %v3461_v26 = vadd.f32 %v8103_v58, %v8022_v38 }
 0x36d   :  { %4213 = vxpose.xlu1.b32.cont [3/4] (short) %v4024_v57, 128 }
 0x36e   :  { %v4068_v49 = vpop.trf.xlu0  ;;  %v3833_v5 = vmax.f32 %v3449_v34, 0.0  ;;  %v3914_v61 = vmul.f32 %v8035_v52, %v3834_v41 }
 0x36f   :  { %4565 = vst.msk [vmem:[%s9421_s7 + $0x8] sm:$0xff] %vm4563_vm1, %v4068_v49  ;;  %v4100_v17 = vpop.trf.xlu1 }
 0x370   :  { %4581 = vst.msk [vmem:[%s9421_s7 + $0x88] sm:$0xff] %vm4563_vm1, %v4100_v17  ;;  %4182 = vxpose.xlu0.b32.end [4/4] (short) %v4039_v44, 128  ;;  %v3849_v17 = vmax.f32 %v3455_v28, 0.0 }
 0x371   :  { %4214 = vxpose.xlu1.b32.end [4/4] (short) %v4040_v43, 128  ;;  %v3913_v43 = vmul.f32 %v8035_v52, %v3833_v5 }
 0x372   :  { %v4069_v19 = vpop.trf.xlu0 }
 0x373   :  { %4566 = vst.msk [vmem:[%s9421_s7 + $0x10] sm:$0xff] %vm4563_vm1, %v4069_v19  ;;  %v4101_v9 = vpop.trf.xlu1  ;;  %v3850_v19 = vmax.f32 %v3457_v20, 0.0  ;;  %v3993_v58 = vadd.f32 %v8059_v48, %v3913_v43 }
 0x374   :  { %4582 = vst.msk [vmem:[%s9421_s7 + $0x90] sm:$0xff] %vm4563_vm1, %v4101_v9  ;;  %v3463_v9 = vadd.f32 %v8105_v47, %v8022_v38  ;;  %v3994_v47 = vadd.f32 %v8059_v48, %v3914_v61 }
 0x376   :  { %v4070_v14 = vpop.trf.xlu0 }
 0x377   :  { %4567 = vst.msk [vmem:[%s9421_s7 + $0x18] sm:$0xff] %vm4563_vm1, %v4070_v14  ;;  %v4102_v54 = vpop.trf.xlu1 }
 0x378   :  { %4583 = vst.msk [vmem:[%s9421_s7 + $0x98] sm:$0xff] %vm4563_vm1, %v4102_v54 }
 0x37a   :  { %v4071_v3 = vpop.trf.xlu0 }
 0x37b   :  { %4568 = vst.msk [vmem:[%s9421_s7 + $0x20] sm:$0xff] %vm4563_vm1, %v4071_v3  ;;  %v4103_v59 = vpop.trf.xlu1  ;;  %v3929_v3 = vmul.f32 %v8027_v12, %v3849_v17 }
 0x37c   :  { %4584 = vst.msk [vmem:[%s9421_s7 + $0xa0] sm:$0xff] %vm4563_vm1, %v4103_v59  ;;  %v3865_v59 = vmax.f32 %v3461_v26, 0.0 }
 0x37e   :  { %v4072_v45 = vpop.trf.xlu0 }
 0x37f   :  { %4569 = vst.msk [vmem:[%s9421_s7 + $0x28] sm:$0xff] %vm4563_vm1, %v4072_v45  ;;  %v4104_v16 = vpop.trf.xlu1  ;;  %v3467_v45 = vadd.f32 %v8107_v27, %v8017_v15 }
 0x380   :  { %4585 = vst.msk [vmem:[%s9421_s7 + $0xa8] sm:$0xff] %vm4563_vm1, %v4104_v16  ;;  %v3930_v16 = vmul.f32 %v8027_v12, %v3850_v19 }
 0x382   :  { %v4073_v62 = vpop.trf.xlu0 }
 0x383   :  { %4570 = vst.msk [vmem:[%s9421_s7 + $0x30] sm:$0xff] %vm4563_vm1, %v4073_v62  ;;  %v4105_v33 = vpop.trf.xlu1  ;;  %v3866_v62 = vmax.f32 %v3463_v9, 0.0 }
 0x384   :  { %4586 = vst.msk [vmem:[%s9421_s7 + $0xb0] sm:$0xff] %vm4563_vm1, %v4105_v33  ;;  %v3469_v33 = vadd.f32 %v8109_v39, %v8017_v15  ;;  %v4010_v39 = vadd.f32 %v8066_v46, %v3930_v16 }
 0x386   :  { %v4074_v0 = vpop.trf.xlu0 }
 0x387   :  { %4571 = vst.msk [vmem:[%s9421_s7 + $0x38] sm:$0xff] %vm4563_vm1, %v4074_v0  ;;  %v4106_v37 = vpop.trf.xlu1 }
 0x388   :  { %4587 = vst.msk [vmem:[%s9421_s7 + $0xb8] sm:$0xff] %vm4563_vm1, %v4106_v37  ;;  %v4009_v37 = vadd.f32 %v8066_v46, %v3929_v3 }
 0x38a   :  { %v4075_v31 = vpop.trf.xlu0 }
 0x38b   :  { %4572 = vst.msk [vmem:[%s9421_s7 + $0x40] sm:$0xff] %vm4563_vm1, %v4075_v31  ;;  %v4107_v21 = vpop.trf.xlu1  ;;  %v3945_v31 = vmul.f32 %v8038_v35, %v3865_v59 }
 0x38c   :  { %4588 = vst.msk [vmem:[%s9421_s7 + $0xc0] sm:$0xff] %vm4563_vm1, %v4107_v21  ;;  %v3881_v21 = vmax.f32 %v3467_v45, 0.0 }
 0x38d   :  { %v4025_v34 = vadd.f32 %v8075_v10, %v3945_v31 }
 0x38e   :  { %v4076_v23 = vpop.trf.xlu0  ;;  %v3961_v63 = vmul.f32 %v8051_v56, %v3881_v21 }
 0x38f   :  { %4573 = vst.msk [vmem:[%s9421_s7 + $0x48] sm:$0xff] %vm4563_vm1, %v4076_v23  ;;  %v4108_v7 = vpop.trf.xlu1  ;;  %v3946_v23 = vmul.f32 %v8038_v35, %v3866_v62 }
 0x390   :  { %4589 = vst.msk [vmem:[%s9421_s7 + $0xc8] sm:$0xff] %vm4563_vm1, %v4108_v7  ;;  %v3882_v7 = vmax.f32 %v3469_v33, 0.0 }
 0x392   :  { %v4077_v24 = vpop.trf.xlu0  ;;  %v3962_v5 = vmul.f32 %v8051_v56, %v3882_v7 }
 0x393   :  { %4574 = vst.msk [vmem:[%s9421_s7 + $0x50] sm:$0xff] %vm4563_vm1, %v4077_v24  ;;  %v4109_v53 = vpop.trf.xlu1 }
 0x394   :  { %4590 = vst.msk [vmem:[%s9421_s7 + $0xd0] sm:$0xff] %vm4563_vm1, %v4109_v53  ;;  %v4042_v43 = vadd.f32 %v8084_v18, %v3962_v5 }
 0x396   :  { %v4078_v6 = vpop.trf.xlu0 }
 0x397   :  { %4575 = vst.msk [vmem:[%s9421_s7 + $0x58] sm:$0xff] %vm4563_vm1, %v4078_v6  ;;  %v4110_v57 = vpop.trf.xlu1 }
 0x398   :  { %4591 = vst.msk [vmem:[%s9421_s7 + $0xd8] sm:$0xff] %vm4563_vm1, %v4110_v57  ;;  %v4026_v57 = vadd.f32 %v8075_v10, %v3946_v23 }
 0x39a   :  { %v4079_v44 = vpop.trf.xlu0 }
 0x39b   :  { %4576 = vst.msk [vmem:[%s9421_s7 + $0x60] sm:$0xff] %vm4563_vm1, %v4079_v44  ;;  %v4111_v49 = vpop.trf.xlu1  ;;  %v4041_v44 = vadd.f32 %v8084_v18, %v3961_v63 }
 0x39c   :  { %4592 = vst.msk [vmem:[%s9421_s7 + $0xe0] sm:$0xff] %vm4563_vm1, %v4111_v49 }
 0x39e   :  { %v4080_v14 = vpop.trf.xlu0 }
 0x39f   :  { %4577 = vst.msk [vmem:[%s9421_s7 + $0x68] sm:$0xff] %vm4563_vm1, %v4080_v14  ;;  %v4112_v54 = vpop.trf.xlu1 }
 0x3a0   :  { %4593 = vst.msk [vmem:[%s9421_s7 + $0xe8] sm:$0xff] %vm4563_vm1, %v4112_v54 }
 0x3a2   :  { %v4081_v0 = vpop.trf.xlu0  ;;  %4243 = vxpose.xlu0.b32.start [1/4] (short) %v3993_v58, 128 }
 0x3a3   :  { %4578 = vst.msk [vmem:[%s9421_s7 + $0x70] sm:$0xff] %vm4563_vm1, %v4081_v0  ;;  %v4113_v27 = vpop.trf.xlu1  ;;  %4275 = vxpose.xlu1.b32.start [1/4] (short) %v3994_v47, 128 }
 0x3a4   :  { %4594 = vst.msk [vmem:[%s9421_s7 + $0xf0] sm:$0xff] %vm4563_vm1, %v4113_v27 }
 0x3a6   :  { %4244 = vxpose.xlu0.b32.cont [2/4] (short) %v4009_v37, 128  ;;  %v4082_v24 = vpop.trf.xlu0 }
 0x3a7   :  { %4579 = vst.msk [vmem:[%s9421_s7 + $0x78] sm:$0xff] %vm4563_vm1, %v4082_v24  ;;  %4276 = vxpose.xlu1.b32.cont [2/4] (short) %v4010_v39, 128  ;;  %v4114_v53 = vpop.trf.xlu1 }
 0x3a8   :  { %4595 = vst.msk [vmem:[%s9421_s7 + $0xf8] sm:$0xff] %vm4563_vm1, %v4114_v53 }
 0x3a9   :  { %v8350_v6 = vpop.f32.mrb[88].mxu0 }
 0x3aa   :  { %v8358_v28 = vpop.f32.mrb[89].mxu0  ;;  %4245 = vxpose.xlu0.b32.cont [3/4] (short) %v4025_v34, 128  ;;  %v4131_v41 = vpop.trf.xlu0 }
 0x3ab   :  { %4596 = vst.msk [vmem:[%s9421_s7 + $0x100] sm:$0xff] %vm4563_vm1, %v4131_v41  ;;  %4277 = vxpose.xlu1.b32.cont [3/4] (short) %v4026_v57, 128  ;;  %v4163_v20 = vpop.trf.xlu1 }
 0x3ac   :  { %4612 = vst.msk [vmem:[%s9421_s7 + $0x180] sm:$0xff] %vm4563_vm1, %v4163_v20 }
 0x3ad   :  { %v8365_v49 = vpop.f32.mrb[90].mxu0 }
 0x3ae   :  { %v8372_v17 = vpop.f32.mrb[88].mxu1  ;;  %v8374_v26 = vpop.f32.mrb[91].mxu0  ;;  %4246 = vxpose.xlu0.b32.end [4/4] (short) %v4041_v44, 128 }
 0x3af   :  { %v8376_v61 = vpop.f32.mrb[89].mxu1  ;;  %v4132_v19 = vpop.trf.xlu0  ;;  %4278 = vxpose.xlu1.b32.end [4/4] (short) %v4042_v43, 128 }
 0x3b0   :  { %4597 = vst.msk [vmem:[%s9421_s7 + $0x108] sm:$0xff] %vm4563_vm1, %v4132_v19  ;;  %v4164_v9 = vpop.trf.xlu1  ;;  %v3538_v19 = vadd.f32 %v8142_v30, %v8013_v29 }
 0x3b1   :  { %v8382_v14 = vpop.f32.mrb[92].mxu0  ;;  %4613 = vst.msk [vmem:[%s9421_s7 + $0x188] sm:$0xff] %vm4563_vm1, %v4164_v9  ;;  %v3540_v9 = vadd.f32 %v8147_v55, %v8013_v29  ;;  %v3546_v55 = vadd.f32 %v8160_v25, %v8010_v60 }
 0x3b2   :  { %v8388_v54 = vpop.f32.mrb[90].mxu1  ;;  %v8390_v58 = vpop.f32.mrb[93].mxu0 }
 0x3b3   :  { %v8392_v3 = vpop.f32.mrb[91].mxu1  ;;  %v4133_v59 = vpop.trf.xlu0  ;;  %v3836_v30 = vmax.f32 %v3540_v9, 0.0 }
 0x3b4   :  { %4598 = vst.msk [vmem:[%s9421_s7 + $0x110] sm:$0xff] %vm4563_vm1, %v4133_v59  ;;  %v4165_v45 = vpop.trf.xlu1 }
 0x3b5   :  { %v8398_v47 = vpop.f32.mrb[94].mxu0  ;;  %4614 = vst.msk [vmem:[%s9421_s7 + $0x190] sm:$0xff] %vm4563_vm1, %v4165_v45  ;;  %v3916_v25 = vmul.f32 %v8035_v52, %v3836_v30 }
 0x3b6   :  { %v8404_v16 = vpop.f32.mrb[92].mxu1  ;;  %v8406_v62 = vpop.f32.mrb[95].mxu0 }
 0x3b7   :  { %v8408_v33 = vpop.f32.mrb[93].mxu1  ;;  %v4134_v0 = vpop.trf.xlu0 }
 0x3b8   :  { %4599 = vst.msk [vmem:[%s9421_s7 + $0x118] sm:$0xff] %vm4563_vm1, %v4134_v0  ;;  %v4166_v27 = vpop.trf.xlu1  ;;  %v3835_v0 = vmax.f32 %v3538_v19, 0.0 }
 0x3b9   :  { %4615 = vst.msk [vmem:[%s9421_s7 + $0x198] sm:$0xff] %vm4563_vm1, %v4166_v27  ;;  %v3544_v27 = vadd.f32 %v8153_v36, %v8010_v60  ;;  %v3550_v36 = vadd.f32 %v8168_v13, %v8022_v38 }
 0x3ba   :  { %v8418_v37 = vpop.f32.mrb[94].mxu1 }
 0x3bb   :  { %v8420_v31 = vpop.f32.mrb[95].mxu1  ;;  %v4135_v21 = vpop.trf.xlu0 }
 0x3bc   :  { %4600 = vst.msk [vmem:[%s9421_s7 + $0x120] sm:$0xff] %vm4563_vm1, %v4135_v21  ;;  %v4167_v39 = vpop.trf.xlu1 }
 0x3bd   :  { %4616 = vst.msk [vmem:[%s9421_s7 + $0x1a0] sm:$0xff] %vm4563_vm1, %v4167_v39 }
 0x3bf   :  { %v4136_v23 = vpop.trf.xlu0 }
 0x3c0   :  { %4601 = vst.msk [vmem:[%s9421_s7 + $0x128] sm:$0xff] %vm4563_vm1, %v4136_v23  ;;  %v4168_v7 = vpop.trf.xlu1  ;;  %v3915_v23 = vmul.f32 %v8035_v52, %v3835_v0 }
 0x3c1   :  { %4617 = vst.msk [vmem:[%s9421_s7 + $0x1a8] sm:$0xff] %vm4563_vm1, %v4168_v7  ;;  %v3851_v7 = vmax.f32 %v3544_v27, 0.0 }
 0x3c2   :  { %v3995_v13 = vadd.f32 %v8059_v48, %v3915_v23 }
 0x3c3   :  { %v4137_v24 = vpop.trf.xlu0 }
 0x3c4   :  { %4602 = vst.msk [vmem:[%s9421_s7 + $0x130] sm:$0xff] %vm4563_vm1, %v4137_v24  ;;  %v4169_v53 = vpop.trf.xlu1  ;;  %v3852_v24 = vmax.f32 %v3546_v55, 0.0 }
 0x3c5   :  { %4618 = vst.msk [vmem:[%s9421_s7 + $0x1b0] sm:$0xff] %vm4563_vm1, %v4169_v53  ;;  %v3552_v53 = vadd.f32 %v8176_v11, %v8022_v38  ;;  %v3996_v11 = vadd.f32 %v8059_v48, %v3916_v25 }
 0x3c7   :  { %v4138_v34 = vpop.trf.xlu0 }
 0x3c8   :  { %4603 = vst.msk [vmem:[%s9421_s7 + $0x138] sm:$0xff] %vm4563_vm1, %v4138_v34  ;;  %v4170_v63 = vpop.trf.xlu1 }
 0x3c9   :  { %4619 = vst.msk [vmem:[%s9421_s7 + $0x1b8] sm:$0xff] %vm4563_vm1, %v4170_v63 }
 0x3cb   :  { %v4139_v57 = vpop.trf.xlu0 }
 0x3cc   :  { %4604 = vst.msk [vmem:[%s9421_s7 + $0x140] sm:$0xff] %vm4563_vm1, %v4139_v57  ;;  %v4171_v5 = vpop.trf.xlu1  ;;  %v3931_v57 = vmul.f32 %v8027_v12, %v3851_v7 }
 0x3cd   :  { %4620 = vst.msk [vmem:[%s9421_s7 + $0x1c0] sm:$0xff] %vm4563_vm1, %v4171_v5  ;;  %v3867_v5 = vmax.f32 %v3550_v36, 0.0 }
 0x3ce   :  { %v4011_v9 = vadd.f32 %v8066_v46, %v3931_v57 }
 0x3cf   :  { %v4140_v41 = vpop.trf.xlu0 }
 0x3d0   :  { %4605 = vst.msk [vmem:[%s9421_s7 + $0x148] sm:$0xff] %vm4563_vm1, %v4140_v41  ;;  %v4172_v20 = vpop.trf.xlu1  ;;  %v3556_v41 = vadd.f32 %v8182_v32, %v8017_v15 }
 0x3d1   :  { %4621 = vst.msk [vmem:[%s9421_s7 + $0x1c8] sm:$0xff] %vm4563_vm1, %v4172_v20  ;;  %v3932_v20 = vmul.f32 %v8027_v12, %v3852_v24 }
 0x3d3   :  { %v4141_v44 = vpop.trf.xlu0 }
 0x3d4   :  { %4606 = vst.msk [vmem:[%s9421_s7 + $0x150] sm:$0xff] %vm4563_vm1, %v4141_v44  ;;  %v4173_v43 = vpop.trf.xlu1  ;;  %v3868_v44 = vmax.f32 %v3552_v53, 0.0 }
 0x3d5   :  { %4622 = vst.msk [vmem:[%s9421_s7 + $0x1d0] sm:$0xff] %vm4563_vm1, %v4173_v43  ;;  %v3558_v43 = vadd.f32 %v8188_v4, %v8017_v15  ;;  %v4012_v4 = vadd.f32 %v8066_v46, %v3932_v20 }
 0x3d6   :  { %v3948_v0 = vmul.f32 %v8038_v35, %v3868_v44 }
 0x3d7   :  { %v4142_v59 = vpop.trf.xlu0  ;;  %v3884_v27 = vmax.f32 %v3558_v43, 0.0 }
 0x3d8   :  { %4607 = vst.msk [vmem:[%s9421_s7 + $0x158] sm:$0xff] %vm4563_vm1, %v4142_v59  ;;  %v4174_v45 = vpop.trf.xlu1  ;;  %v3947_v59 = vmul.f32 %v8038_v35, %v3867_v5  ;;  %v4028_v23 = vadd.f32 %v8075_v10, %v3948_v0 }
 0x3d9   :  { %4623 = vst.msk [vmem:[%s9421_s7 + $0x1d8] sm:$0xff] %vm4563_vm1, %v4174_v45  ;;  %v3883_v45 = vmax.f32 %v3556_v41, 0.0  ;;  %v3964_v7 = vmul.f32 %v8051_v56, %v3884_v27 }
 0x3db   :  { %v4143_v21 = vpop.trf.xlu0  ;;  %v4044_v53 = vadd.f32 %v8084_v18, %v3964_v7 }
 0x3dc   :  { %4608 = vst.msk [vmem:[%s9421_s7 + $0x160] sm:$0xff] %vm4563_vm1, %v4143_v21  ;;  %v4175_v39 = vpop.trf.xlu1  ;;  %v4027_v21 = vadd.f32 %v8075_v10, %v3947_v59 }
 0x3dd   :  { %4624 = vst.msk [vmem:[%s9421_s7 + $0x1e0] sm:$0xff] %vm4563_vm1, %v4175_v39  ;;  %v3963_v39 = vmul.f32 %v8051_v56, %v3883_v45 }
 0x3df   :  { %v4144_v34 = vpop.trf.xlu0  ;;  %v4043_v24 = vadd.f32 %v8084_v18, %v3963_v39  ;;  %v3629_v39 = vadd.f32 %v8149_v8, %v8013_v29  ;;  %v3635_v8 = vadd.f32 %v8162_v51, %v8010_v60 }
 0x3e0   :  { %4609 = vst.msk [vmem:[%s9421_s7 + $0x168] sm:$0xff] %vm4563_vm1, %v4144_v34  ;;  %v4176_v63 = vpop.trf.xlu1 }
 0x3e1   :  { %4625 = vst.msk [vmem:[%s9421_s7 + $0x1e8] sm:$0xff] %vm4563_vm1, %v4176_v63 }
 0x3e3   :  { %v4145_v19 = vpop.trf.xlu0  ;;  %4307 = vxpose.xlu0.b32.start [1/4] (short) %v3995_v13, 128 }
 0x3e4   :  { %4610 = vst.msk [vmem:[%s9421_s7 + $0x170] sm:$0xff] %vm4563_vm1, %v4145_v19  ;;  %v4177_v32 = vpop.trf.xlu1  ;;  %4339 = vxpose.xlu1.b32.start [1/4] (short) %v3996_v11, 128 }
 0x3e5   :  { %4626 = vst.msk [vmem:[%s9421_s7 + $0x1f0] sm:$0xff] %vm4563_vm1, %v4177_v32 }
 0x3e7   :  { %4308 = vxpose.xlu0.b32.cont [2/4] (short) %v4011_v9, 128  ;;  %v4146_v30 = vpop.trf.xlu0 }
 0x3e8   :  { %4611 = vst.msk [vmem:[%s9421_s7 + $0x178] sm:$0xff] %vm4563_vm1, %v4146_v30  ;;  %4340 = vxpose.xlu1.b32.cont [2/4] (short) %v4012_v4, 128  ;;  %v4178_v55 = vpop.trf.xlu1 }
 0x3e9   :  { %4627 = vst.msk [vmem:[%s9421_s7 + $0x1f8] sm:$0xff] %vm4563_vm1, %v4178_v55 }
 0x3eb   :  { %4309 = vxpose.xlu0.b32.cont [3/4] (short) %v4027_v21, 128  ;;  %v4195_v36 = vpop.trf.xlu0  ;;  %v3627_v21 = vadd.f32 %v8145_v22, %v8013_v29  ;;  %v3838_v22 = vmax.f32 %v3629_v39, 0.0 }
 0x3ec   :  { %4628 = vst.msk [vmem:[%s9421_s7 + $0x200] sm:$0xff] %vm4563_vm1, %v4195_v36  ;;  %4341 = vxpose.xlu1.b32.cont [3/4] (short) %v4028_v23, 128  ;;  %v4227_v25 = vpop.trf.xlu1 }
 0x3ed   :  { %4644 = vst.msk [vmem:[%s9421_s7 + $0x280] sm:$0xff] %vm4563_vm1, %v4227_v25  ;;  %v3837_v36 = vmax.f32 %v3627_v21, 0.0  ;;  %v3633_v25 = vadd.f32 %v8158_v2, %v8010_v60  ;;  %v3639_v2 = vadd.f32 %v8174_v50, %v8022_v38  ;;  %v3918_v51 = vmul.f32 %v8035_v52, %v3838_v22 }
 0x3ef   :  { %4310 = vxpose.xlu0.b32.end [4/4] (short) %v4043_v24, 128  ;;  %v4196_v34 = vpop.trf.xlu0 }
 0x3f0   :  { %4629 = vst.msk [vmem:[%s9421_s7 + $0x208] sm:$0xff] %vm4563_vm1, %v4196_v34  ;;  %4342 = vxpose.xlu1.b32.end [4/4] (short) %v4044_v53, 128  ;;  %v4228_v63 = vpop.trf.xlu1  ;;  %v3917_v34 = vmul.f32 %v8035_v52, %v3837_v36 }
 0x3f1   :  { %4645 = vst.msk [vmem:[%s9421_s7 + $0x288] sm:$0xff] %vm4563_vm1, %v4228_v63  ;;  %v3853_v63 = vmax.f32 %v3633_v25, 0.0 }
 0x3f2   :  { %v3997_v50 = vadd.f32 %v8059_v48, %v3917_v34 }
 0x3f3   :  { %v4197_v13 = vpop.trf.xlu0 }
 0x3f4   :  { %4630 = vst.msk [vmem:[%s9421_s7 + $0x210] sm:$0xff] %vm4563_vm1, %v4197_v13  ;;  %v4229_v57 = vpop.trf.xlu1  ;;  %v3854_v13 = vmax.f32 %v3635_v8, 0.0 }
 0x3f5   :  { %4646 = vst.msk [vmem:[%s9421_s7 + $0x290] sm:$0xff] %vm4563_vm1, %v4229_v57  ;;  %v3641_v57 = vadd.f32 %v8178_v42, %v8022_v38  ;;  %v3998_v42 = vadd.f32 %v8059_v48, %v3918_v51 }
 0x3f7   :  { %v4198_v5 = vpop.trf.xlu0 }
 0x3f8   :  { %4631 = vst.msk [vmem:[%s9421_s7 + $0x218] sm:$0xff] %vm4563_vm1, %v4198_v5  ;;  %v4230_v41 = vpop.trf.xlu1 }
 0x3f9   :  { %4647 = vst.msk [vmem:[%s9421_s7 + $0x298] sm:$0xff] %vm4563_vm1, %v4230_v41 }
 0x3fb   :  { %v4199_v11 = vpop.trf.xlu0 }
 0x3fc   :  { %4632 = vst.msk [vmem:[%s9421_s7 + $0x220] sm:$0xff] %vm4563_vm1, %v4199_v11  ;;  %v4231_v20 = vpop.trf.xlu1  ;;  %v3933_v11 = vmul.f32 %v8027_v12, %v3853_v63 }
 0x3fd   :  { %4648 = vst.msk [vmem:[%s9421_s7 + $0x2a0] sm:$0xff] %vm4563_vm1, %v4231_v20  ;;  %v3869_v20 = vmax.f32 %v3639_v2, 0.0 }
 0x3ff   :  { %v4200_v44 = vpop.trf.xlu0 }
 0x400   :  { %4633 = vst.msk [vmem:[%s9421_s7 + $0x228] sm:$0xff] %vm4563_vm1, %v4200_v44  ;;  %v4232_v43 = vpop.trf.xlu1  ;;  %v3645_v44 = vadd.f32 %v8186_v40, %v8017_v15 }
 0x401   :  { %4649 = vst.msk [vmem:[%s9421_s7 + $0x2a8] sm:$0xff] %vm4563_vm1, %v4232_v43  ;;  %v3934_v43 = vmul.f32 %v8027_v12, %v3854_v13 }
 0x403   :  { %v4201_v19 = vpop.trf.xlu0 }
 0x404   :  { %4634 = vst.msk [vmem:[%s9421_s7 + $0x230] sm:$0xff] %vm4563_vm1, %v4201_v19  ;;  %v4233_v32 = vpop.trf.xlu1  ;;  %v3870_v19 = vmax.f32 %v3641_v57, 0.0 }
 0x405   :  { %4650 = vst.msk [vmem:[%s9421_s7 + $0x2b0] sm:$0xff] %vm4563_vm1, %v4233_v32  ;;  %v3647_v32 = vadd.f32 %v8190_v1, %v8017_v15  ;;  %v4014_v1 = vadd.f32 %v8066_v46, %v3934_v43 }
 0x407   :  { %v4202_v9 = vpop.trf.xlu0 }
 0x408   :  { %4635 = vst.msk [vmem:[%s9421_s7 + $0x238] sm:$0xff] %vm4563_vm1, %v4202_v9  ;;  %v4234_v59 = vpop.trf.xlu1 }
 0x409   :  { %4651 = vst.msk [vmem:[%s9421_s7 + $0x2b8] sm:$0xff] %vm4563_vm1, %v4234_v59  ;;  %v4013_v59 = vadd.f32 %v8066_v46, %v3933_v11 }
 0x40b   :  { %v4203_v45 = vpop.trf.xlu0 }
 0x40c   :  { %4636 = vst.msk [vmem:[%s9421_s7 + $0x240] sm:$0xff] %vm4563_vm1, %v4203_v45  ;;  %v4235_v4 = vpop.trf.xlu1  ;;  %v3949_v45 = vmul.f32 %v8038_v35, %v3869_v20 }
 0x40d   :  { %4652 = vst.msk [vmem:[%s9421_s7 + $0x2c0] sm:$0xff] %vm4563_vm1, %v4235_v4  ;;  %v3885_v4 = vmax.f32 %v3645_v44, 0.0 }
 0x40e   :  { %v4029_v21 = vadd.f32 %v8075_v10, %v3949_v45  ;;  %v3718_v45 = vadd.f32 %v8358_v28, %v8013_v29  ;;  %v3724_v28 = vadd.f32 %v8374_v26, %v8010_v60 }
 0x40f   :  { %v4204_v0 = vpop.trf.xlu0  ;;  %v3965_v39 = vmul.f32 %v8051_v56, %v3885_v4 }
 0x410   :  { %4637 = vst.msk [vmem:[%s9421_s7 + $0x248] sm:$0xff] %vm4563_vm1, %v4204_v0  ;;  %v4236_v27 = vpop.trf.xlu1  ;;  %v3950_v0 = vmul.f32 %v8038_v35, %v3870_v19 }
 0x411   :  { %4653 = vst.msk [vmem:[%s9421_s7 + $0x2c8] sm:$0xff] %vm4563_vm1, %v4236_v27  ;;  %v3886_v27 = vmax.f32 %v3647_v32, 0.0  ;;  %v4045_v22 = vadd.f32 %v8084_v18, %v3965_v39 }
 0x413   :  { %v4205_v30 = vpop.trf.xlu0 }
 0x414   :  { %4638 = vst.msk [vmem:[%s9421_s7 + $0x250] sm:$0xff] %vm4563_vm1, %v4205_v30  ;;  %v4237_v55 = vpop.trf.xlu1 }
 0x415   :  { %4654 = vst.msk [vmem:[%s9421_s7 + $0x2d0] sm:$0xff] %vm4563_vm1, %v4237_v55 }
 0x417   :  { %v4206_v23 = vpop.trf.xlu0 }
 0x418   :  { %4639 = vst.msk [vmem:[%s9421_s7 + $0x258] sm:$0xff] %vm4563_vm1, %v4206_v23  ;;  %v4238_v7 = vpop.trf.xlu1  ;;  %v4030_v23 = vadd.f32 %v8075_v10, %v3950_v0 }
 0x419   :  { %4655 = vst.msk [vmem:[%s9421_s7 + $0x2d8] sm:$0xff] %vm4563_vm1, %v4238_v7  ;;  %v3966_v7 = vmul.f32 %v8051_v56, %v3886_v27  ;;  %v3722_v27 = vadd.f32 %v8365_v49, %v8010_v60  ;;  %v3728_v49 = vadd.f32 %v8382_v14, %v8022_v38 }
 0x41b   :  { %v4207_v24 = vpop.trf.xlu0  ;;  %v4046_v8 = vadd.f32 %v8084_v18, %v3966_v7  ;;  %v3855_v39 = vmax.f32 %v3722_v27, 0.0  ;;  %v3730_v7 = vadd.f32 %v8390_v58, %v8022_v38 }
 0x41c   :  { %4640 = vst.msk [vmem:[%s9421_s7 + $0x260] sm:$0xff] %vm4563_vm1, %v4207_v24  ;;  %v4239_v53 = vpop.trf.xlu1 }
 0x41d   :  { %4656 = vst.msk [vmem:[%s9421_s7 + $0x2e0] sm:$0xff] %vm4563_vm1, %v4239_v53 }
 0x41f   :  { %v4208_v5 = vpop.trf.xlu0 }
 0x420   :  { %4641 = vst.msk [vmem:[%s9421_s7 + $0x268] sm:$0xff] %vm4563_vm1, %v4208_v5  ;;  %v4240_v41 = vpop.trf.xlu1 }
 0x421   :  { %4657 = vst.msk [vmem:[%s9421_s7 + $0x2e8] sm:$0xff] %vm4563_vm1, %v4240_v41 }
 0x423   :  { %v4209_v9 = vpop.trf.xlu0  ;;  %4371 = vxpose.xlu0.b32.start [1/4] (short) %v3997_v50, 128 }
 0x424   :  { %4642 = vst.msk [vmem:[%s9421_s7 + $0x270] sm:$0xff] %vm4563_vm1, %v4209_v9  ;;  %v4241_v40 = vpop.trf.xlu1  ;;  %4403 = vxpose.xlu1.b32.start [1/4] (short) %v3998_v42, 128 }
 0x425   :  { %4658 = vst.msk [vmem:[%s9421_s7 + $0x2f0] sm:$0xff] %vm4563_vm1, %v4241_v40 }
 0x427   :  { %4372 = vxpose.xlu0.b32.cont [2/4] (short) %v4013_v59, 128  ;;  %v4210_v30 = vpop.trf.xlu0  ;;  %v3716_v59 = vadd.f32 %v8350_v6, %v8013_v29  ;;  %v3840_v6 = vmax.f32 %v3718_v45, 0.0 }
 0x428   :  { %4643 = vst.msk [vmem:[%s9421_s7 + $0x278] sm:$0xff] %vm4563_vm1, %v4210_v30  ;;  %4404 = vxpose.xlu1.b32.cont [2/4] (short) %v4014_v1, 128  ;;  %v4242_v55 = vpop.trf.xlu1 }
 0x429   :  { %4659 = vst.msk [vmem:[%s9421_s7 + $0x2f8] sm:$0xff] %vm4563_vm1, %v4242_v55  ;;  %v3839_v0 = vmax.f32 %v3716_v59, 0.0  ;;  %v3920_v26 = vmul.f32 %v8035_v52, %v3840_v6 }
 0x42b   :  { %4373 = vxpose.xlu0.b32.cont [3/4] (short) %v4029_v21, 128  ;;  %v4259_v36 = vpop.trf.xlu0  ;;  %v3919_v21 = vmul.f32 %v8035_v52, %v3839_v0  ;;  %v4000_v58 = vadd.f32 %v8059_v48, %v3920_v26 }
 0x42c   :  { %4660 = vst.msk [vmem:[%s9421_s7 + $0x300] sm:$0xff] %vm4563_vm1, %v4259_v36  ;;  %4405 = vxpose.xlu1.b32.cont [3/4] (short) %v4030_v23, 128  ;;  %v4291_v25 = vpop.trf.xlu1  ;;  %v3856_v23 = vmax.f32 %v3724_v28, 0.0 }
 0x42d   :  { %4676 = vst.msk [vmem:[%s9421_s7 + $0x380] sm:$0xff] %vm4563_vm1, %v4291_v25  ;;  %v3999_v14 = vadd.f32 %v8059_v48, %v3919_v21 }
 0x42f   :  { %4374 = vxpose.xlu0.b32.end [4/4] (short) %v4045_v22, 128  ;;  %v4260_v24 = vpop.trf.xlu0  ;;  %v3935_v22 = vmul.f32 %v8027_v12, %v3855_v39 }
 0x430   :  { %4661 = vst.msk [vmem:[%s9421_s7 + $0x308] sm:$0xff] %vm4563_vm1, %v4260_v24  ;;  %4406 = vxpose.xlu1.b32.end [4/4] (short) %v4046_v8, 128  ;;  %v4292_v53 = vpop.trf.xlu1  ;;  %v3871_v8 = vmax.f32 %v3728_v49, 0.0  ;;  %v3734_v24 = vadd.f32 %v8398_v47, %v8017_v15 }
 0x431   :  { %4677 = vst.msk [vmem:[%s9421_s7 + $0x388] sm:$0xff] %vm4563_vm1, %v4292_v53  ;;  %v3936_v53 = vmul.f32 %v8027_v12, %v3856_v23 }
 0x433   :  { %v4261_v34 = vpop.trf.xlu0 }
 0x434   :  { %4662 = vst.msk [vmem:[%s9421_s7 + $0x310] sm:$0xff] %vm4563_vm1, %v4261_v34  ;;  %v4293_v63 = vpop.trf.xlu1  ;;  %v3872_v34 = vmax.f32 %v3730_v7, 0.0 }
 0x435   :  { %4678 = vst.msk [vmem:[%s9421_s7 + $0x390] sm:$0xff] %vm4563_vm1, %v4293_v63  ;;  %v3736_v63 = vadd.f32 %v8406_v62, %v8017_v15  ;;  %v4016_v62 = vadd.f32 %v8066_v46, %v3936_v53 }
 0x437   :  { %v4262_v2 = vpop.trf.xlu0 }
 0x438   :  { %4663 = vst.msk [vmem:[%s9421_s7 + $0x318] sm:$0xff] %vm4563_vm1, %v4262_v2  ;;  %v4294_v51 = vpop.trf.xlu1 }
 0x439   :  { %4679 = vst.msk [vmem:[%s9421_s7 + $0x398] sm:$0xff] %vm4563_vm1, %v4294_v51  ;;  %v4015_v51 = vadd.f32 %v8066_v46, %v3935_v22 }
 0x43b   :  { %v4263_v13 = vpop.trf.xlu0 }
 0x43c   :  { %4664 = vst.msk [vmem:[%s9421_s7 + $0x320] sm:$0xff] %vm4563_vm1, %v4263_v13  ;;  %v4295_v57 = vpop.trf.xlu1  ;;  %v3951_v13 = vmul.f32 %v8038_v35, %v3871_v8  ;;  %v3805_v8 = vadd.f32 %v8372_v17, %v8013_v29 }
 0x43d   :  { %4680 = vst.msk [vmem:[%s9421_s7 + $0x3a0] sm:$0xff] %vm4563_vm1, %v4295_v57  ;;  %v3887_v57 = vmax.f32 %v3734_v24, 0.0  ;;  %v3807_v24 = vadd.f32 %v8376_v61, %v8013_v29  ;;  %v3813_v29 = vadd.f32 %v8392_v3, %v8010_v60 }
 0x43f   :  { %v4264_v5 = vpop.trf.xlu0  ;;  %v3842_v17 = vmax.f32 %v3807_v24, 0.0  ;;  %v3858_v3 = vmax.f32 %v3813_v29, 0.0 }
 0x440   :  { %4665 = vst.msk [vmem:[%s9421_s7 + $0x328] sm:$0xff] %vm4563_vm1, %v4264_v5  ;;  %v4296_v41 = vpop.trf.xlu1  ;;  %v3952_v5 = vmul.f32 %v8038_v35, %v3872_v34  ;;  %v3841_v34 = vmax.f32 %v3805_v8, 0.0 }
 0x441   :  { %4681 = vst.msk [vmem:[%s9421_s7 + $0x3a8] sm:$0xff] %vm4563_vm1, %v4296_v41  ;;  %v3888_v41 = vmax.f32 %v3736_v63, 0.0  ;;  %v3811_v63 = vadd.f32 %v8388_v54, %v8010_v60  ;;  %v3817_v54 = vadd.f32 %v8404_v16, %v8022_v38  ;;  %v3922_v60 = vmul.f32 %v8035_v52, %v3842_v17 }
 0x443   :  { %v4265_v50 = vpop.trf.xlu0 }
 0x444   :  { %4666 = vst.msk [vmem:[%s9421_s7 + $0x330] sm:$0xff] %vm4563_vm1, %v4265_v50  ;;  %v4297_v11 = vpop.trf.xlu1 }
 0x445   :  { %4682 = vst.msk [vmem:[%s9421_s7 + $0x3b0] sm:$0xff] %vm4563_vm1, %v4297_v11 }
 0x447   :  { %v4266_v20 = vpop.trf.xlu0 }
 0x448   :  { %4667 = vst.msk [vmem:[%s9421_s7 + $0x338] sm:$0xff] %vm4563_vm1, %v4266_v20  ;;  %v4298_v44 = vpop.trf.xlu1  ;;  %v4031_v20 = vadd.f32 %v8075_v10, %v3951_v13  ;;  %v3819_v13 = vadd.f32 %v8408_v33, %v8022_v38  ;;  %v4002_v38 = vadd.f32 %v8059_v48, %v3922_v60 }
 0x449   :  { %4683 = vst.msk [vmem:[%s9421_s7 + $0x3b8] sm:$0xff] %vm4563_vm1, %v4298_v44  ;;  %v3967_v44 = vmul.f32 %v8051_v56, %v3887_v57 }
 0x44a   :  { %v3874_v33 = vmax.f32 %v3819_v13, 0.0 }
 0x44b   :  { %v4267_v42 = vpop.trf.xlu0 }
 0x44c   :  { %4668 = vst.msk [vmem:[%s9421_s7 + $0x340] sm:$0xff] %vm4563_vm1, %v4267_v42  ;;  %v4299_v43 = vpop.trf.xlu1  ;;  %v4032_v42 = vadd.f32 %v8075_v10, %v3952_v5 }
 0x44d   :  { %4684 = vst.msk [vmem:[%s9421_s7 + $0x3c0] sm:$0xff] %vm4563_vm1, %v4299_v43  ;;  %v3968_v43 = vmul.f32 %v8051_v56, %v3888_v41  ;;  %v3873_v41 = vmax.f32 %v3817_v54, 0.0 }
 0x44f   :  { %v4268_v19 = vpop.trf.xlu0 }
 0x450   :  { %4669 = vst.msk [vmem:[%s9421_s7 + $0x348] sm:$0xff] %vm4563_vm1, %v4268_v19  ;;  %v4300_v32 = vpop.trf.xlu1 }
 0x451   :  { %4685 = vst.msk [vmem:[%s9421_s7 + $0x3c8] sm:$0xff] %vm4563_vm1, %v4300_v32 }
 0x453   :  { %v4269_v9 = vpop.trf.xlu0 }
 0x454   :  { %4670 = vst.msk [vmem:[%s9421_s7 + $0x350] sm:$0xff] %vm4563_vm1, %v4269_v9  ;;  %v4301_v40 = vpop.trf.xlu1  ;;  %v4047_v9 = vadd.f32 %v8084_v18, %v3967_v44 }
 0x455   :  { %4686 = vst.msk [vmem:[%s9421_s7 + $0x3d0] sm:$0xff] %vm4563_vm1, %v4301_v40  ;;  %v4048_v40 = vadd.f32 %v8084_v18, %v3968_v43 }
 0x457   :  { %v4270_v4 = vpop.trf.xlu0 }
 0x458   :  { %4671 = vst.msk [vmem:[%s9421_s7 + $0x358] sm:$0xff] %vm4563_vm1, %v4270_v4  ;;  %v4302_v1 = vpop.trf.xlu1 }
 0x459   :  { %4687 = vst.msk [vmem:[%s9421_s7 + $0x3d8] sm:$0xff] %vm4563_vm1, %v4302_v1 }
 0x45b   :  { %v4271_v30 = vpop.trf.xlu0 }
 0x45c   :  { %4672 = vst.msk [vmem:[%s9421_s7 + $0x360] sm:$0xff] %vm4563_vm1, %v4271_v30  ;;  %v4303_v55 = vpop.trf.xlu1 }
 0x45d   :  { %4688 = vst.msk [vmem:[%s9421_s7 + $0x3e0] sm:$0xff] %vm4563_vm1, %v4303_v55 }
 0x45f   :  { %v4272_v36 = vpop.trf.xlu0 }
 0x460   :  { %4673 = vst.msk [vmem:[%s9421_s7 + $0x368] sm:$0xff] %vm4563_vm1, %v4272_v36  ;;  %v4304_v25 = vpop.trf.xlu1 }
 0x461   :  { %4689 = vst.msk [vmem:[%s9421_s7 + $0x3e8] sm:$0xff] %vm4563_vm1, %v4304_v25 }
 0x463   :  { %v4273_v2 = vpop.trf.xlu0  ;;  %4435 = vxpose.xlu0.b32.start [1/4] (short) %v3999_v14, 128 }
 0x464   :  { %4674 = vst.msk [vmem:[%s9421_s7 + $0x370] sm:$0xff] %vm4563_vm1, %v4273_v2  ;;  %v4305_v47 = vpop.trf.xlu1  ;;  %4467 = vxpose.xlu1.b32.start [1/4] (short) %v4000_v58, 128 }
 0x465   :  { %4690 = vst.msk [vmem:[%s9421_s7 + $0x3f0] sm:$0xff] %vm4563_vm1, %v4305_v47  ;;  %v3921_v47 = vmul.f32 %v8035_v52, %v3841_v34  ;;  %v3938_v52 = vmul.f32 %v8027_v12, %v3858_v3 }
 0x467   :  { %4436 = vxpose.xlu0.b32.cont [2/4] (short) %v4015_v51, 128  ;;  %v4274_v50 = vpop.trf.xlu0  ;;  %v3857_v51 = vmax.f32 %v3811_v63, 0.0  ;;  %v4001_v16 = vadd.f32 %v8059_v48, %v3921_v47 }
 0x468   :  { %4675 = vst.msk [vmem:[%s9421_s7 + $0x378] sm:$0xff] %vm4563_vm1, %v4274_v50  ;;  %4468 = vxpose.xlu1.b32.cont [2/4] (short) %v4016_v62, 128  ;;  %v4306_v11 = vpop.trf.xlu1  ;;  %v3823_v50 = vadd.f32 %v8418_v37, %v8017_v15 }
 0x469   :  { %4691 = vst.msk [vmem:[%s9421_s7 + $0x3f8] sm:$0xff] %vm4563_vm1, %v4306_v11  ;;  %v3937_v5 = vmul.f32 %v8027_v12, %v3857_v51  ;;  %v3825_v11 = vadd.f32 %v8420_v31, %v8017_v15  ;;  %v4018_v15 = vadd.f32 %v8066_v46, %v3938_v52  ;;  %v3954_v12 = vmul.f32 %v8038_v35, %v3874_v33 }
 0x46a   :  { %v3889_v48 = vmax.f32 %v3823_v50, 0.0 }
 0x46b   :  { %4437 = vxpose.xlu0.b32.cont [3/4] (short) %v4031_v20, 128  ;;  %v4323_v19 = vpop.trf.xlu0  ;;  %v4017_v44 = vadd.f32 %v8066_v46, %v3937_v5  ;;  %v3890_v31 = vmax.f32 %v3825_v11, 0.0 }
 0x46c   :  { %4692 = vst.msk [vmem:[%s9421_s7 + $0x400] sm:$0xff] %vm4563_vm1, %v4323_v19  ;;  %4469 = vxpose.xlu1.b32.cont [3/4] (short) %v4032_v42, 128  ;;  %v4355_v32 = vpop.trf.xlu1  ;;  %v3953_v42 = vmul.f32 %v8038_v35, %v3873_v41  ;;  %v4034_v35 = vadd.f32 %v8075_v10, %v3954_v12 }
 0x46d   :  { %4708 = vst.msk [vmem:[%s9421_s7 + $0x480] sm:$0xff] %vm4563_vm1, %v4355_v32  ;;  %v3970_v46 = vmul.f32 %v8051_v56, %v3890_v31 }
 0x46e   :  { %v4033_v32 = vadd.f32 %v8075_v10, %v3953_v42 }
 0x46f   :  { %4438 = vxpose.xlu0.b32.end [4/4] (short) %v4047_v9, 128  ;;  %v4324_v59 = vpop.trf.xlu0  ;;  %v3969_v9 = vmul.f32 %v8051_v56, %v3889_v48  ;;  %v4050_v10 = vadd.f32 %v8084_v18, %v3970_v46 }
 0x470   :  { %4693 = vst.msk [vmem:[%s9421_s7 + $0x408] sm:$0xff] %vm4563_vm1, %v4324_v59  ;;  %4470 = vxpose.xlu1.b32.end [4/4] (short) %v4048_v40, 128  ;;  %v4356_v45 = vpop.trf.xlu1 }
 0x471   :  { %4709 = vst.msk [vmem:[%s9421_s7 + $0x488] sm:$0xff] %vm4563_vm1, %v4356_v45  ;;  %v4049_v45 = vadd.f32 %v8084_v18, %v3969_v9 }
 0x473   :  { %v4325_v4 = vpop.trf.xlu0 }
 0x474   :  { %4694 = vst.msk [vmem:[%s9421_s7 + $0x410] sm:$0xff] %vm4563_vm1, %v4325_v4  ;;  %v4357_v1 = vpop.trf.xlu1 }
 0x475   :  { %4710 = vst.msk [vmem:[%s9421_s7 + $0x490] sm:$0xff] %vm4563_vm1, %v4357_v1 }
 0x477   :  { %v4326_v0 = vpop.trf.xlu0 }
 0x478   :  { %4695 = vst.msk [vmem:[%s9421_s7 + $0x418] sm:$0xff] %vm4563_vm1, %v4326_v0  ;;  %v4358_v27 = vpop.trf.xlu1 }
 0x479   :  { %4711 = vst.msk [vmem:[%s9421_s7 + $0x498] sm:$0xff] %vm4563_vm1, %v4358_v27 }
 0x47b   :  { %v4327_v6 = vpop.trf.xlu0 }
 0x47c   :  { %4696 = vst.msk [vmem:[%s9421_s7 + $0x420] sm:$0xff] %vm4563_vm1, %v4327_v6  ;;  %v4359_v28 = vpop.trf.xlu1 }
 0x47d   :  { %4712 = vst.msk [vmem:[%s9421_s7 + $0x4a0] sm:$0xff] %vm4563_vm1, %v4359_v28 }
 0x47f   :  { %v4328_v30 = vpop.trf.xlu0 }
 0x480   :  { %4697 = vst.msk [vmem:[%s9421_s7 + $0x428] sm:$0xff] %vm4563_vm1, %v4328_v30  ;;  %v4360_v55 = vpop.trf.xlu1 }
 0x481   :  { %4713 = vst.msk [vmem:[%s9421_s7 + $0x4a8] sm:$0xff] %vm4563_vm1, %v4360_v55 }
 0x483   :  { %v4329_v21 = vpop.trf.xlu0 }
 0x484   :  { %4698 = vst.msk [vmem:[%s9421_s7 + $0x430] sm:$0xff] %vm4563_vm1, %v4329_v21  ;;  %v4361_v39 = vpop.trf.xlu1 }
 0x485   :  { %4714 = vst.msk [vmem:[%s9421_s7 + $0x4b0] sm:$0xff] %vm4563_vm1, %v4361_v39 }
 0x487   :  { %v4330_v49 = vpop.trf.xlu0 }
 0x488   :  { %4699 = vst.msk [vmem:[%s9421_s7 + $0x438] sm:$0xff] %vm4563_vm1, %v4330_v49  ;;  %v4362_v26 = vpop.trf.xlu1 }
 0x489   :  { %4715 = vst.msk [vmem:[%s9421_s7 + $0x4b8] sm:$0xff] %vm4563_vm1, %v4362_v26 }
 0x48b   :  { %v4331_v23 = vpop.trf.xlu0 }
 0x48c   :  { %4700 = vst.msk [vmem:[%s9421_s7 + $0x440] sm:$0xff] %vm4563_vm1, %v4331_v23  ;;  %v4363_v7 = vpop.trf.xlu1 }
 0x48d   :  { %4716 = vst.msk [vmem:[%s9421_s7 + $0x4c0] sm:$0xff] %vm4563_vm1, %v4363_v7 }
 0x48f   :  { %v4332_v36 = vpop.trf.xlu0 }
 0x490   :  { %4701 = vst.msk [vmem:[%s9421_s7 + $0x448] sm:$0xff] %vm4563_vm1, %v4332_v36  ;;  %v4364_v25 = vpop.trf.xlu1 }
 0x491   :  { %4717 = vst.msk [vmem:[%s9421_s7 + $0x4c8] sm:$0xff] %vm4563_vm1, %v4364_v25 }
 0x493   :  { %v4333_v14 = vpop.trf.xlu0 }
 0x494   :  { %4702 = vst.msk [vmem:[%s9421_s7 + $0x450] sm:$0xff] %vm4563_vm1, %v4333_v14  ;;  %v4365_v22 = vpop.trf.xlu1 }
 0x495   :  { %4718 = vst.msk [vmem:[%s9421_s7 + $0x4d0] sm:$0xff] %vm4563_vm1, %v4365_v22 }
 0x497   :  { %v4334_v58 = vpop.trf.xlu0 }
 0x498   :  { %4703 = vst.msk [vmem:[%s9421_s7 + $0x458] sm:$0xff] %vm4563_vm1, %v4334_v58  ;;  %v4366_v53 = vpop.trf.xlu1 }
 0x499   :  { %4719 = vst.msk [vmem:[%s9421_s7 + $0x4d8] sm:$0xff] %vm4563_vm1, %v4366_v53 }
 0x49b   :  { %v4335_v61 = vpop.trf.xlu0 }
 0x49c   :  { %4704 = vst.msk [vmem:[%s9421_s7 + $0x460] sm:$0xff] %vm4563_vm1, %v4335_v61  ;;  %v4367_v2 = vpop.trf.xlu1 }
 0x49d   :  { %4720 = vst.msk [vmem:[%s9421_s7 + $0x4e0] sm:$0xff] %vm4563_vm1, %v4367_v2 }
 0x49f   :  { %v4336_v57 = vpop.trf.xlu0 }
 0x4a0   :  { %4705 = vst.msk [vmem:[%s9421_s7 + $0x468] sm:$0xff] %vm4563_vm1, %v4336_v57  ;;  %v4368_v62 = vpop.trf.xlu1 }
 0x4a1   :  { %4721 = vst.msk [vmem:[%s9421_s7 + $0x4e8] sm:$0xff] %vm4563_vm1, %v4368_v62 }
 0x4a3   :  { %v4337_v20 = vpop.trf.xlu0  ;;  %4499 = vxpose.xlu0.b32.start [1/4] (short) %v4001_v16, 128 }
 0x4a4   :  { %4706 = vst.msk [vmem:[%s9421_s7 + $0x470] sm:$0xff] %vm4563_vm1, %v4337_v20  ;;  %v4369_v37 = vpop.trf.xlu1  ;;  %4531 = vxpose.xlu1.b32.start [1/4] (short) %v4002_v38, 128 }
 0x4a5   :  { %4722 = vst.msk [vmem:[%s9421_s7 + $0x4f0] sm:$0xff] %vm4563_vm1, %v4369_v37 }
 0x4a7   :  { %4500 = vxpose.xlu0.b32.cont [2/4] (short) %v4017_v44, 128  ;;  %v4338_v43 = vpop.trf.xlu0 }
 0x4a8   :  { %4532 = vxpose.xlu1.b32.cont [2/4] (short) %v4018_v15, 128  ;;  %v4370_v19 = vpop.trf.xlu1  ;;  %4707 = vst.msk [vmem:[%s9421_s7 + $0x478] sm:$0xff] %vm4563_vm1, %v4338_v43 }
 0x4a9   :  { %4723 = vst.msk [vmem:[%s9421_s7 + $0x4f8] sm:$0xff] %vm4563_vm1, %v4370_v19 }
 0x4ab   :  { %4501 = vxpose.xlu0.b32.cont [3/4] (short) %v4033_v32, 128  ;;  %v4387_v40 = vpop.trf.xlu0 }
 0x4ac   :  { %4533 = vxpose.xlu1.b32.cont [3/4] (short) %v4034_v35, 128  ;;  %v4419_v59 = vpop.trf.xlu1  ;;  %4724 = vst.msk [vmem:[%s9421_s7 + $0x500] sm:$0xff] %vm4563_vm1, %v4387_v40 }
 0x4ad   :  { %4740 = vst.msk [vmem:[%s9421_s7 + $0x580] sm:$0xff] %vm4563_vm1, %v4419_v59 }
 0x4af   :  { %4502 = vxpose.xlu0.b32.end [4/4] (short) %v4049_v45, 128  ;;  %v4388_v56 = vpop.trf.xlu0 }
 0x4b0   :  { %4534 = vxpose.xlu1.b32.end [4/4] (short) %v4050_v10, 128  ;;  %v4420_v4 = vpop.trf.xlu1  ;;  %4725 = vst.msk [vmem:[%s9421_s7 + $0x508] sm:$0xff] %vm4563_vm1, %v4388_v56 }
 0x4b1   :  { %4741 = vst.msk [vmem:[%s9421_s7 + $0x588] sm:$0xff] %vm4563_vm1, %v4420_v4 }
 0x4b3   :  { %v4389_v1 = vpop.trf.xlu0 }
 0x4b4   :  { %v4421_v0 = vpop.trf.xlu1  ;;  %4726 = vst.msk [vmem:[%s9421_s7 + $0x510] sm:$0xff] %vm4563_vm1, %v4389_v1 }
 0x4b5   :  { %4742 = vst.msk [vmem:[%s9421_s7 + $0x590] sm:$0xff] %vm4563_vm1, %v4421_v0 }
 0x4b7   :  { %v4390_v18 = vpop.trf.xlu0 }
 0x4b8   :  { %v4422_v27 = vpop.trf.xlu1  ;;  %4727 = vst.msk [vmem:[%s9421_s7 + $0x518] sm:$0xff] %vm4563_vm1, %v4390_v18 }
 0x4b9   :  { %4743 = vst.msk [vmem:[%s9421_s7 + $0x598] sm:$0xff] %vm4563_vm1, %v4422_v27 }
 0x4bb   :  { %v4391_v6 = vpop.trf.xlu0 }
 0x4bc   :  { %v4423_v28 = vpop.trf.xlu1  ;;  %4728 = vst.msk [vmem:[%s9421_s7 + $0x520] sm:$0xff] %vm4563_vm1, %v4391_v6 }
 0x4bd   :  { %4744 = vst.msk [vmem:[%s9421_s7 + $0x5a0] sm:$0xff] %vm4563_vm1, %v4423_v28 }
 0x4bf   :  { %v4392_v30 = vpop.trf.xlu0 }
 0x4c0   :  { %v4424_v55 = vpop.trf.xlu1  ;;  %4729 = vst.msk [vmem:[%s9421_s7 + $0x528] sm:$0xff] %vm4563_vm1, %v4392_v30 }
 0x4c1   :  { %4745 = vst.msk [vmem:[%s9421_s7 + $0x5a8] sm:$0xff] %vm4563_vm1, %v4424_v55 }
 0x4c3   :  { %v4393_v21 = vpop.trf.xlu0 }
 0x4c4   :  { %v4425_v39 = vpop.trf.xlu1  ;;  %4730 = vst.msk [vmem:[%s9421_s7 + $0x530] sm:$0xff] %vm4563_vm1, %v4393_v21 }
 0x4c5   :  { %4746 = vst.msk [vmem:[%s9421_s7 + $0x5b0] sm:$0xff] %vm4563_vm1, %v4425_v39 }
 0x4c7   :  { %v4394_v49 = vpop.trf.xlu0 }
 0x4c8   :  { %v4426_v26 = vpop.trf.xlu1  ;;  %4731 = vst.msk [vmem:[%s9421_s7 + $0x538] sm:$0xff] %vm4563_vm1, %v4394_v49 }
 0x4c9   :  { %4747 = vst.msk [vmem:[%s9421_s7 + $0x5b8] sm:$0xff] %vm4563_vm1, %v4426_v26 }
 0x4cb   :  { %v4395_v23 = vpop.trf.xlu0 }
 0x4cc   :  { %v4427_v7 = vpop.trf.xlu1  ;;  %4732 = vst.msk [vmem:[%s9421_s7 + $0x540] sm:$0xff] %vm4563_vm1, %v4395_v23 }
 0x4cd   :  { %4748 = vst.msk [vmem:[%s9421_s7 + $0x5c0] sm:$0xff] %vm4563_vm1, %v4427_v7 }
 0x4cf   :  { %v4396_v36 = vpop.trf.xlu0 }
 0x4d0   :  { %v4428_v25 = vpop.trf.xlu1  ;;  %4733 = vst.msk [vmem:[%s9421_s7 + $0x548] sm:$0xff] %vm4563_vm1, %v4396_v36 }
 0x4d1   :  { %4749 = vst.msk [vmem:[%s9421_s7 + $0x5c8] sm:$0xff] %vm4563_vm1, %v4428_v25 }
 0x4d3   :  { %v4397_v14 = vpop.trf.xlu0 }
 0x4d4   :  { %v4429_v22 = vpop.trf.xlu1  ;;  %4734 = vst.msk [vmem:[%s9421_s7 + $0x550] sm:$0xff] %vm4563_vm1, %v4397_v14 }
 0x4d5   :  { %4750 = vst.msk [vmem:[%s9421_s7 + $0x5d0] sm:$0xff] %vm4563_vm1, %v4429_v22 }
 0x4d7   :  { %v4398_v8 = vpop.trf.xlu0 }
 0x4d8   :  { %v4430_v24 = vpop.trf.xlu1  ;;  %4735 = vst.msk [vmem:[%s9421_s7 + $0x558] sm:$0xff] %vm4563_vm1, %v4398_v8 }
 0x4d9   :  { %4751 = vst.msk [vmem:[%s9421_s7 + $0x5d8] sm:$0xff] %vm4563_vm1, %v4430_v24 }
 0x4db   :  { %v4399_v58 = vpop.trf.xlu0 }
 0x4dc   :  { %v4431_v53 = vpop.trf.xlu1  ;;  %4736 = vst.msk [vmem:[%s9421_s7 + $0x560] sm:$0xff] %vm4563_vm1, %v4399_v58 }
 0x4dd   :  { %4752 = vst.msk [vmem:[%s9421_s7 + $0x5e0] sm:$0xff] %vm4563_vm1, %v4431_v53 }
 0x4df   :  { %v4400_v34 = vpop.trf.xlu0 }
 0x4e0   :  { %v4432_v63 = vpop.trf.xlu1  ;;  %4737 = vst.msk [vmem:[%s9421_s7 + $0x568] sm:$0xff] %vm4563_vm1, %v4400_v34 }
 0x4e1   :  { %4753 = vst.msk [vmem:[%s9421_s7 + $0x5e8] sm:$0xff] %vm4563_vm1, %v4432_v63 }
 0x4e3   :  { %v4401_v17 = vpop.trf.xlu0 }
 0x4e4   :  { %v4433_v29 = vpop.trf.xlu1  ;;  %4738 = vst.msk [vmem:[%s9421_s7 + $0x570] sm:$0xff] %vm4563_vm1, %v4401_v17 }
 0x4e5   :  { %4754 = vst.msk [vmem:[%s9421_s7 + $0x5f0] sm:$0xff] %vm4563_vm1, %v4433_v29 }
 0x4e7   :  { %v4402_v61 = vpop.trf.xlu0 }
 0x4e8   :  { %v4434_v2 = vpop.trf.xlu1  ;;  %4739 = vst.msk [vmem:[%s9421_s7 + $0x578] sm:$0xff] %vm4563_vm1, %v4402_v61 }
 0x4e9   :  { %4755 = vst.msk [vmem:[%s9421_s7 + $0x5f8] sm:$0xff] %vm4563_vm1, %v4434_v2 }
 0x4eb   :  { %v4451_v47 = vpop.trf.xlu0 }
 0x4ec   :  { %v4483_v51 = vpop.trf.xlu1  ;;  %4756 = vst.msk [vmem:[%s9421_s7 + $0x600] sm:$0xff] %vm4563_vm1, %v4451_v47 }
 0x4ed   :  { %4772 = vst.msk [vmem:[%s9421_s7 + $0x680] sm:$0xff] %vm4563_vm1, %v4483_v51 }
 0x4ef   :  { %v4452_v54 = vpop.trf.xlu0 }
 0x4f0   :  { %v4484_v60 = vpop.trf.xlu1  ;;  %4757 = vst.msk [vmem:[%s9421_s7 + $0x608] sm:$0xff] %vm4563_vm1, %v4452_v54 }
 0x4f1   :  { %4773 = vst.msk [vmem:[%s9421_s7 + $0x688] sm:$0xff] %vm4563_vm1, %v4484_v60 }
 0x4f3   :  { %v4453_v3 = vpop.trf.xlu0 }
 0x4f4   :  { %v4485_v13 = vpop.trf.xlu1  ;;  %4758 = vst.msk [vmem:[%s9421_s7 + $0x610] sm:$0xff] %vm4563_vm1, %v4453_v3 }
 0x4f5   :  { %4774 = vst.msk [vmem:[%s9421_s7 + $0x690] sm:$0xff] %vm4563_vm1, %v4485_v13 }
 0x4f7   :  { %v4454_v57 = vpop.trf.xlu0 }
 0x4f8   :  { %v4486_v62 = vpop.trf.xlu1  ;;  %4759 = vst.msk [vmem:[%s9421_s7 + $0x618] sm:$0xff] %vm4563_vm1, %v4454_v57 }
 0x4f9   :  { %4775 = vst.msk [vmem:[%s9421_s7 + $0x698] sm:$0xff] %vm4563_vm1, %v4486_v62 }
 0x4fb   :  { %v4455_v16 = vpop.trf.xlu0 }
 0x4fc   :  { %v4487_v5 = vpop.trf.xlu1  ;;  %4760 = vst.msk [vmem:[%s9421_s7 + $0x620] sm:$0xff] %vm4563_vm1, %v4455_v16 }
 0x4fd   :  { %4776 = vst.msk [vmem:[%s9421_s7 + $0x6a0] sm:$0xff] %vm4563_vm1, %v4487_v5 }
 0x4ff   :  { %v4456_v41 = vpop.trf.xlu0 }
 0x500   :  { %v4488_v50 = vpop.trf.xlu1  ;;  %4761 = vst.msk [vmem:[%s9421_s7 + $0x628] sm:$0xff] %vm4563_vm1, %v4456_v41 }
 0x501   :  { %4777 = vst.msk [vmem:[%s9421_s7 + $0x6a8] sm:$0xff] %vm4563_vm1, %v4488_v50 }
 0x503   :  { %v4457_v38 = vpop.trf.xlu0 }
 0x504   :  { %v4489_v52 = vpop.trf.xlu1  ;;  %4762 = vst.msk [vmem:[%s9421_s7 + $0x630] sm:$0xff] %vm4563_vm1, %v4457_v38 }
 0x505   :  { %4778 = vst.msk [vmem:[%s9421_s7 + $0x6b0] sm:$0xff] %vm4563_vm1, %v4489_v52 }
 0x507   :  { %v4458_v33 = vpop.trf.xlu0 }
 0x508   :  { %v4490_v11 = vpop.trf.xlu1  ;;  %4763 = vst.msk [vmem:[%s9421_s7 + $0x638] sm:$0xff] %vm4563_vm1, %v4458_v33 }
 0x509   :  { %4779 = vst.msk [vmem:[%s9421_s7 + $0x6b8] sm:$0xff] %vm4563_vm1, %v4490_v11 }
 0x50b   :  { %v4459_v20 = vpop.trf.xlu0 }
 0x50c   :  { %v4491_v37 = vpop.trf.xlu1  ;;  %4764 = vst.msk [vmem:[%s9421_s7 + $0x640] sm:$0xff] %vm4563_vm1, %v4459_v20 }
 0x50d   :  { %4780 = vst.msk [vmem:[%s9421_s7 + $0x6c0] sm:$0xff] %vm4563_vm1, %v4491_v37 }
 0x50f   :  { %v4460_v44 = vpop.trf.xlu0 }
 0x510   :  { %v4492_v42 = vpop.trf.xlu1  ;;  %4765 = vst.msk [vmem:[%s9421_s7 + $0x648] sm:$0xff] %vm4563_vm1, %v4460_v44 }
 0x511   :  { %4781 = vst.msk [vmem:[%s9421_s7 + $0x6c8] sm:$0xff] %vm4563_vm1, %v4492_v42 }
 0x513   :  { %v4461_v48 = vpop.trf.xlu0 }
 0x514   :  { %v4493_v15 = vpop.trf.xlu1  ;;  %4766 = vst.msk [vmem:[%s9421_s7 + $0x650] sm:$0xff] %vm4563_vm1, %v4461_v48 }
 0x515   :  { %4782 = vst.msk [vmem:[%s9421_s7 + $0x6d0] sm:$0xff] %vm4563_vm1, %v4493_v15 }
 0x517   :  { %v4462_v12 = vpop.trf.xlu0 }
 0x518   :  { %v4494_v31 = vpop.trf.xlu1  ;;  %4767 = vst.msk [vmem:[%s9421_s7 + $0x658] sm:$0xff] %vm4563_vm1, %v4462_v12 }
 0x519   :  { %4783 = vst.msk [vmem:[%s9421_s7 + $0x6d8] sm:$0xff] %vm4563_vm1, %v4494_v31 }
 0x51b   :  { %v4463_v43 = vpop.trf.xlu0 }
 0x51c   :  { %v4495_v19 = vpop.trf.xlu1  ;;  %4768 = vst.msk [vmem:[%s9421_s7 + $0x660] sm:$0xff] %vm4563_vm1, %v4463_v43 }
 0x51d   :  { %4784 = vst.msk [vmem:[%s9421_s7 + $0x6e0] sm:$0xff] %vm4563_vm1, %v4495_v19 }
 0x51f   :  { %v4464_v32 = vpop.trf.xlu0 }
 0x520   :  { %v4496_v9 = vpop.trf.xlu1  ;;  %4769 = vst.msk [vmem:[%s9421_s7 + $0x668] sm:$0xff] %vm4563_vm1, %v4464_v32 }
 0x521   :  { %4785 = vst.msk [vmem:[%s9421_s7 + $0x6e8] sm:$0xff] %vm4563_vm1, %v4496_v9 }
 0x523   :  { %v4465_v35 = vpop.trf.xlu0 }
 0x524   :  { %v4497_v46 = vpop.trf.xlu1  ;;  %4770 = vst.msk [vmem:[%s9421_s7 + $0x670] sm:$0xff] %vm4563_vm1, %v4465_v35 }
 0x525   :  { %4786 = vst.msk [vmem:[%s9421_s7 + $0x6f0] sm:$0xff] %vm4563_vm1, %v4497_v46 }
 0x527   :  { %v4466_v40 = vpop.trf.xlu0 }
 0x528   :  { %v4498_v59 = vpop.trf.xlu1  ;;  %4771 = vst.msk [vmem:[%s9421_s7 + $0x678] sm:$0xff] %vm4563_vm1, %v4466_v40 }
 0x529   :  { %4787 = vst.msk [vmem:[%s9421_s7 + $0x6f8] sm:$0xff] %vm4563_vm1, %v4498_v59 }
 0x52b   :  { %v4515_v45 = vpop.trf.xlu0 }
 0x52c   :  { %v4547_v10 = vpop.trf.xlu1  ;;  %4788 = vst.msk [vmem:[%s9421_s7 + $0x700] sm:$0xff] %vm4563_vm1, %v4515_v45 }
 0x52d   :  { %4804 = vst.msk [vmem:[%s9421_s7 + $0x780] sm:$0xff] %vm4563_vm1, %v4547_v10 }
 0x52f   :  { %v4516_v56 = vpop.trf.xlu0 }
 0x530   :  { %v4548_v4 = vpop.trf.xlu1  ;;  %4789 = vst.msk [vmem:[%s9421_s7 + $0x708] sm:$0xff] %vm4563_vm1, %v4516_v56 }
 0x531   :  { %4805 = vst.msk [vmem:[%s9421_s7 + $0x788] sm:$0xff] %vm4563_vm1, %v4548_v4 }
 0x533   :  { %v4517_v1 = vpop.trf.xlu0 }
 0x534   :  { %v4549_v0 = vpop.trf.xlu1  ;;  %4790 = vst.msk [vmem:[%s9421_s7 + $0x710] sm:$0xff] %vm4563_vm1, %v4517_v1 }
 0x535   :  { %4806 = vst.msk [vmem:[%s9421_s7 + $0x790] sm:$0xff] %vm4563_vm1, %v4549_v0 }
 0x537   :  { %v4518_v18 = vpop.trf.xlu0 }
 0x538   :  { %v4550_v27 = vpop.trf.xlu1  ;;  %4791 = vst.msk [vmem:[%s9421_s7 + $0x718] sm:$0xff] %vm4563_vm1, %v4518_v18 }
 0x539   :  { %4807 = vst.msk [vmem:[%s9421_s7 + $0x798] sm:$0xff] %vm4563_vm1, %v4550_v27 }
 0x53b   :  { %v4519_v6 = vpop.trf.xlu0 }
 0x53c   :  { %v4551_v28 = vpop.trf.xlu1  ;;  %4792 = vst.msk [vmem:[%s9421_s7 + $0x720] sm:$0xff] %vm4563_vm1, %v4519_v6 }
 0x53d   :  { %4808 = vst.msk [vmem:[%s9421_s7 + $0x7a0] sm:$0xff] %vm4563_vm1, %v4551_v28 }
 0x53f   :  { %v4520_v30 = vpop.trf.xlu0 }
 0x540   :  { %v4552_v55 = vpop.trf.xlu1  ;;  %4793 = vst.msk [vmem:[%s9421_s7 + $0x728] sm:$0xff] %vm4563_vm1, %v4520_v30 }
 0x541   :  { %4809 = vst.msk [vmem:[%s9421_s7 + $0x7a8] sm:$0xff] %vm4563_vm1, %v4552_v55 }
 0x543   :  { %v4521_v21 = vpop.trf.xlu0 }
 0x544   :  { %v4553_v39 = vpop.trf.xlu1  ;;  %4794 = vst.msk [vmem:[%s9421_s7 + $0x730] sm:$0xff] %vm4563_vm1, %v4521_v21 }
 0x545   :  { %4810 = vst.msk [vmem:[%s9421_s7 + $0x7b0] sm:$0xff] %vm4563_vm1, %v4553_v39 }
 0x547   :  { %v4522_v49 = vpop.trf.xlu0 }
 0x548   :  { %v4554_v26 = vpop.trf.xlu1  ;;  %4795 = vst.msk [vmem:[%s9421_s7 + $0x738] sm:$0xff] %vm4563_vm1, %v4522_v49 }
 0x549   :  { %4811 = vst.msk [vmem:[%s9421_s7 + $0x7b8] sm:$0xff] %vm4563_vm1, %v4554_v26 }
 0x54b   :  { %v4523_v23 = vpop.trf.xlu0 }
 0x54c   :  { %v4555_v7 = vpop.trf.xlu1  ;;  %4796 = vst.msk [vmem:[%s9421_s7 + $0x740] sm:$0xff] %vm4563_vm1, %v4523_v23 }
 0x54d   :  { %4812 = vst.msk [vmem:[%s9421_s7 + $0x7c0] sm:$0xff] %vm4563_vm1, %v4555_v7 }
 0x54f   :  { %v4524_v36 = vpop.trf.xlu0 }
 0x550   :  { %v4556_v25 = vpop.trf.xlu1  ;;  %4797 = vst.msk [vmem:[%s9421_s7 + $0x748] sm:$0xff] %vm4563_vm1, %v4524_v36 }
 0x551   :  { %4813 = vst.msk [vmem:[%s9421_s7 + $0x7c8] sm:$0xff] %vm4563_vm1, %v4556_v25 }
 0x553   :  { %v4525_v14 = vpop.trf.xlu0 }
 0x554   :  { %v4557_v22 = vpop.trf.xlu1  ;;  %4798 = vst.msk [vmem:[%s9421_s7 + $0x750] sm:$0xff] %vm4563_vm1, %v4525_v14 }
 0x555   :  { %4814 = vst.msk [vmem:[%s9421_s7 + $0x7d0] sm:$0xff] %vm4563_vm1, %v4557_v22 }
 0x557   :  { %v4526_v8 = vpop.trf.xlu0 }
 0x558   :  { %v4558_v24 = vpop.trf.xlu1  ;;  %4799 = vst.msk [vmem:[%s9421_s7 + $0x758] sm:$0xff] %vm4563_vm1, %v4526_v8 }
 0x559   :  { %4815 = vst.msk [vmem:[%s9421_s7 + $0x7d8] sm:$0xff] %vm4563_vm1, %v4558_v24 }
 0x55b   :  { %v4527_v58 = vpop.trf.xlu0 }
 0x55c   :  { %v4559_v53 = vpop.trf.xlu1  ;;  %4800 = vst.msk [vmem:[%s9421_s7 + $0x760] sm:$0xff] %vm4563_vm1, %v4527_v58 }
 0x55d   :  { %4816 = vst.msk [vmem:[%s9421_s7 + $0x7e0] sm:$0xff] %vm4563_vm1, %v4559_v53 }
 0x55f   :  { %v4528_v34 = vpop.trf.xlu0 }
 0x560   :  { %v4560_v63 = vpop.trf.xlu1  ;;  %4801 = vst.msk [vmem:[%s9421_s7 + $0x768] sm:$0xff] %vm4563_vm1, %v4528_v34 }
 0x561   :  { %4817 = vst.msk [vmem:[%s9421_s7 + $0x7e8] sm:$0xff] %vm4563_vm1, %v4560_v63 }
 0x563   :  { %v4529_v17 = vpop.trf.xlu0 }
 0x564   :  { %v4561_v29 = vpop.trf.xlu1  ;;  %4802 = vst.msk [vmem:[%s9421_s7 + $0x770] sm:$0xff] %vm4563_vm1, %v4529_v17 }
 0x565   :  { %4818 = vst.msk [vmem:[%s9421_s7 + $0x7f0] sm:$0xff] %vm4563_vm1, %v4561_v29 }
 0x567   :  { %v4530_v61 = vpop.trf.xlu0 }
 0x568   :  { %v4562_v2 = vpop.trf.xlu1  ;;  %4803 = vst.msk [vmem:[%s9421_s7 + $0x778] sm:$0xff] %vm4563_vm1, %v4530_v61 }
 0x569   :  { %4819 = vst.msk [vmem:[%s9421_s7 + $0x7f8] sm:$0xff] %vm4563_vm1, %v4562_v2 }

</bundles_post_ra>
